<compile_context>
chip_gen: v7x
topology: tpu7x:2x2x1
jax: 0.10.0
libtpu: 0.0.40
codegen_flags: <defaults>
</compile_context>

<pallas_src>
import jax
import jax.numpy as jnp
from jax import lax
from jax.experimental import pallas as pl
from jax.experimental.pallas import tpu as pltpu

# ---- hyper-params (faithful to the PyTorch module defaults) ----
EMB_DIM = 300          # emb_dim / query_dim
D_PAD = 384            # EMB_DIM padded to a multiple of 128 (lane-dense)
FEATURE_DIM = 2048
HEADS = 8
DIM_HEAD = 64
INNER = HEADS * DIM_HEAD            # 512
ATTN_SCALE = DIM_HEAD ** -0.5       # 0.125
DUAL_SCALE = 12.0                   # Dual.scale
EPS = 1e-5                          # Dual.eps
NEG_MAX = -jnp.finfo(jnp.float32).max


def _pick_tb(b):
    """Batches per grid step: largest of 8/4/2/1 dividing B, capped at B//2 so
    the grid has >= 2 steps (keeps both v7x TensorCores busy)."""
    tb = 1
    for cand in (8, 4, 2, 1):
        if b % cand == 0:
            tb = cand
            break
    if b > 1:
        tb = max(1, min(tb, b // 2))
    return tb


# --------------------------------------------------------------------------
# Kernel 1 (fused encode_p):
#   hidden = caption + Attention(caption, key_mask)      (hidden stays in VMEM)
#   p      = (span @ hidden) / scale
#   p_emb  = linear_p(p) + eps * linear_mini(p)
# --------------------------------------------------------------------------
def _encode_p_kernel(len_ref, cap_ref, span_ref,
                     wqkv_ref, wo_ref, bo_ref, wpm_ref, bpm_ref,
                     out_ref):
    tb, n, dp = cap_ref.shape
    n_phr = span_ref.shape[1]
    r = tb * n
    bf16 = jnp.bfloat16

    cap = cap_ref[...]                                     # (tb, n, dp) f32
    x = cap.reshape(r, dp)                                 # leading-dim merge (free)
    x16 = x.astype(bf16)

    # ---- fused QKV projection: one (r, 384) @ (384, 1536) MXU pass ----
    qkv = jnp.dot(x16, wqkv_ref[...],
                  preferred_element_type=jnp.float32)      # (r, 1536) f32

    # ---- split heads with lane slices + stack (no in-kernel transposes) ----
    def split_heads(block):                                # (r, 512) -> (H, r, Dh)
        return jnp.stack(
            [block[:, h * DIM_HEAD:(h + 1) * DIM_HEAD] for h in range(HEADS)],
            axis=0)

    q = split_heads(qkv[:, 0 * INNER:1 * INNER]).astype(bf16)
    k = split_heads(qkv[:, 1 * INNER:2 * INNER]).astype(bf16)
    v = split_heads(qkv[:, 2 * INNER:3 * INNER]).astype(bf16)

    # ---- attention over all tb*n tokens, batched over heads (one dot_general)
    sim = jnp.einsum('hid,hjd->hij', q, k,
                     preferred_element_type=jnp.float32)   # (H, r, r)

    # key-validity mask from SMEM scalars + iota; block-diagonal across the
    # tb batches that share this block (exact same per-query softmax as the
    # per-batch reference, keys outside the query's batch are masked out).
    b0 = pl.program_id(0) * tb
    iota_n = lax.broadcasted_iota(jnp.int32, (1, n), 1)
    if tb == 1:
        valid = iota_n < len_ref[b0]                       # (1, n) bool
        sim = jnp.where(valid[None], sim, NEG_MAX)
    else:
        klen = jnp.concatenate(
            [jnp.full((1, n), len_ref[b0 + t], jnp.int32) for t in range(tb)],
            axis=1)                                        # (1, r)
        kpos = jnp.concatenate([iota_n] * tb, axis=1)      # (1, r)
        kbat = jnp.concatenate(
            [jnp.full((1, n), t, jnp.int32) for t in range(tb)], axis=1)
        qbat = jnp.concatenate(
            [jnp.full((n, 1), t, jnp.int32) for t in range(tb)], axis=0)
        valid = (qbat == kbat) & (kpos < klen)             # (r, r) bool
        sim = jnp.where(valid[None], sim, NEG_MAX)

    sim = sim - jnp.max(sim, axis=-1, keepdims=True)
    e = jnp.exp(sim)
    attn = e * pl.reciprocal(jnp.sum(e, axis=-1, keepdims=True), approx=True)

    head_out = jnp.einsum('hij,hjd->hid', attn.astype(bf16), v,
                          preferred_element_type=jnp.float32)  # (H, r, Dh) f32

    # ---- merge heads (lane concat) and project: one full-depth K=512 matmul
    merged = jnp.concatenate([head_out[h] for h in range(HEADS)], axis=-1)
    o = jnp.dot(merged.astype(bf16), wo_ref[...],
                preferred_element_type=jnp.float32)        # (r, dp)
    hidden = x + o + bo_ref[...]                           # residual + bias, f32
    hidden3 = hidden.reshape(tb, n, dp)                    # leading-dim split (free)

    # ---- phrase reduce (masked token sum) / scale ----
    ph = jnp.einsum('tpn,tnd->tpd', span_ref[...], hidden3,
                    preferred_element_type=jnp.float32) * (1.0 / DUAL_SCALE)

    # ---- fused linear_p | linear_mini: one (tb*P, 384) @ (384, 768) matmul;
    #      eps-combine and bias fold stay in f32 so the eps term survives.
    ph2 = ph.reshape(tb * n_phr, dp).astype(bf16)
    lin = jnp.dot(ph2, wpm_ref[...],
                  preferred_element_type=jnp.float32)      # (tb*P, 768)
    emb = lin[:, :dp] + EPS * lin[:, dp:] + bpm_ref[...]
    out_ref[...] = emb.reshape(tb, n_phr, dp).astype(out_ref.dtype)


def _encode_p_call(length, cap, span, prep, tb):
    B, N, Dp = cap.shape
    P = span.shape[1]
    grid = (B // tb,)

    bmap = lambda i, lens: (i, 0, 0)
    const2 = lambda i, lens: (0, 0)

    def wspec(shape):
        # constant-index weights: single-buffer them (VMEM headroom on v7x)
        return pl.BlockSpec(shape, const2, pipeline_mode=pl.Buffered(1))

    grid_spec = pltpu.PrefetchScalarGridSpec(
        num_scalar_prefetch=1,                              # `length` -> SMEM
        grid=grid,
        in_specs=[
            pl.BlockSpec((tb, N, Dp), bmap),                # caption embedding (f32)
            pl.BlockSpec((tb, P, N), bmap),                 # phrase span mask (f32)
            wspec((Dp, 3 * INNER)),                         # fused Wq|Wk|Wv (bf16, scale folded)
            wspec((INNER, Dp)),                             # Wo (bf16)
            wspec((1, Dp)),                                 # bo (f32)
            wspec((Dp, 2 * Dp)),                            # fused Wp|Wm (bf16)
            wspec((1, Dp)),                                 # bp + eps*bm (f32)
        ],
        out_specs=pl.BlockSpec((tb, P, Dp), bmap),
    )
    return pl.pallas_call(
        _encode_p_kernel,
        out_shape=jax.ShapeDtypeStruct((B, P, Dp), jnp.float32),
        grid_spec=grid_spec,
        compiler_params=pltpu.CompilerParams(dimension_semantics=("parallel",)),
    )(length, cap, span,
      prep["wqkv"], prep["wo"], prep["bo"], prep["wpm"], prep["bpm"])


# --------------------------------------------------------------------------
# Kernel 2 (encode_k): k_emb = label_emb + linear_f(feature)
# --------------------------------------------------------------------------
def _encode_k_kernel(lab_ref, feat_ref, wf_ref, bf_ref, out_ref):
    tb, nk, dp = lab_ref.shape
    f_dim = feat_ref.shape[-1]
    feat = feat_ref[...].reshape(tb * nk, f_dim).astype(jnp.bfloat16)
    proj = jnp.dot(feat, wf_ref[...],
                   preferred_element_type=jnp.float32) + bf_ref[...]
    out = lab_ref[...].reshape(tb * nk, dp) + proj
    out_ref[...] = out.reshape(tb, nk, dp).astype(out_ref.dtype)


def _encode_k_call(lab, feature, prep, tb):
    B, K, Dp = lab.shape
    F = feature.shape[-1]
    grid = (B // tb,)
    bmap = lambda i: (i, 0, 0)
    const2 = lambda i: (0, 0)

    grid_spec = pltpu.PrefetchScalarGridSpec(
        num_scalar_prefetch=0,
        grid=grid,
        in_specs=[
            pl.BlockSpec((tb, K, Dp), bmap),                # label embedding (f32)
            pl.BlockSpec((tb, K, F), bmap),                 # feature (f32, cast in-kernel)
            pl.BlockSpec((F, Dp), const2, pipeline_mode=pl.Buffered(1)),
            pl.BlockSpec((1, Dp), const2, pipeline_mode=pl.Buffered(1)),
        ],
        out_specs=pl.BlockSpec((tb, K, Dp), bmap),
    )
    return pl.pallas_call(
        _encode_k_kernel,
        out_shape=jax.ShapeDtypeStruct((B, K, Dp), jnp.float32),
        grid_spec=grid_spec,
        compiler_params=pltpu.CompilerParams(dimension_semantics=("parallel",)),
    )(lab, feature, prep["wf"], prep["bf"])


# --------------------------------------------------------------------------
# Wrapper: one-time parameter prep (padding / fusing / bf16 casts) + forward
# --------------------------------------------------------------------------
def _pad_axis(x, axis, target):
    amount = target - x.shape[axis]
    if amount <= 0:
        return x
    cfg = [(0, 0)] * x.ndim
    cfg[axis] = (0, amount)
    return jnp.pad(x, cfg)


def prepare_params(params):
    """Pad EMB_DIM 300 -> 384 (lane dense), fuse Wq|Wk|Wv and Wp|Wm, fold the
    attention scale into Wq and (bp + eps*bm) in f32, cast matmul weights to
    bf16.  Call ONCE and reuse across forwards."""
    bf16 = jnp.bfloat16
    vec = _pad_axis(params["vectors"], 1, D_PAD)                          # (V, 384)

    wq = _pad_axis(params["wq_t"] * ATTN_SCALE, 0, D_PAD)                 # (384, 512)
    wk = _pad_axis(params["wkv_t"][:, :INNER], 0, D_PAD)
    wv = _pad_axis(params["wkv_t"][:, INNER:], 0, D_PAD)
    wqkv = jnp.concatenate([wq, wk, wv], axis=1).astype(bf16)             # (384, 1536)

    wo = _pad_axis(params["wo_t"], 1, D_PAD).astype(bf16)                 # (512, 384)
    wp = _pad_axis(_pad_axis(params["wp_t"], 0, D_PAD), 1, D_PAD)
    wm = _pad_axis(_pad_axis(params["wm_t"], 0, D_PAD), 1, D_PAD)
    wpm = jnp.concatenate([wp, wm], axis=1).astype(bf16)                  # (384, 768)
    bpm = _pad_axis(params["bp"] + EPS * params["bm"], 1, D_PAD)          # f32 fold

    return {
        "vectors": vec,
        "wqkv": wqkv,
        "wo": wo,
        "bo": _pad_axis(params["bo"], 1, D_PAD),
        "wpm": wpm,
        "bpm": bpm,
        "wf": _pad_axis(params["wf_t"], 1, D_PAD).astype(bf16),           # (2048, 384)
        "bf": _pad_axis(params["bf"], 1, D_PAD),
    }


@jax.jit
def dual_forward(prep, caption_id, phrase_span_mask, length, label, feature):
    B, _ = caption_id.shape
    cap = jnp.take(prep["vectors"], caption_id, axis=0)                   # (B, N, 384) f32
    lab = jnp.take(prep["vectors"], label, axis=0)                        # (B, K, 384) f32
    span = phrase_span_mask.astype(jnp.float32)
    length = length.astype(jnp.int32)
    tb = _pick_tb(B)

    p_pad = _encode_p_call(length, cap, span, prep, tb)                   # (B, P, 384)
    k_pad = _encode_k_call(lab, feature, prep, tb)                        # (B, K, 384)
    return p_pad[..., :EMB_DIM], k_pad[..., :EMB_DIM]


# --------------------------------------------------------------------------
# Pure-JAX reference with the SAME bf16 weight casts (no Pallas) for checking
# --------------------------------------------------------------------------
@jax.jit
def dual_reference(params, caption_id, phrase_span_mask, length, label, feature):
    bf16, f32 = jnp.bfloat16, jnp.float32
    vectors = params["vectors"]
    cap = jnp.take(vectors, caption_id, axis=0)                           # (B, N, 300)
    B, N, D = cap.shape
    x16 = cap.astype(bf16)

    q = jnp.dot(x16, (params["wq_t"] * ATTN_SCALE).astype(bf16),
                preferred_element_type=f32)
    kv = jnp.dot(x16, params["wkv_t"].astype(bf16), preferred_element_type=f32)
    k, v = kv[..., :INNER], kv[..., INNER:]

    def split(t):
        return t.reshape(B, N, HEADS, DIM_HEAD).transpose(0, 2, 1, 3)

    qh, kh, vh = split(q), split(k), split(v)
    sim = jnp.einsum("bhid,bhjd->bhij", qh.astype(bf16), kh.astype(bf16),
                     preferred_element_type=f32)
    valid = jnp.arange(N)[None, :] < length[:, None]
    sim = jnp.where(valid[:, None, None, :], sim, NEG_MAX)
    attn = jax.nn.softmax(sim, axis=-1)
    out = jnp.einsum("bhij,bhjd->bhid", attn.astype(bf16), vh.astype(bf16),
                     preferred_element_type=f32)
    out = out.transpose(0, 2, 1, 3).reshape(B, N, INNER)
    hidden = cap + (jnp.dot(out.astype(bf16), params["wo_t"].astype(bf16),
                            preferred_element_type=f32) + params["bo"])

    p = jnp.einsum("bpn,bnd->bpd", phrase_span_mask.astype(f32), hidden) / DUAL_SCALE
    p16 = p.astype(bf16)
    p_emb = (jnp.dot(p16, params["wp_t"].astype(bf16), preferred_element_type=f32)
             + params["bp"]) + EPS * (
        jnp.dot(p16, params["wm_t"].astype(bf16), preferred_element_type=f32)
        + params["bm"])

    k_emb = jnp.take(vectors, label, axis=0) + (
        jnp.dot(feature.astype(bf16), params["wf_t"].astype(bf16),
                preferred_element_type=f32) + params["bf"])
    return p_emb, k_emb


# --------------------------------------------------------------------------
# Deterministic parameter construction (mirrors Dual.__init__)
# --------------------------------------------------------------------------
def make_params(key, vocab_size):
    ks = jax.random.split(key, 8)
    return {
        # wv = Embedding.from_pretrained(vectors)
        "vectors": jax.random.normal(ks[0], (vocab_size, EMB_DIM), jnp.float32),
        # Attention: to_q, to_kv (no bias), to_out (weight zeroed, bias kept)
        "wq_t": 0.02 * jax.random.normal(ks[1], (EMB_DIM, INNER), jnp.float32),
        "wkv_t": 0.02 * jax.random.normal(ks[2], (EMB_DIM, 2 * INNER), jnp.float32),
        "wo_t": jnp.zeros((INNER, EMB_DIM), jnp.float32),                # zero-init attn out
        "bo": 0.02 * jax.random.normal(ks[3], (1, EMB_DIM), jnp.float32),
        # linear_p: weight = eye
        "wp_t": jnp.eye(EMB_DIM, dtype=jnp.float32),
        "bp": 0.02 * jax.random.normal(ks[4], (1, EMB_DIM), jnp.float32),
        # linear_mini
        "wm_t": 0.02 * jax.random.normal(ks[5], (EMB_DIM, EMB_DIM), jnp.float32),
        "bm": 0.02 * jax.random.normal(ks[6], (1, EMB_DIM), jnp.float32),
        # linear_f: weight = zeros
        "wf_t": jnp.zeros((FEATURE_DIM, EMB_DIM), jnp.float32),
        "bf": 0.02 * jax.random.normal(ks[7], (1, EMB_DIM), jnp.float32),
    }


if __name__ == "__main__":
    B, N, P, K, VOCAB = 2, 8, 3, 4, 50

    key = jax.random.PRNGKey(0)
    kp, kc, ks, kl, kf, kr = jax.random.split(key, 6)

    params = make_params(kp, VOCAB)
    caption_id = jax.random.randint(kc, (B, N), 0, VOCAB, dtype=jnp.int32)
    length = jnp.array([N, N - 3], dtype=jnp.int32)                      # valid token counts
    phrase_span_mask = (jax.random.uniform(ks, (B, P, N)) > 0.5).astype(jnp.float32)
    label = jax.random.randint(kl, (B, K), 0, VOCAB, dtype=jnp.int32)
    feature = jax.random.normal(kf, (B, K, FEATURE_DIM), jnp.float32)

    # --- faithful parameters (zero-init attn-out / linear_f, eye linear_p) ---
    prep = prepare_params(params)                                        # one-time prep
    p_emb, k_emb = dual_forward(prep, caption_id, phrase_span_mask, length, label, feature)
    p_emb = jax.block_until_ready(p_emb)
    k_emb = jax.block_until_ready(k_emb)
    p_ref, k_ref = dual_reference(params, caption_id, phrase_span_mask, length, label, feature)
    assert p_emb.shape == (B, P, EMB_DIM) and k_emb.shape == (B, K, EMB_DIM)
    assert jnp.allclose(p_emb, p_ref, rtol=1e-2, atol=1e-2)
    assert jnp.allclose(k_emb, k_ref, rtol=1e-2, atol=1e-2)

    # --- non-degenerate weights so every matmul path is actually exercised ---
    kw1, kw2, kw3 = jax.random.split(kr, 3)
    rparams = dict(params)
    rparams["wo_t"] = 0.02 * jax.random.normal(kw1, (INNER, EMB_DIM), jnp.float32)
    rparams["wp_t"] = 0.02 * jax.random.normal(kw2, (EMB_DIM, EMB_DIM), jnp.float32)
    rparams["wf_t"] = 0.02 * jax.random.normal(kw3, (FEATURE_DIM, EMB_DIM), jnp.float32)
    rprep = prepare_params(rparams)                                      # same shapes -> no recompile
    p_emb2, k_emb2 = dual_forward(rprep, caption_id, phrase_span_mask, length, label, feature)
    p_emb2 = jax.block_until_ready(p_emb2)
    k_emb2 = jax.block_until_ready(k_emb2)
    p_ref2, k_ref2 = dual_reference(rparams, caption_id, phrase_span_mask, length, label, feature)
    assert jnp.allclose(p_emb2, p_ref2, rtol=1e-2, atol=1e-2)
    assert jnp.allclose(k_emb2, k_ref2, rtol=1e-2, atol=1e-2)

    print("KERNEL_OK")
</pallas_src>

<mosaic_0001>
module attributes {stable_mosaic.version = 11 : i64} {
  func.func @_encode_p_kernel(%arg0: i32, %arg1: memref<2xi32, #tpu.memory_space<smem>>, %arg2: memref<1x8x384xf32, #tpu.memory_space<vmem>>, %arg3: memref<1x3x8xf32, #tpu.memory_space<vmem>>, %arg4: memref<384x1536xbf16, #tpu.memory_space<vmem>>, %arg5: memref<512x384xbf16, #tpu.memory_space<vmem>>, %arg6: memref<1x384xf32, #tpu.memory_space<vmem>>, %arg7: memref<384x768xbf16, #tpu.memory_space<vmem>>, %arg8: memref<1x384xf32, #tpu.memory_space<vmem>>, %arg9: memref<1x3x384xf32, #tpu.memory_space<vmem>>) attributes {dimension_semantics = [#tpu.dimension_semantics<parallel>], iteration_bounds = array<i64: 2>, scalar_prefetch = 1 : i64, scratch_operands = 0 : i64, tpu.core_type = #tpu.core_type<tc>, window_params = [{transform_indices = @transform_0, window_bounds = array<i64: 1, 8, 384>}, {transform_indices = @transform_1, window_bounds = array<i64: 1, 3, 8>}, {pipeline_mode = #tpu.pipeline_mode<synchronous>, transform_indices = @transform_2, window_bounds = array<i64: 384, 1536>}, {pipeline_mode = #tpu.pipeline_mode<synchronous>, transform_indices = @transform_3, window_bounds = array<i64: 512, 384>}, {pipeline_mode = #tpu.pipeline_mode<synchronous>, transform_indices = @transform_4, window_bounds = array<i64: 1, 384>}, {pipeline_mode = #tpu.pipeline_mode<synchronous>, transform_indices = @transform_5, window_bounds = array<i64: 384, 768>}, {pipeline_mode = #tpu.pipeline_mode<synchronous>, transform_indices = @transform_6, window_bounds = array<i64: 1, 384>}, {transform_indices = @transform_7, window_bounds = array<i64: 1, 3, 384>}]} {
    %c0 = arith.constant 0 : index
    %c0_0 = arith.constant 0 : index
    %c0_1 = arith.constant 0 : index
    %0 = vector.load %arg2[%c0, %c0_0, %c0_1] : memref<1x8x384xf32, #tpu.memory_space<vmem>>, vector<1x8x384xf32>
    %1 = vector.shape_cast %0 : vector<1x8x384xf32> to vector<8x384xf32>
    %2 = arith.truncf %1 : vector<8x384xf32> to vector<8x384xbf16>
    %c0_2 = arith.constant 0 : index
    %c0_3 = arith.constant 0 : index
    %3 = vector.load %arg4[%c0_2, %c0_3] : memref<384x1536xbf16, #tpu.memory_space<vmem>>, vector<384x1536xbf16>
    %cst = arith.constant dense<0.000000e+00> : vector<8x1536xf32>
    %4 = tpu.matmul %2, %3, %cst {dimension_numbers = #tpu.dot_dimension_numbers<[1], [0], [0], [1], [0, 0, 1, 1], [], []>} : vector<8x384xbf16>, vector<384x1536xbf16>, vector<8x1536xf32> -> vector<8x1536xf32>
    %5 = vector.extract_strided_slice %4 {offsets = [0, 0], sizes = [8, 512], strides = [1, 1]} : vector<8x1536xf32> to vector<8x512xf32>
    %6 = vector.extract_strided_slice %5 {offsets = [0, 0], sizes = [8, 64], strides = [1, 1]} : vector<8x512xf32> to vector<8x64xf32>
    %7 = vector.extract_strided_slice %5 {offsets = [0, 64], sizes = [8, 64], strides = [1, 1]} : vector<8x512xf32> to vector<8x64xf32>
    %8 = vector.extract_strided_slice %5 {offsets = [0, 128], sizes = [8, 64], strides = [1, 1]} : vector<8x512xf32> to vector<8x64xf32>
    %9 = vector.extract_strided_slice %5 {offsets = [0, 192], sizes = [8, 64], strides = [1, 1]} : vector<8x512xf32> to vector<8x64xf32>
    %10 = vector.extract_strided_slice %5 {offsets = [0, 256], sizes = [8, 64], strides = [1, 1]} : vector<8x512xf32> to vector<8x64xf32>
    %11 = vector.extract_strided_slice %5 {offsets = [0, 320], sizes = [8, 64], strides = [1, 1]} : vector<8x512xf32> to vector<8x64xf32>
    %12 = vector.extract_strided_slice %5 {offsets = [0, 384], sizes = [8, 64], strides = [1, 1]} : vector<8x512xf32> to vector<8x64xf32>
    %13 = vector.extract_strided_slice %5 {offsets = [0, 448], sizes = [8, 64], strides = [1, 1]} : vector<8x512xf32> to vector<8x64xf32>
    %14 = vector.shape_cast %6 : vector<8x64xf32> to vector<1x8x64xf32>
    %15 = vector.shape_cast %7 : vector<8x64xf32> to vector<1x8x64xf32>
    %16 = vector.shape_cast %8 : vector<8x64xf32> to vector<1x8x64xf32>
    %17 = vector.shape_cast %9 : vector<8x64xf32> to vector<1x8x64xf32>
    %18 = vector.shape_cast %10 : vector<8x64xf32> to vector<1x8x64xf32>
    %19 = vector.shape_cast %11 : vector<8x64xf32> to vector<1x8x64xf32>
    %20 = vector.shape_cast %12 : vector<8x64xf32> to vector<1x8x64xf32>
    %21 = vector.shape_cast %13 : vector<8x64xf32> to vector<1x8x64xf32>
    %22 = tpu.concatenate %14, %15, %16, %17, %18, %19, %20, %21 in 0 : vector<1x8x64xf32>, vector<1x8x64xf32>, vector<1x8x64xf32>, vector<1x8x64xf32>, vector<1x8x64xf32>, vector<1x8x64xf32>, vector<1x8x64xf32>, vector<1x8x64xf32> -> vector<8x8x64xf32>
    %23 = arith.truncf %22 : vector<8x8x64xf32> to vector<8x8x64xbf16>
    %24 = vector.extract_strided_slice %4 {offsets = [0, 512], sizes = [8, 512], strides = [1, 1]} : vector<8x1536xf32> to vector<8x512xf32>
    %25 = vector.extract_strided_slice %24 {offsets = [0, 0], sizes = [8, 64], strides = [1, 1]} : vector<8x512xf32> to vector<8x64xf32>
    %26 = vector.extract_strided_slice %24 {offsets = [0, 64], sizes = [8, 64], strides = [1, 1]} : vector<8x512xf32> to vector<8x64xf32>
    %27 = vector.extract_strided_slice %24 {offsets = [0, 128], sizes = [8, 64], strides = [1, 1]} : vector<8x512xf32> to vector<8x64xf32>
    %28 = vector.extract_strided_slice %24 {offsets = [0, 192], sizes = [8, 64], strides = [1, 1]} : vector<8x512xf32> to vector<8x64xf32>
    %29 = vector.extract_strided_slice %24 {offsets = [0, 256], sizes = [8, 64], strides = [1, 1]} : vector<8x512xf32> to vector<8x64xf32>
    %30 = vector.extract_strided_slice %24 {offsets = [0, 320], sizes = [8, 64], strides = [1, 1]} : vector<8x512xf32> to vector<8x64xf32>
    %31 = vector.extract_strided_slice %24 {offsets = [0, 384], sizes = [8, 64], strides = [1, 1]} : vector<8x512xf32> to vector<8x64xf32>
    %32 = vector.extract_strided_slice %24 {offsets = [0, 448], sizes = [8, 64], strides = [1, 1]} : vector<8x512xf32> to vector<8x64xf32>
    %33 = vector.shape_cast %25 : vector<8x64xf32> to vector<1x8x64xf32>
    %34 = vector.shape_cast %26 : vector<8x64xf32> to vector<1x8x64xf32>
    %35 = vector.shape_cast %27 : vector<8x64xf32> to vector<1x8x64xf32>
    %36 = vector.shape_cast %28 : vector<8x64xf32> to vector<1x8x64xf32>
    %37 = vector.shape_cast %29 : vector<8x64xf32> to vector<1x8x64xf32>
    %38 = vector.shape_cast %30 : vector<8x64xf32> to vector<1x8x64xf32>
    %39 = vector.shape_cast %31 : vector<8x64xf32> to vector<1x8x64xf32>
    %40 = vector.shape_cast %32 : vector<8x64xf32> to vector<1x8x64xf32>
    %41 = tpu.concatenate %33, %34, %35, %36, %37, %38, %39, %40 in 0 : vector<1x8x64xf32>, vector<1x8x64xf32>, vector<1x8x64xf32>, vector<1x8x64xf32>, vector<1x8x64xf32>, vector<1x8x64xf32>, vector<1x8x64xf32>, vector<1x8x64xf32> -> vector<8x8x64xf32>
    %42 = arith.truncf %41 : vector<8x8x64xf32> to vector<8x8x64xbf16>
    %43 = vector.extract_strided_slice %4 {offsets = [0, 1024], sizes = [8, 512], strides = [1, 1]} : vector<8x1536xf32> to vector<8x512xf32>
    %44 = vector.extract_strided_slice %43 {offsets = [0, 0], sizes = [8, 64], strides = [1, 1]} : vector<8x512xf32> to vector<8x64xf32>
    %45 = vector.extract_strided_slice %43 {offsets = [0, 64], sizes = [8, 64], strides = [1, 1]} : vector<8x512xf32> to vector<8x64xf32>
    %46 = vector.extract_strided_slice %43 {offsets = [0, 128], sizes = [8, 64], strides = [1, 1]} : vector<8x512xf32> to vector<8x64xf32>
    %47 = vector.extract_strided_slice %43 {offsets = [0, 192], sizes = [8, 64], strides = [1, 1]} : vector<8x512xf32> to vector<8x64xf32>
    %48 = vector.extract_strided_slice %43 {offsets = [0, 256], sizes = [8, 64], strides = [1, 1]} : vector<8x512xf32> to vector<8x64xf32>
    %49 = vector.extract_strided_slice %43 {offsets = [0, 320], sizes = [8, 64], strides = [1, 1]} : vector<8x512xf32> to vector<8x64xf32>
    %50 = vector.extract_strided_slice %43 {offsets = [0, 384], sizes = [8, 64], strides = [1, 1]} : vector<8x512xf32> to vector<8x64xf32>
    %51 = vector.extract_strided_slice %43 {offsets = [0, 448], sizes = [8, 64], strides = [1, 1]} : vector<8x512xf32> to vector<8x64xf32>
    %52 = vector.shape_cast %44 : vector<8x64xf32> to vector<1x8x64xf32>
    %53 = vector.shape_cast %45 : vector<8x64xf32> to vector<1x8x64xf32>
    %54 = vector.shape_cast %46 : vector<8x64xf32> to vector<1x8x64xf32>
    %55 = vector.shape_cast %47 : vector<8x64xf32> to vector<1x8x64xf32>
    %56 = vector.shape_cast %48 : vector<8x64xf32> to vector<1x8x64xf32>
    %57 = vector.shape_cast %49 : vector<8x64xf32> to vector<1x8x64xf32>
    %58 = vector.shape_cast %50 : vector<8x64xf32> to vector<1x8x64xf32>
    %59 = vector.shape_cast %51 : vector<8x64xf32> to vector<1x8x64xf32>
    %60 = tpu.concatenate %52, %53, %54, %55, %56, %57, %58, %59 in 0 : vector<1x8x64xf32>, vector<1x8x64xf32>, vector<1x8x64xf32>, vector<1x8x64xf32>, vector<1x8x64xf32>, vector<1x8x64xf32>, vector<1x8x64xf32>, vector<1x8x64xf32> -> vector<8x8x64xf32>
    %61 = arith.truncf %60 : vector<8x8x64xf32> to vector<8x8x64xbf16>
    "tpu.trace_start"() <{level = 10 : i32, message = "hid,hjd->hij"}> : () -> ()
    %cst_4 = arith.constant dense<0.000000e+00> : vector<8x8x8xf32>
    %62 = tpu.matmul %23, %42, %cst_4 {dimension_numbers = #tpu.dot_dimension_numbers<[2], [2], [1], [1], [0, 0, 0, 1, 1, 1], [0], [0]>} : vector<8x8x64xbf16>, vector<8x8x64xbf16>, vector<8x8x8xf32> -> vector<8x8x8xf32>
    "tpu.trace_stop"() : () -> ()
    %c1_i32 = arith.constant 1 : i32
    %63 = arith.muli %arg0, %c1_i32 : i32
    %64 = tpu.iota {dimensions = array<i32: 1>} : vector<1x8xi32>
    %65 = arith.index_cast %63 : i32 to index
    %66 = memref.load %arg1[%65] : memref<2xi32, #tpu.memory_space<smem>>
    %67 = vector.broadcast %66 : i32 to vector<1x8xi32>
    %68 = arith.cmpi slt, %64, %67 : vector<1x8xi32>
    %69 = vector.shape_cast %68 : vector<1x8xi1> to vector<1x1x8xi1>
    %cst_5 = arith.constant -3.40282347E+38 : f32
    %70 = vector.shape_cast %69 : vector<1x1x8xi1> to vector<1x1x8xi1>
    %71 = vector.broadcast %70 : vector<1x1x8xi1> to vector<8x8x8xi1>
    %72 = vector.broadcast %cst_5 : f32 to vector<8x8x8xf32>
    %73 = arith.select %71, %62, %72 : vector<8x8x8xi1>, vector<8x8x8xf32>
    %cst_6 = arith.constant dense<0xFF800000> : vector<8x8xf32>
    %74 = vector.multi_reduction <maximumf>, %73, %cst_6 [2] : vector<8x8x8xf32> to vector<8x8xf32>
    %75 = vector.shape_cast %74 : vector<8x8xf32> to vector<8x8x1xf32>
    %76 = vector.broadcast %75 : vector<8x8x1xf32> to vector<8x8x8xf32>
    %77 = arith.subf %73, %76 : vector<8x8x8xf32>
    %78 = math.exp %77 : vector<8x8x8xf32>
    %cst_7 = arith.constant dense<0.000000e+00> : vector<8x8xf32>
    %79 = vector.multi_reduction <add>, %78, %cst_7 [2] : vector<8x8x8xf32> to vector<8x8xf32>
    %80 = vector.shape_cast %79 : vector<8x8xf32> to vector<8x8x1xf32>
    %81 = tpu.reciprocal %80 {approx = true} : vector<8x8x1xf32> -> vector<8x8x1xf32>
    %82 = vector.broadcast %81 : vector<8x8x1xf32> to vector<8x8x8xf32>
    %83 = arith.mulf %78, %82 : vector<8x8x8xf32>
    %84 = arith.truncf %83 : vector<8x8x8xf32> to vector<8x8x8xbf16>
    "tpu.trace_start"() <{level = 10 : i32, message = "hij,hjd->hid"}> : () -> ()
    %cst_8 = arith.constant dense<0.000000e+00> : vector<8x8x64xf32>
    %85 = tpu.matmul %84, %61, %cst_8 {dimension_numbers = #tpu.dot_dimension_numbers<[2], [1], [1], [2], [0, 0, 0, 1, 1, 2], [0], [0]>} : vector<8x8x8xbf16>, vector<8x8x64xbf16>, vector<8x8x64xf32> -> vector<8x8x64xf32>
    "tpu.trace_stop"() : () -> ()
    %86 = vector.extract_strided_slice %85 {offsets = [0, 0, 0], sizes = [1, 8, 64], strides = [1, 1, 1]} : vector<8x8x64xf32> to vector<1x8x64xf32>
    %87 = vector.shape_cast %86 : vector<1x8x64xf32> to vector<8x64xf32>
    %88 = vector.extract_strided_slice %85 {offsets = [1, 0, 0], sizes = [1, 8, 64], strides = [1, 1, 1]} : vector<8x8x64xf32> to vector<1x8x64xf32>
    %89 = vector.shape_cast %88 : vector<1x8x64xf32> to vector<8x64xf32>
    %90 = vector.extract_strided_slice %85 {offsets = [2, 0, 0], sizes = [1, 8, 64], strides = [1, 1, 1]} : vector<8x8x64xf32> to vector<1x8x64xf32>
    %91 = vector.shape_cast %90 : vector<1x8x64xf32> to vector<8x64xf32>
    %92 = vector.extract_strided_slice %85 {offsets = [3, 0, 0], sizes = [1, 8, 64], strides = [1, 1, 1]} : vector<8x8x64xf32> to vector<1x8x64xf32>
    %93 = vector.shape_cast %92 : vector<1x8x64xf32> to vector<8x64xf32>
    %94 = vector.extract_strided_slice %85 {offsets = [4, 0, 0], sizes = [1, 8, 64], strides = [1, 1, 1]} : vector<8x8x64xf32> to vector<1x8x64xf32>
    %95 = vector.shape_cast %94 : vector<1x8x64xf32> to vector<8x64xf32>
    %96 = vector.extract_strided_slice %85 {offsets = [5, 0, 0], sizes = [1, 8, 64], strides = [1, 1, 1]} : vector<8x8x64xf32> to vector<1x8x64xf32>
    %97 = vector.shape_cast %96 : vector<1x8x64xf32> to vector<8x64xf32>
    %98 = vector.extract_strided_slice %85 {offsets = [6, 0, 0], sizes = [1, 8, 64], strides = [1, 1, 1]} : vector<8x8x64xf32> to vector<1x8x64xf32>
    %99 = vector.shape_cast %98 : vector<1x8x64xf32> to vector<8x64xf32>
    %100 = vector.extract_strided_slice %85 {offsets = [7, 0, 0], sizes = [1, 8, 64], strides = [1, 1, 1]} : vector<8x8x64xf32> to vector<1x8x64xf32>
    %101 = vector.shape_cast %100 : vector<1x8x64xf32> to vector<8x64xf32>
    %102 = tpu.concatenate %87, %89, %91, %93, %95, %97, %99, %101 in 1 : vector<8x64xf32>, vector<8x64xf32>, vector<8x64xf32>, vector<8x64xf32>, vector<8x64xf32>, vector<8x64xf32>, vector<8x64xf32>, vector<8x64xf32> -> vector<8x512xf32>
    %103 = arith.truncf %102 : vector<8x512xf32> to vector<8x512xbf16>
    %c0_9 = arith.constant 0 : index
    %c0_10 = arith.constant 0 : index
    %104 = vector.load %arg5[%c0_9, %c0_10] : memref<512x384xbf16, #tpu.memory_space<vmem>>, vector<512x384xbf16>
    %cst_11 = arith.constant dense<0.000000e+00> : vector<8x384xf32>
    %105 = tpu.matmul %103, %104, %cst_11 {dimension_numbers = #tpu.dot_dimension_numbers<[1], [0], [0], [1], [0, 0, 1, 1], [], []>} : vector<8x512xbf16>, vector<512x384xbf16>, vector<8x384xf32> -> vector<8x384xf32>
    %106 = arith.addf %1, %105 : vector<8x384xf32>
    %c0_12 = arith.constant 0 : index
    %c0_13 = arith.constant 0 : index
    %107 = vector.load %arg6[%c0_12, %c0_13] : memref<1x384xf32, #tpu.memory_space<vmem>>, vector<1x384xf32>
    %108 = vector.broadcast %107 : vector<1x384xf32> to vector<8x384xf32>
    %109 = arith.addf %106, %108 : vector<8x384xf32>
    %110 = vector.shape_cast %109 : vector<8x384xf32> to vector<1x8x384xf32>
    %c0_14 = arith.constant 0 : index
    %c0_15 = arith.constant 0 : index
    %c0_16 = arith.constant 0 : index
    %111 = vector.load %arg3[%c0_14, %c0_15, %c0_16] : memref<1x3x8xf32, #tpu.memory_space<vmem>>, vector<1x3x8xf32>
    "tpu.trace_start"() <{level = 10 : i32, message = "tpn,tnd->tpd"}> : () -> ()
    %cst_17 = arith.constant dense<0.000000e+00> : vector<1x3x384xf32>
    %112 = tpu.matmul %111, %110, %cst_17 {dimension_numbers = #tpu.dot_dimension_numbers<[2], [1], [1], [2], [0, 0, 0, 1, 1, 2], [0], [0]>} : vector<1x3x8xf32>, vector<1x8x384xf32>, vector<1x3x384xf32> -> vector<1x3x384xf32>
    "tpu.trace_stop"() : () -> ()
    %cst_18 = arith.constant 0.0833333358 : f32
    %113 = vector.broadcast %cst_18 : f32 to vector<1x3x384xf32>
    %114 = arith.mulf %112, %113 : vector<1x3x384xf32>
    %115 = vector.shape_cast %114 : vector<1x3x384xf32> to vector<3x384xf32>
    %116 = arith.truncf %115 : vector<3x384xf32> to vector<3x384xbf16>
    %c0_19 = arith.constant 0 : index
    %c0_20 = arith.constant 0 : index
    %117 = vector.load %arg7[%c0_19, %c0_20] : memref<384x768xbf16, #tpu.memory_space<vmem>>, vector<384x768xbf16>
    %cst_21 = arith.constant dense<0.000000e+00> : vector<3x768xf32>
    %118 = tpu.matmul %116, %117, %cst_21 {dimension_numbers = #tpu.dot_dimension_numbers<[1], [0], [0], [1], [0, 0, 1, 1], [], []>} : vector<3x384xbf16>, vector<384x768xbf16>, vector<3x768xf32> -> vector<3x768xf32>
    %119 = vector.extract_strided_slice %118 {offsets = [0, 0], sizes = [3, 384], strides = [1, 1]} : vector<3x768xf32> to vector<3x384xf32>
    %120 = vector.extract_strided_slice %118 {offsets = [0, 384], sizes = [3, 384], strides = [1, 1]} : vector<3x768xf32> to vector<3x384xf32>
    %cst_22 = arith.constant 9.99999974E-6 : f32
    %121 = vector.broadcast %cst_22 : f32 to vector<3x384xf32>
    %122 = arith.mulf %121, %120 : vector<3x384xf32>
    %123 = arith.addf %119, %122 : vector<3x384xf32>
    %c0_23 = arith.constant 0 : index
    %c0_24 = arith.constant 0 : index
    %124 = vector.load %arg8[%c0_23, %c0_24] : memref<1x384xf32, #tpu.memory_space<vmem>>, vector<1x384xf32>
    %125 = vector.broadcast %124 : vector<1x384xf32> to vector<3x384xf32>
    %126 = arith.addf %123, %125 : vector<3x384xf32>
    %127 = vector.shape_cast %126 : vector<3x384xf32> to vector<1x3x384xf32>
    %c0_25 = arith.constant 0 : index
    %c0_26 = arith.constant 0 : index
    %c0_27 = arith.constant 0 : index
    %128 = vector.load %arg9[%c0_25, %c0_26, %c0_27] : memref<1x3x384xf32, #tpu.memory_space<vmem>>, vector<1x3x384xf32>
    tpu.vector_store %arg9[%c0_25, %c0_26, %c0_27], %127 {strides = array<i32>} : memref<1x3x384xf32, #tpu.memory_space<vmem>>, vector<1x3x384xf32>,
    return
  }
  func.func @transform_0(%arg0: i32, %arg1: memref<2xi32, #tpu.memory_space<smem>>) -> (i32, i32, i32) {
    %c0_i32 = arith.constant 0 : i32
    %c0_i32_0 = arith.constant 0 : i32
    %c0_i32_1 = arith.constant 0 : i32
    return %arg0, %c0_i32, %c0_i32_0 : i32, i32, i32
  }
  func.func @transform_1(%arg0: i32, %arg1: memref<2xi32, #tpu.memory_space<smem>>) -> (i32, i32, i32) {
    %c0_i32 = arith.constant 0 : i32
    %c0_i32_0 = arith.constant 0 : i32
    %c0_i32_1 = arith.constant 0 : i32
    return %arg0, %c0_i32, %c0_i32_0 : i32, i32, i32
  }
  func.func @transform_2(%arg0: i32, %arg1: memref<2xi32, #tpu.memory_space<smem>>) -> (i32, i32) {
    %c0_i32 = arith.constant 0 : i32
    %c0_i32_0 = arith.constant 0 : i32
    %c0_i32_1 = arith.constant 0 : i32
    return %c0_i32, %c0_i32_0 : i32, i32
  }
  func.func @transform_3(%arg0: i32, %arg1: memref<2xi32, #tpu.memory_space<smem>>) -> (i32, i32) {
    %c0_i32 = arith.constant 0 : i32
    %c0_i32_0 = arith.constant 0 : i32
    %c0_i32_1 = arith.constant 0 : i32
    return %c0_i32, %c0_i32_0 : i32, i32
  }
  func.func @transform_4(%arg0: i32, %arg1: memref<2xi32, #tpu.memory_space<smem>>) -> (i32, i32) {
    %c0_i32 = arith.constant 0 : i32
    %c0_i32_0 = arith.constant 0 : i32
    %c0_i32_1 = arith.constant 0 : i32
    return %c0_i32, %c0_i32_0 : i32, i32
  }
  func.func @transform_5(%arg0: i32, %arg1: memref<2xi32, #tpu.memory_space<smem>>) -> (i32, i32) {
    %c0_i32 = arith.constant 0 : i32
    %c0_i32_0 = arith.constant 0 : i32
    %c0_i32_1 = arith.constant 0 : i32
    return %c0_i32, %c0_i32_0 : i32, i32
  }
  func.func @transform_6(%arg0: i32, %arg1: memref<2xi32, #tpu.memory_space<smem>>) -> (i32, i32) {
    %c0_i32 = arith.constant 0 : i32
    %c0_i32_0 = arith.constant 0 : i32
    %c0_i32_1 = arith.constant 0 : i32
    return %c0_i32, %c0_i32_0 : i32, i32
  }
  func.func @transform_7(%arg0: i32, %arg1: memref<2xi32, #tpu.memory_space<smem>>) -> (i32, i32, i32) {
    %c0_i32 = arith.constant 0 : i32
    %c0_i32_0 = arith.constant 0 : i32
    %c0_i32_1 = arith.constant 0 : i32
    return %arg0, %c0_i32, %c0_i32_0 : i32, i32, i32
  }
}

module attributes {stable_mosaic.version = 11 : i64} {
  func.func @_encode_k_kernel(%arg0: i32, %arg1: memref<1x4x384xf32, #tpu.memory_space<vmem>>, %arg2: memref<1x4x2048xf32, #tpu.memory_space<vmem>>, %arg3: memref<2048x384xbf16, #tpu.memory_space<vmem>>, %arg4: memref<1x384xf32, #tpu.memory_space<vmem>>, %arg5: memref<1x4x384xf32, #tpu.memory_space<vmem>>) attributes {dimension_semantics = [#tpu.dimension_semantics<parallel>], iteration_bounds = array<i64: 2>, scalar_prefetch = 0 : i64, scratch_operands = 0 : i64, tpu.core_type = #tpu.core_type<tc>, window_params = [{transform_indices = @transform_0, window_bounds = array<i64: 1, 4, 384>}, {transform_indices = @transform_1, window_bounds = array<i64: 1, 4, 2048>}, {pipeline_mode = #tpu.pipeline_mode<synchronous>, transform_indices = @transform_2, window_bounds = array<i64: 2048, 384>}, {pipeline_mode = #tpu.pipeline_mode<synchronous>, transform_indices = @transform_3, window_bounds = array<i64: 1, 384>}, {transform_indices = @transform_4, window_bounds = array<i64: 1, 4, 384>}]} {
    %c0 = arith.constant 0 : index
    %c0_0 = arith.constant 0 : index
    %c0_1 = arith.constant 0 : index
    %0 = vector.load %arg2[%c0, %c0_0, %c0_1] : memref<1x4x2048xf32, #tpu.memory_space<vmem>>, vector<1x4x2048xf32>
    %1 = vector.shape_cast %0 : vector<1x4x2048xf32> to vector<4x2048xf32>
    %2 = arith.truncf %1 : vector<4x2048xf32> to vector<4x2048xbf16>
    %c0_2 = arith.constant 0 : index
    %c0_3 = arith.constant 0 : index
    %3 = vector.load %arg3[%c0_2, %c0_3] : memref<2048x384xbf16, #tpu.memory_space<vmem>>, vector<2048x384xbf16>
    %cst = arith.constant dense<0.000000e+00> : vector<4x384xf32>
    %4 = tpu.matmul %2, %3, %cst {dimension_numbers = #tpu.dot_dimension_numbers<[1], [0], [0], [1], [0, 0, 1, 1], [], []>} : vector<4x2048xbf16>, vector<2048x384xbf16>, vector<4x384xf32> -> vector<4x384xf32>
    %c0_4 = arith.constant 0 : index
    %c0_5 = arith.constant 0 : index
    %5 = vector.load %arg4[%c0_4, %c0_5] : memref<1x384xf32, #tpu.memory_space<vmem>>, vector<1x384xf32>
    %6 = vector.broadcast %5 : vector<1x384xf32> to vector<4x384xf32>
    %7 = arith.addf %4, %6 : vector<4x384xf32>
    %c0_6 = arith.constant 0 : index
    %c0_7 = arith.constant 0 : index
    %c0_8 = arith.constant 0 : index
    %8 = vector.load %arg1[%c0_6, %c0_7, %c0_8] : memref<1x4x384xf32, #tpu.memory_space<vmem>>, vector<1x4x384xf32>
    %9 = vector.shape_cast %8 : vector<1x4x384xf32> to vector<4x384xf32>
    %10 = arith.addf %9, %7 : vector<4x384xf32>
    %11 = vector.shape_cast %10 : vector<4x384xf32> to vector<1x4x384xf32>
    %c0_9 = arith.constant 0 : index
    %c0_10 = arith.constant 0 : index
    %c0_11 = arith.constant 0 : index
    %12 = vector.load %arg5[%c0_9, %c0_10, %c0_11] : memref<1x4x384xf32, #tpu.memory_space<vmem>>, vector<1x4x384xf32>
    tpu.vector_store %arg5[%c0_9, %c0_10, %c0_11], %11 {strides = array<i32>} : memref<1x4x384xf32, #tpu.memory_space<vmem>>, vector<1x4x384xf32>,
    return
  }
  func.func @transform_0(%arg0: i32) -> (i32, i32, i32) {
    %c0_i32 = arith.constant 0 : i32
    %c0_i32_0 = arith.constant 0 : i32
    %c0_i32_1 = arith.constant 0 : i32
    return %arg0, %c0_i32, %c0_i32_0 : i32, i32, i32
  }
  func.func @transform_1(%arg0: i32) -> (i32, i32, i32) {
    %c0_i32 = arith.constant 0 : i32
    %c0_i32_0 = arith.constant 0 : i32
    %c0_i32_1 = arith.constant 0 : i32
    return %arg0, %c0_i32, %c0_i32_0 : i32, i32, i32
  }
  func.func @transform_2(%arg0: i32) -> (i32, i32) {
    %c0_i32 = arith.constant 0 : i32
    %c0_i32_0 = arith.constant 0 : i32
    %c0_i32_1 = arith.constant 0 : i32
    return %c0_i32, %c0_i32_0 : i32, i32
  }
  func.func @transform_3(%arg0: i32) -> (i32, i32) {
    %c0_i32 = arith.constant 0 : i32
    %c0_i32_0 = arith.constant 0 : i32
    %c0_i32_1 = arith.constant 0 : i32
    return %c0_i32, %c0_i32_0 : i32, i32
  }
  func.func @transform_4(%arg0: i32) -> (i32, i32, i32) {
    %c0_i32 = arith.constant 0 : i32
    %c0_i32_0 = arith.constant 0 : i32
    %c0_i32_1 = arith.constant 0 : i32
    return %arg0, %c0_i32, %c0_i32_0 : i32, i32, i32
  }
}

</mosaic_0001>

<bundles_post_ra>
// kernel: dual_forward.3
= control target key start
LH: loop header
LB: loop body
LE: loop exit
PB: predicated region body
PF: predicated region fallthrough
CT: control target
= control target key end

     0   :  { %9 = vsyncpa [#allocation3], 0  ;;  %s6215_s0 = inlined_call_operand.vmem [shape: f32[2,4,384], index: 0, kind: input, shape index: {}]   ;;  %s6216_s1 = inlined_call_operand.vmem [shape: f32[2,4,2048], index: 1, kind: input, shape index: {}]   ;;  %s6217_s2 = inlined_call_operand.vmem [shape: bf16[2048,384], index: 2, kind: input, shape index: {}]   ;;  %s6218_s3 = inlined_call_operand.vmem [shape: f32[1,384], index: 3, kind: input, shape index: {}]   ;;  %s6219_s4 = inlined_call_operand.hbm [shape: f32[2,4,384], index: 4, kind: output, shape index: {}]  }
   0x1   :  { %11 = vsyncpa [#allocation3 + $0x1], 0  ;;  %s4837_s15 = smov 0   ;;  %s4839_s16 = smov 0  }
   0x2   :  { %s4841_s17 = smov 0   ;;  %s4843_s18 = smov 0  }
   0x3 LB: > { %s4858_s19 = sadd.s32 4294967295, %s4809_s18   ;;  %s3586_s20 = sadd.s32 4294967294, %s4809_s18   ;;  %s4809_s18 = sphi %s4843_s18, %s6225_s18   ;;  %s4805_s17 = sphi %s4841_s17, %s6224_s17   ;;  %s4801_s16 = sphi %s4839_s16, %s6223_s16   ;;  %s4797_s15 = sphi %s4837_s15, %s6222_s15  }
   0x4   : > { %s4862_s21 = sadd.s32 1, %s4809_s18   ;;  %s118_s22 = sadd.s32 1, %s4805_s17 }
   0x5   : > { %s115_s23 = ssub.s32 %s4809_s18, %s4862_s21  ;;  %p128_p0 = scmp.ne.s32.totalorder %s4805_s17, %s4801_s16 }
   0x6   : > { %p116_p1 = scmp.eq.s32.totalorder %s115_s23, 0  ;;  %p129_p2 = scmp.eq.s32.totalorder %s4858_s19, 1 }
   0x7   : > { %p134_p3 = scmp.ne.s32.totalorder %s4801_s16, %s4797_s15  ;;  %p135_p4 = scmp.eq.s32.totalorder %s3586_s20, 1 }
   0x8   : > { %s4873_s24 = scalar_select %p116_p1, %s4805_s17, %s118_s22  }
   0x9   : > { %p4875_p5 = por %p129_p2, %p128_p0  ;;  %p4879_p6 = por %p135_p4, %p134_p3 }
   0xa   : > { %p3589_p7 = scmp.ge.s32.totalorder %s4809_s18, 1  ;;  %p175_p8 = scmp.lt.s32.totalorder %s4809_s18, 3 }
   0xc   : > { %p176_p9 = pnand %p3589_p7, %p175_p8 }
   0xd   : > { %v4227_v0 = vld [vmem:[%s6217_s2 + $0x4] ss:$12 sps:$4 sm:$0xff] (!%p176_p9)   ;;  %v4231_v2 = vld [vmem:[%s6217_s2] ss:$12 sps:$4 sm:$0xff] (!%p176_p9)   ;;  %v4233_v4 = vld [vmem:[%s6217_s2 + $0x1c] ss:$12 sps:$4 sm:$0xff] (!%p176_p9)  }
   0xe   : > { %179 = sbr.rel (%p176_p9) target bundleno = 632 (0x278), region = 36  ;;  %v4229_v1 = vld [vmem:[%s6217_s2 + $0x304] ss:$12 sps:$4 sm:$0xff] (!%p176_p9)   ;;  %2842 = vmatprep.subr.bf16.mxu1 (!%p176_p9), %v4227_v0  ;;  %v4232_v3 = vld [vmem:[%s6217_s2 + $0x300] ss:$12 sps:$4 sm:$0xff] (!%p176_p9)   ;;  %p206_p10 = scmp.lt.s32.totalorder (!%p176_p9), %s4858_s19, 1 }
   0xf   : > { %2924 = vmatprep.subr.bf16.mxu0 (!%p176_p9), %v4229_v1  ;;  %2843 = vmatpush1.bf16.msra.mxu1 (!%p176_p9), %v4231_v2  ;;  %v4235_v5 = vld [vmem:[%s6217_s2 + $0x31c] ss:$12 sps:$4 sm:$0xff] (!%p176_p9)   ;;  %v4237_v6 = vld [vmem:[%s6217_s2 + $0x18] ss:$12 sps:$4 sm:$0xff] (!%p176_p9)   ;;  %v4239_v8 = vld [vmem:[%s6217_s2 + $0x34] ss:$12 sps:$4 sm:$0xff] (!%p176_p9)  }
  0x10   : > { %2925 = vmatpush1.bf16.msra.mxu0 (!%p176_p9), %v4232_v3  ;;  %2844 = vmatprep.subr.bf16.mxu1 (!%p176_p9), %v4233_v4  ;;  %v4238_v7 = vld [vmem:[%s6217_s2 + $0x318] ss:$12 sps:$4 sm:$0xff] (!%p176_p9)   ;;  %v4241_v9 = vld [vmem:[%s6217_s2 + $0x334] ss:$12 sps:$4 sm:$0xff] (!%p176_p9)   ;;  %v4243_v10 = vld [vmem:[%s6217_s2 + $0x30] ss:$12 sps:$4 sm:$0xff] (!%p176_p9)  }
  0x11   : > { %2926 = vmatprep.subr.bf16.mxu0 (!%p176_p9), %v4235_v5  ;;  %v4244_v11 = vld [vmem:[%s6217_s2 + $0x330] ss:$12 sps:$4 sm:$0xff] (!%p176_p9)   ;;  %v4245_v12 = vld [vmem:[%s6217_s2 + $0x4c] ss:$12 sps:$4 sm:$0xff] (!%p176_p9)   ;;  %v4249_v14 = vld [vmem:[%s6217_s2 + $0x48] ss:$12 sps:$4 sm:$0xff] (!%p176_p9)  }
  0x12   : > { %v4247_v13 = vld [vmem:[%s6217_s2 + $0x34c] ss:$12 sps:$4 sm:$0xff] (!%p176_p9)   ;;  %v4250_v15 = vld [vmem:[%s6217_s2 + $0x348] ss:$12 sps:$4 sm:$0xff] (!%p176_p9)   ;;  %v4251_v16 = vld [vmem:[%s6217_s2 + $0x64] ss:$12 sps:$4 sm:$0xff] (!%p176_p9)  }
  0x13   : > { %2845 = vmatpush1.bf16.msra.mxu1 (!%p176_p9), %v4237_v6  ;;  %v4253_v17 = vld [vmem:[%s6217_s2 + $0x364] ss:$12 sps:$4 sm:$0xff] (!%p176_p9)   ;;  %v4255_v18 = vld [vmem:[%s6217_s2 + $0x60] ss:$12 sps:$4 sm:$0xff] (!%p176_p9)   ;;  %v4257_v20 = vld [vmem:[%s6217_s2 + $0x7c] ss:$12 sps:$4 sm:$0xff] (!%p176_p9)  }
  0x14   : > { %2927 = vmatpush1.bf16.msra.mxu0 (!%p176_p9), %v4238_v7  ;;  %2846 = vmatprep.subr.bf16.mxu1 (!%p176_p9), %v4239_v8  ;;  %v4256_v19 = vld [vmem:[%s6217_s2 + $0x360] ss:$12 sps:$4 sm:$0xff] (!%p176_p9)   ;;  %v4259_v21 = vld [vmem:[%s6217_s2 + $0x37c] ss:$12 sps:$4 sm:$0xff] (!%p176_p9)   ;;  %v4261_v22 = vld [vmem:[%s6217_s2 + $0x78] ss:$12 sps:$4 sm:$0xff] (!%p176_p9)  }
  0x15   : > { %2928 = vmatprep.subr.bf16.mxu0 %v4241_v9  ;;  %v4262_v23 = vld [vmem:[%s6217_s2 + $0x378] ss:$12 sps:$4 sm:$0xff]   ;;  %v4263_v24 = vld [vmem:[%s6217_s2 + $0x94] ss:$12 sps:$4 sm:$0xff]   ;;  %v4267_v26 = vld [vmem:[%s6217_s2 + $0x90] ss:$12 sps:$4 sm:$0xff]  }
  0x16   : > { %v4265_v25 = vld [vmem:[%s6217_s2 + $0x394] ss:$12 sps:$4 sm:$0xff]   ;;  %v4268_v27 = vld [vmem:[%s6217_s2 + $0x390] ss:$12 sps:$4 sm:$0xff]   ;;  %v4269_v28 = vld [vmem:[%s6217_s2 + $0xac] ss:$12 sps:$4 sm:$0xff]  }
  0x17   : > { %2847 = vmatpush1.bf16.msra.mxu1 %v4243_v10  ;;  %v4271_v29 = vld [vmem:[%s6217_s2 + $0x3ac] ss:$12 sps:$4 sm:$0xff]   ;;  %v4273_v30 = vld [vmem:[%s6217_s2 + $0xa8] ss:$12 sps:$4 sm:$0xff]   ;;  %v4275_v32 = vld [vmem:[%s6217_s2 + $0xc4] ss:$12 sps:$4 sm:$0xff]  }
  0x18   : > { %2929 = vmatpush1.bf16.msra.mxu0 %v4244_v11  ;;  %2848 = vmatprep.subr.bf16.mxu1 %v4245_v12  ;;  %v4274_v31 = vld [vmem:[%s6217_s2 + $0x3a8] ss:$12 sps:$4 sm:$0xff]   ;;  %v4277_v33 = vld [vmem:[%s6217_s2 + $0x3c4] ss:$12 sps:$4 sm:$0xff]   ;;  %v4279_v34 = vld [vmem:[%s6217_s2 + $0xc0] ss:$12 sps:$4 sm:$0xff]  }
  0x19   : > { %2930 = vmatprep.subr.bf16.mxu0 %v4247_v13  ;;  %v4280_v35 = vld [vmem:[%s6217_s2 + $0x3c0] ss:$12 sps:$4 sm:$0xff]   ;;  %v4281_v36 = vld [vmem:[%s6217_s2 + $0xdc] ss:$12 sps:$4 sm:$0xff]   ;;  %s4998_s7 = scalar_select %p206_p10, %s4858_s19, 1 }
  0x1a   : > { %v4283_v37 = vld [vmem:[%s6217_s2 + $0x3dc] ss:$12 sps:$4 sm:$0xff]   ;;  %v4285_v38 = vld [vmem:[%s6217_s2 + $0xd8] ss:$12 sps:$4 sm:$0xff]   ;;  %v4287_v40 = vld [vmem:[%s6217_s2 + $0xf4] ss:$12 sps:$4 sm:$0xff]  }
  0x1b   : > { %2849 = vmatpush1.bf16.msra.mxu1 %v4249_v14  ;;  %v4286_v39 = vld [vmem:[%s6217_s2 + $0x3d8] ss:$12 sps:$4 sm:$0xff]   ;;  %s3980_s22 = sshll.u32 %s4998_s7, 6  ;;  %v4289_v41 = vld [vmem:[%s6217_s2 + $0x3f4] ss:$12 sps:$4 sm:$0xff]   ;;  %s203_s8 = sand.u32 1, %s4801_s16  }
  0x1c   : > { %2931 = vmatpush1.bf16.msra.mxu0 %v4250_v15  ;;  %2850 = vmatprep.subr.bf16.mxu1 %v4251_v16  ;;  %v4291_v42 = vld [vmem:[%s6217_s2 + $0xf0] ss:$12 sps:$4 sm:$0xff]   ;;  %s5025_s9 = scalar_lea.vmem %s6216_s1, %s3980_s22  ;;  %v4293_v44 = vld [vmem:[%s6217_s2 + $0x10c] ss:$12 sps:$4 sm:$0xff]   ;;  %v4297_v47 = vld [vmem:[%s6217_s2 + $0x108] ss:$12 sps:$4 sm:$0xff]  }
  0x1d   : > { %2932 = vmatprep.subr.bf16.mxu0 %v4253_v17  ;;  %v4292_v43 = vld [vmem:[%s6217_s2 + $0x3f0] ss:$12 sps:$4 sm:$0xff]   ;;  %v4295_v45 = vld [vmem:[%s6217_s2 + $0x40c] ss:$12 sps:$4 sm:$0xff]   ;;  %v217_v46 = vld [vmem:[%s5025_s9] sm:$0xff]  ;;  %s4186_s10 = smul.u32 12, %s4998_s7 }
  0x1e   : > { %v233_v48 = vcombine.high %v217_v46, %v217_v46  ;;  %v4298_v49 = vld [vmem:[%s6217_s2 + $0x408] ss:$12 sps:$4 sm:$0xff]   ;;  %v4299_v51 = vld [vmem:[%s6217_s2 + $0x124] ss:$12 sps:$4 sm:$0xff]   ;;  %v4303_v56 = vld [vmem:[%s6217_s2 + $0x120] ss:$12 sps:$4 sm:$0xff]   ;;  %v5101_v8 = vpack.c.bf16 %v217_v46, %v217_v46 }
  0x1f   : > { %2851 = vmatpush1.bf16.msra.mxu1 %v4255_v18  ;;  %v219_v50 = vld [vmem:[%s5025_s9 + $0x10] sm:$0xff]  ;;  %v4304_v57 = vld [vmem:[%s6217_s2 + $0x420] ss:$12 sps:$4 sm:$0xff]   ;;  %v4305_v58 = vld [vmem:[%s6217_s2 + $0x13c] ss:$12 sps:$4 sm:$0xff]   ;;  %s210_s13 = scalar_lea.vmem %s6215_s0, %s4186_s10  ;;  %s4187_s7 = smul.u32 192, %s4858_s19 }
  0x20   : > { %2933 = vmatpush1.bf16.msra.mxu0 %v4256_v19  ;;  %2852 = vmatprep.subr.bf16.mxu1 %v4257_v20  ;;  %v4301_v52 = vld [vmem:[%s6217_s2 + $0x424] ss:$12 sps:$4 sm:$0xff]   ;;  %v5047_v53 = vpack.c.bf16 %v233_v48, %v233_v48  ;;  %v235_v54 = vcombine.high %v219_v50, %v219_v50  ;;  %v4307_v59 = vld [vmem:[%s6217_s2 + $0x43c] ss:$12 sps:$4 sm:$0xff]   ;;  %v4311_v62 = vld [vmem:[%s6217_s2 + $0x154] ss:$12 sps:$4 sm:$0xff]   ;;  %v5103_v9 = vpack.c.bf16 %v219_v50, %v219_v50 }
  0x21   : > { %2934 = vmatprep.subr.bf16.mxu0 %v4259_v21  ;;  %v4309_v60 = vld [vmem:[%s6217_s2 + $0x138] ss:$12 sps:$4 sm:$0xff]   ;;  %v4313_v63 = vld [vmem:[%s6217_s2 + $0x454] ss:$12 sps:$4 sm:$0xff]   ;;  %v4315_v0 = vld [vmem:[%s6217_s2 + $0x150] ss:$12 sps:$4 sm:$0xff]   ;;  %s6171_s27 = scalar_lea.hbm %s6219_s4, %s4187_s7 }
  0x22   : > { %2874 = vmatprep.mubr.bf16.mxu1 %v5047_v53  ;;  %v5050_v55 = vpack.c.bf16 %v235_v54, %v235_v54  ;;  %v4310_v61 = vld [vmem:[%s6217_s2 + $0x438] ss:$12 sps:$4 sm:$0xff]   ;;  %v4316_v1 = vld [vmem:[%s6217_s2 + $0x450] ss:$12 sps:$4 sm:$0xff]   ;;  %v4321_v4 = vld [vmem:[%s6217_s2 + $0x168] ss:$12 sps:$4 sm:$0xff]  }
  0x23   : > { %2853 = vmatpush1.bf16.msra.mxu1 %v4261_v22  ;;  %v4317_v2 = vld [vmem:[%s6217_s2 + $0x16c] ss:$12 sps:$4 sm:$0xff]   ;;  %v4322_v5 = vld [vmem:[%s6217_s2 + $0x468] ss:$12 sps:$4 sm:$0xff]   ;;  %v4326_v6 = vld [vmem:[%s6217_s2 + $0x184] ss:$12 sps:$4 sm:$0xff]  }
  0x24   : > { %2935 = vmatpush1.bf16.msra.mxu0 %v4262_v23  ;;  %2854 = vmatprep.subr.bf16.mxu1 %v4263_v24  ;;  %v4319_v3 = vld [vmem:[%s6217_s2 + $0x46c] ss:$12 sps:$4 sm:$0xff]   ;;  %v4330_v7 = vld [vmem:[%s6217_s2 + $0x484] ss:$12 sps:$4 sm:$0xff]   ;;  %v4333_v12 = vld [vmem:[%s6217_s2 + $0x19c] ss:$12 sps:$4 sm:$0xff]  }
  0x25   : > { %2936 = vmatprep.subr.bf16.mxu0 %v4265_v25  ;;  %2956 = vmatprep.mubr.bf16.mxu0 %v5050_v55  ;;  %v4324_v10 = vld [vmem:[%s6217_s2 + $0x180] ss:$12 sps:$4 sm:$0xff]   ;;  %v4336_v13 = vld [vmem:[%s6217_s2 + $0x49c] ss:$12 sps:$4 sm:$0xff]   ;;  %v4331_v14 = vld [vmem:[%s6217_s2 + $0x198] ss:$12 sps:$4 sm:$0xff]  }
  0x26   : > { %v4328_v11 = vld [vmem:[%s6217_s2 + $0x480] ss:$12 sps:$4 sm:$0xff]   ;;  %v4334_v15 = vld [vmem:[%s6217_s2 + $0x498] ss:$12 sps:$4 sm:$0xff]   ;;  %v4337_v18 = vld [vmem:[%s6217_s2 + $0x1b0] ss:$12 sps:$4 sm:$0xff]  }
  0x27   : > { %2855 = vmatpush1.bf16.msra.mxu1 %v4267_v26  ;;  %v4339_v16 = vld [vmem:[%s6217_s2 + $0x1b4] ss:$12 sps:$4 sm:$0xff]   ;;  %v4340_v19 = vld [vmem:[%s6217_s2 + $0x4b0] ss:$12 sps:$4 sm:$0xff]   ;;  %v4345_v20 = vld [vmem:[%s6217_s2 + $0x1cc] ss:$12 sps:$4 sm:$0xff]  }
  0x28   : > { %2937 = vmatpush1.bf16.msra.mxu0 %v4268_v27  ;;  %2856 = vmatprep.subr.bf16.mxu1 %v4269_v28  ;;  %v4342_v17 = vld [vmem:[%s6217_s2 + $0x4b4] ss:$12 sps:$4 sm:$0xff]   ;;  %v4348_v21 = vld [vmem:[%s6217_s2 + $0x4cc] ss:$12 sps:$4 sm:$0xff]   ;;  %v4351_v24 = vld [vmem:[%s6217_s2 + $0x1e4] ss:$12 sps:$4 sm:$0xff]  }
  0x29   : > { %2938 = vmatprep.subr.bf16.mxu0 %v4271_v29  ;;  %v4343_v22 = vld [vmem:[%s6217_s2 + $0x1c8] ss:$12 sps:$4 sm:$0xff]   ;;  %v4354_v25 = vld [vmem:[%s6217_s2 + $0x4e4] ss:$12 sps:$4 sm:$0xff]   ;;  %v4349_v26 = vld [vmem:[%s6217_s2 + $0x1e0] ss:$12 sps:$4 sm:$0xff]  }
  0x2a   : > { %v4346_v23 = vld [vmem:[%s6217_s2 + $0x4c8] ss:$12 sps:$4 sm:$0xff]   ;;  %v4352_v27 = vld [vmem:[%s6217_s2 + $0x4e0] ss:$12 sps:$4 sm:$0xff]   ;;  %v4375_v46 = vld [vmem:[%s6217_s2 + $0x244] ss:$12 sps:$4 sm:$0xff]  }
  0x2b   : > { %2857 = vmatpush1.bf16.msra.mxu1 %v4273_v30  ;;  %v4357_v28 = vld [vmem:[%s6217_s2 + $0x1fc] ss:$12 sps:$4 sm:$0xff]   ;;  %v4355_v30 = vld [vmem:[%s6217_s2 + $0x1f8] ss:$12 sps:$4 sm:$0xff]   ;;  %v4373_v48 = vld [vmem:[%s6217_s2 + $0x240] ss:$12 sps:$4 sm:$0xff]  }
  0x2c   : > { %2939 = vmatpush1.bf16.msra.mxu0 %v4274_v31  ;;  %2858 = vmatprep.subr.bf16.mxu1 %v4275_v32  ;;  %v4360_v29 = vld [vmem:[%s6217_s2 + $0x4fc] ss:$12 sps:$4 sm:$0xff]   ;;  %v4358_v31 = vld [vmem:[%s6217_s2 + $0x4f8] ss:$12 sps:$4 sm:$0xff]   ;;  %v4363_v32 = vld [vmem:[%s6217_s2 + $0x214] ss:$12 sps:$4 sm:$0xff]  }
  0x2d   : > { %2940 = vmatprep.subr.bf16.mxu0 %v4277_v33  ;;  %v4366_v33 = vld [vmem:[%s6217_s2 + $0x514] ss:$12 sps:$4 sm:$0xff]   ;;  %v4381_v50 = vld [vmem:[%s6217_s2 + $0x25c] ss:$12 sps:$4 sm:$0xff]   ;;  %v4382_v54 = vld [vmem:[%s6217_s2 + $0x558] ss:$12 sps:$4 sm:$0xff]  }
  0x2e   : > { %s3501_s19 = scalar_lea.sflag [#allocation3], %s203_s8  ;;  %s4811_s29 = smov [#allocation2]  }
  0x2f   : > { %2859 = vmatpush1.bf16.msra.mxu1 %v4279_v34  ;;  %v5180_v34 = vld [vmem:[%s5025_s9 + $0x8] sm:$0xff]  ;;  %s4751_s30 = sshll.u32 %s4811_s29, 4  ;;  %s4752_s30 = int_to_ptr.vmem [resolvable:$false] %s4751_s30 }
  0x30   : > { %2941 = vmatpush1.bf16.msra.mxu0 %v4280_v35  ;;  %2860 = vmatprep.subr.bf16.mxu1 %v4281_v36  ;;  %v5183_v35 = vld [vmem:[%s5025_s9 + $0x18] sm:$0xff]  ;;  %s4753_s5 = scalar_lea.vmem %s4752_s30, 384 }
  0x31   : > { %2942 = vmatprep.subr.bf16.mxu0 %v4283_v37  ;;  %v4361_v36 = vld [vmem:[%s6217_s2 + $0x210] ss:$12 sps:$4 sm:$0xff]  }
  0x32   : > { %v4364_v37 = vld [vmem:[%s6217_s2 + $0x510] ss:$12 sps:$4 sm:$0xff]  }
  0x33   : > { %2861 = vmatpush1.bf16.msra.mxu1 %v4285_v38  ;;  %v234_v38 = vcombine.high %v5180_v34, %v5180_v34 }
  0x34   : > { %2943 = vmatpush1.bf16.msra.mxu0 %v4286_v39  ;;  %2862 = vmatprep.subr.bf16.mxu1 %v4287_v40  ;;  %v236_v39 = vcombine.high %v5183_v35, %v5183_v35  ;;  %v4369_v40 = vld [vmem:[%s6217_s2 + $0x22c] ss:$12 sps:$4 sm:$0xff]  }
  0x35   : > { %2944 = vmatprep.subr.bf16.mxu0 %v4289_v41  ;;  %v4372_v41 = vld [vmem:[%s6217_s2 + $0x52c] ss:$12 sps:$4 sm:$0xff]  }
  0x37   : > { %2863 = vmatpush1.bf16.msra.mxu1 %v4291_v42  ;;  %v5201_v42 = vpack.c.bf16 %v234_v38, %v234_v38 }
  0x38   : > { %2945 = vmatpush1.bf16.msra.mxu0 %v4292_v43  ;;  %2864 = vmatprep.subr.bf16.mxu1 %v4293_v44  ;;  %v5203_v43 = vpack.c.bf16 %v236_v39, %v236_v39  ;;  %v4367_v44 = vld [vmem:[%s6217_s2 + $0x228] ss:$12 sps:$4 sm:$0xff]   ;;  %v4443_v39 = vld [vmem:[%s6217_s2 + $0x660] ss:$12 sps:$4 sm:$0xff]  }
  0x39   : > { %2946 = vmatprep.subr.bf16.mxu0 %v4295_v45  ;;  %v4370_v45 = vld [vmem:[%s6217_s2 + $0x528] ss:$12 sps:$4 sm:$0xff]  }
  0x3b   : > { %2865 = vmatpush1.bf16.msra.mxu1 %v4297_v47  ;;  %v4378_v47 = vld [vmem:[%s6217_s2 + $0x544] ss:$12 sps:$4 sm:$0xff]  }
  0x3c   : > { %2947 = vmatpush1.bf16.msra.mxu0 %v4298_v49  ;;  %2866 = vmatprep.subr.bf16.mxu1 %v4299_v51  ;;  %v4376_v49 = vld [vmem:[%s6217_s2 + $0x540] ss:$12 sps:$4 sm:$0xff]   ;;  %v4384_v51 = vld [vmem:[%s6217_s2 + $0x55c] ss:$12 sps:$4 sm:$0xff]  }
  0x3d   : > { %2948 = vmatprep.subr.bf16.mxu0 %v4301_v52  ;;  %v4379_v52 = vld [vmem:[%s6217_s2 + $0x258] ss:$12 sps:$4 sm:$0xff]  }
  0x3f   : > { %2867 = vmatpush1.bf16.msra.mxu1 %v4303_v56  ;;  %v4387_v56 = vld [vmem:[%s6217_s2 + $0x274] ss:$12 sps:$4 sm:$0xff]  }
  0x40   : > { %2949 = vmatpush1.bf16.msra.mxu0 %v4304_v57  ;;  %2868 = vmatprep.subr.bf16.mxu1 %v4305_v58  ;;  %v4390_v57 = vld [vmem:[%s6217_s2 + $0x574] ss:$12 sps:$4 sm:$0xff]   ;;  %v4385_v58 = vld [vmem:[%s6217_s2 + $0x270] ss:$12 sps:$4 sm:$0xff]  }
  0x41   : > { %2950 = vmatprep.subr.bf16.mxu0 %v4307_v59  ;;  %v4388_v59 = vld [vmem:[%s6217_s2 + $0x570] ss:$12 sps:$4 sm:$0xff]  }
  0x43   : > { %2869 = vmatpush1.bf16.msra.mxu1 %v4309_v60  ;;  %v4393_v60 = vld [vmem:[%s6217_s2 + $0x28c] ss:$12 sps:$4 sm:$0xff]  }
  0x44   : > { %2951 = vmatpush1.bf16.msra.mxu0 %v4310_v61  ;;  %2870 = vmatprep.subr.bf16.mxu1 %v4311_v62  ;;  %v4396_v61 = vld [vmem:[%s6217_s2 + $0x58c] ss:$12 sps:$4 sm:$0xff]   ;;  %v4391_v62 = vld [vmem:[%s6217_s2 + $0x288] ss:$12 sps:$4 sm:$0xff]  }
  0x45   : > { %2952 = vmatprep.subr.bf16.mxu0 %v4313_v63  ;;  %v4394_v63 = vld [vmem:[%s6217_s2 + $0x588] ss:$12 sps:$4 sm:$0xff]  }
  0x47   : > { %2871 = vmatpush1.bf16.msra.mxu1 %v4315_v0  ;;  %v4399_v0 = vld [vmem:[%s6217_s2 + $0x2a4] ss:$12 sps:$4 sm:$0xff]  }
  0x48   : > { %2953 = vmatpush1.bf16.msra.mxu0 %v4316_v1  ;;  %2872 = vmatprep.subr.bf16.mxu1 %v4317_v2  ;;  %v4402_v1 = vld [vmem:[%s6217_s2 + $0x5a4] ss:$12 sps:$4 sm:$0xff]   ;;  %v4397_v2 = vld [vmem:[%s6217_s2 + $0x2a0] ss:$12 sps:$4 sm:$0xff]  }
  0x49   : > { %2954 = vmatprep.subr.bf16.mxu0 %v4319_v3  ;;  %v4400_v3 = vld [vmem:[%s6217_s2 + $0x5a0] ss:$12 sps:$4 sm:$0xff]  }
  0x4b   : > { %2873 = vmatpush1.bf16.msra.mxu1 %v4321_v4  ;;  %v4405_v4 = vld [vmem:[%s6217_s2 + $0x2bc] ss:$12 sps:$4 sm:$0xff]  }
  0x4c   : > { %2955 = vmatpush1.bf16.msra.mxu0 %v4322_v5  ;;  %2883 = vmatprep.subr.bf16.mxu1 %v4326_v6  ;;  %v4408_v5 = vld [vmem:[%s6217_s2 + $0x5bc] ss:$12 sps:$4 sm:$0xff]   ;;  %v4403_v6 = vld [vmem:[%s6217_s2 + $0x2b8] ss:$12 sps:$4 sm:$0xff]  }
  0x4d   : > { %2965 = vmatprep.subr.bf16.mxu0 %v4330_v7  ;;  %v4406_v7 = vld [vmem:[%s6217_s2 + $0x5b8] ss:$12 sps:$4 sm:$0xff]  }
  0x4e   : > { %2875 = vmatmul.mubr.bf16.vlgmr.msra.gmra.mrb[0].mxu1 %v5101_v8 }
  0x4f   : > { %2957 = vmatmul.mubr.bf16.vlgmr.msra.gmra.mrb[0].mxu0 %v5103_v9  ;;  %2884 = vmatpush1.bf16.msra.mxu1 %v4324_v10  ;;  %v4411_v10 = vld [vmem:[%s6217_s2 + $0x2d4] ss:$12 sps:$4 sm:$0xff]  }
  0x50   : > { %2966 = vmatpush1.bf16.msra.mxu0 %v4328_v11  ;;  %2885 = vmatprep.subr.bf16.mxu1 %v4333_v12  ;;  %v4414_v11 = vld [vmem:[%s6217_s2 + $0x5d4] ss:$12 sps:$4 sm:$0xff]   ;;  %v4409_v12 = vld [vmem:[%s6217_s2 + $0x2d0] ss:$12 sps:$4 sm:$0xff]  }
  0x51   : > { %2967 = vmatprep.subr.bf16.mxu0 %v4336_v13  ;;  %2915 = vmatprep.mubr.bf16.mxu1 %v5201_v42  ;;  %v4412_v13 = vld [vmem:[%s6217_s2 + $0x5d0] ss:$12 sps:$4 sm:$0xff]  }
  0x52   : > { %2997 = vmatprep.mubr.bf16.mxu0 %v5203_v43 }
  0x53   : > { %2886 = vmatpush1.bf16.msra.mxu1 %v4331_v14  ;;  %v4417_v14 = vld [vmem:[%s6217_s2 + $0x2ec] ss:$12 sps:$4 sm:$0xff]  }
  0x54   : > { %2968 = vmatpush1.bf16.msra.mxu0 %v4334_v15  ;;  %2887 = vmatprep.subr.bf16.mxu1 %v4339_v16  ;;  %v4420_v15 = vld [vmem:[%s6217_s2 + $0x5ec] ss:$12 sps:$4 sm:$0xff]   ;;  %v4415_v16 = vld [vmem:[%s6217_s2 + $0x2e8] ss:$12 sps:$4 sm:$0xff]  }
  0x55   : > { %2969 = vmatprep.subr.bf16.mxu0 %v4342_v17  ;;  %v4418_v17 = vld [vmem:[%s6217_s2 + $0x5e8] ss:$12 sps:$4 sm:$0xff]  }
  0x57   : > { %2888 = vmatpush1.bf16.msra.mxu1 %v4337_v18  ;;  %v4425_v18 = vld [vmem:[%s6217_s2 + $0x604] ss:$12 sps:$4 sm:$0xff]  }
  0x58   : > { %2970 = vmatpush1.bf16.msra.mxu0 %v4340_v19  ;;  %2889 = vmatprep.subr.bf16.mxu1 %v4345_v20  ;;  %v4426_v19 = vld [vmem:[%s6217_s2 + $0xc8] ss:$12 sps:$4 sm:$0xff]   ;;  %v5317_v20 = vpack.c.bf16 %v5180_v34, %v5180_v34  ;;  %v4442_v34 = vld [vmem:[%s6217_s2 + $0x50] ss:$12 sps:$4 sm:$0xff]  }
  0x59   : > { %2971 = vmatprep.subr.bf16.mxu0 %v4348_v21  ;;  %v5321_v21 = vpack.c.bf16 %v5183_v35, %v5183_v35  ;;  %v5369_v35 = vld [vmem:[%s5025_s9 + $0x20] sm:$0xff] }
  0x5a   : > { %v237_v38 = vcombine.high %v5369_v35, %v5369_v35 }
  0x5b   : > { %2890 = vmatpush1.bf16.msra.mxu1 %v4343_v22  ;;  %v4423_v22 = vld [vmem:[%s6217_s2 + $0x600] ss:$12 sps:$4 sm:$0xff]  }
  0x5c   : > { %2972 = vmatpush1.bf16.msra.mxu0 %v4346_v23  ;;  %2891 = vmatprep.subr.bf16.mxu1 %v4351_v24  ;;  %v4427_v23 = vld [vmem:[%s6217_s2 + $0x8] ss:$12 sps:$4 sm:$0xff]  }
  0x5d   : > { %2973 = vmatprep.subr.bf16.mxu0 %v4354_v25  ;;  %v4430_v24 = vld [vmem:[%s6217_s2 + $0x61c] ss:$12 sps:$4 sm:$0xff]   ;;  %v4431_v25 = vld [vmem:[%s6217_s2 + $0xe0] ss:$12 sps:$4 sm:$0xff]  }
  0x5f   : > { %2892 = vmatpush1.bf16.msra.mxu1 %v4349_v26  ;;  %v4428_v26 = vld [vmem:[%s6217_s2 + $0x618] ss:$12 sps:$4 sm:$0xff]  }
  0x60   : > { %2974 = vmatpush1.bf16.msra.mxu0 %v4352_v27  ;;  %2893 = vmatprep.subr.bf16.mxu1 %v4357_v28  ;;  %v4432_v27 = vld [vmem:[%s6217_s2 + $0x20] ss:$12 sps:$4 sm:$0xff]  }
  0x61   : > { %2975 = vmatprep.subr.bf16.mxu0 %v4360_v29  ;;  %v4435_v28 = vld [vmem:[%s6217_s2 + $0x634] ss:$12 sps:$4 sm:$0xff]   ;;  %v4436_v29 = vld [vmem:[%s6217_s2 + $0xf8] ss:$12 sps:$4 sm:$0xff]  }
  0x63   : > { %2894 = vmatpush1.bf16.msra.mxu1 %v4355_v30  ;;  %v4433_v30 = vld [vmem:[%s6217_s2 + $0x630] ss:$12 sps:$4 sm:$0xff]  }
  0x64   : > { %2976 = vmatpush1.bf16.msra.mxu0 %v4358_v31  ;;  %2895 = vmatprep.subr.bf16.mxu1 %v4363_v32  ;;  %v4437_v31 = vld [vmem:[%s6217_s2 + $0x38] ss:$12 sps:$4 sm:$0xff]  }
  0x65   : > { %2977 = vmatprep.subr.bf16.mxu0 %v4366_v33  ;;  %v4440_v32 = vld [vmem:[%s6217_s2 + $0x64c] ss:$12 sps:$4 sm:$0xff]   ;;  %v4438_v33 = vld [vmem:[%s6217_s2 + $0x648] ss:$12 sps:$4 sm:$0xff]  }
  0x67   : > { %2896 = vmatpush1.bf16.msra.mxu1 %v4361_v36  ;;  %v4445_v36 = vld [vmem:[%s6217_s2 + $0x664] ss:$12 sps:$4 sm:$0xff]  }
  0x68   : > { %2978 = vmatpush1.bf16.msra.mxu0 %v4364_v37  ;;  %2897 = vmatprep.subr.bf16.mxu1 %v4369_v40  ;;  %v4446_v37 = vld [vmem:[%s6217_s2 + $0x128] ss:$12 sps:$4 sm:$0xff]   ;;  %v5382_v40 = vpack.c.bf16 %v237_v38, %v237_v38 }
  0x69   : > { %2979 = vmatprep.subr.bf16.mxu0 %v4372_v41  ;;  %v4447_v41 = vld [vmem:[%s6217_s2 + $0x68] ss:$12 sps:$4 sm:$0xff]  }
  0x6a   : > { %v4516_v38 = vld [vmem:[%s6217_s2 + $0x7b4] ss:$12 sps:$4 sm:$0xff]  }
  0x6b   : > { %2898 = vmatpush1.bf16.msra.mxu1 %v4367_v44  ;;  %v4450_v44 = vld [vmem:[%s6217_s2 + $0x67c] ss:$12 sps:$4 sm:$0xff]  }
  0x6c   : > { %2980 = vmatpush1.bf16.msra.mxu0 %v4370_v45  ;;  %2899 = vmatprep.subr.bf16.mxu1 %v4375_v46  ;;  %v4451_v45 = vld [vmem:[%s6217_s2 + $0x140] ss:$12 sps:$4 sm:$0xff]   ;;  %v4448_v46 = vld [vmem:[%s6217_s2 + $0x678] ss:$12 sps:$4 sm:$0xff]  }
  0x6d   : > { %2981 = vmatprep.subr.bf16.mxu0 %v4378_v47  ;;  %v4452_v47 = vld [vmem:[%s6217_s2 + $0x80] ss:$12 sps:$4 sm:$0xff]  }
  0x6f   : > { %2900 = vmatpush1.bf16.msra.mxu1 %v4373_v48  ;;  %v4455_v48 = vld [vmem:[%s6217_s2 + $0x694] ss:$12 sps:$4 sm:$0xff]  }
  0x70   : > { %2982 = vmatpush1.bf16.msra.mxu0 %v4376_v49  ;;  %2901 = vmatprep.subr.bf16.mxu1 %v4381_v50  ;;  %v4456_v49 = vld [vmem:[%s6217_s2 + $0x158] ss:$12 sps:$4 sm:$0xff]   ;;  %v4453_v50 = vld [vmem:[%s6217_s2 + $0x690] ss:$12 sps:$4 sm:$0xff]  }
  0x71   : > { %2983 = vmatprep.subr.bf16.mxu0 %v4384_v51  ;;  %v4457_v51 = vld [vmem:[%s6217_s2 + $0x98] ss:$12 sps:$4 sm:$0xff]  }
  0x73   : > { %2902 = vmatpush1.bf16.msra.mxu1 %v4379_v52  ;;  %v4460_v52 = vld [vmem:[%s6217_s2 + $0x6ac] ss:$12 sps:$4 sm:$0xff]  }
  0x74   : > { %2984 = vmatpush1.bf16.msra.mxu0 %v4382_v54  ;;  %2903 = vmatprep.subr.bf16.mxu1 %v4387_v56  ;;  %v4461_v54 = vld [vmem:[%s6217_s2 + $0x170] ss:$12 sps:$4 sm:$0xff]   ;;  %v4458_v56 = vld [vmem:[%s6217_s2 + $0x6a8] ss:$12 sps:$4 sm:$0xff]  }
  0x75   : > { %2985 = vmatprep.subr.bf16.mxu0 %v4390_v57  ;;  %v4462_v57 = vld [vmem:[%s6217_s2 + $0xb0] ss:$12 sps:$4 sm:$0xff]  }
  0x77   : > { %2904 = vmatpush1.bf16.msra.mxu1 %v4385_v58  ;;  %v4465_v58 = vld [vmem:[%s6217_s2 + $0x6c4] ss:$12 sps:$4 sm:$0xff]  }
  0x78   : > { %2986 = vmatpush1.bf16.msra.mxu0 %v4388_v59  ;;  %2905 = vmatprep.subr.bf16.mxu1 %v4393_v60  ;;  %v4466_v59 = vld [vmem:[%s6217_s2 + $0x248] ss:$12 sps:$4 sm:$0xff]   ;;  %v4463_v60 = vld [vmem:[%s6217_s2 + $0x6c0] ss:$12 sps:$4 sm:$0xff]  }
  0x79   : > { %2987 = vmatprep.subr.bf16.mxu0 %v4396_v61  ;;  %v4467_v61 = vld [vmem:[%s6217_s2 + $0x188] ss:$12 sps:$4 sm:$0xff]  }
  0x7b   : > { %2906 = vmatpush1.bf16.msra.mxu1 %v4391_v62  ;;  %v4470_v62 = vld [vmem:[%s6217_s2 + $0x6dc] ss:$12 sps:$4 sm:$0xff]  }
  0x7c   : > { %2988 = vmatpush1.bf16.msra.mxu0 %v4394_v63  ;;  %2907 = vmatprep.subr.bf16.mxu1 %v4399_v0  ;;  %v4471_v63 = vld [vmem:[%s6217_s2 + $0x260] ss:$12 sps:$4 sm:$0xff]   ;;  %v4468_v0 = vld [vmem:[%s6217_s2 + $0x6d8] ss:$12 sps:$4 sm:$0xff]  }
  0x7d   : > { %2989 = vmatprep.subr.bf16.mxu0 %v4402_v1  ;;  %v4472_v1 = vld [vmem:[%s6217_s2 + $0x1a0] ss:$12 sps:$4 sm:$0xff]  }
  0x7f   : > { %2908 = vmatpush1.bf16.msra.mxu1 %v4397_v2  ;;  %v4475_v2 = vld [vmem:[%s6217_s2 + $0x6f4] ss:$12 sps:$4 sm:$0xff]  }
  0x80   : > { %2990 = vmatpush1.bf16.msra.mxu0 %v4400_v3  ;;  %2909 = vmatprep.subr.bf16.mxu1 %v4405_v4  ;;  %v4473_v3 = vld [vmem:[%s6217_s2 + $0x6f0] ss:$12 sps:$4 sm:$0xff]   ;;  %v4477_v4 = vld [vmem:[%s6217_s2 + $0x1b8] ss:$12 sps:$4 sm:$0xff]  }
  0x81   : > { %2991 = vmatprep.subr.bf16.mxu0 %v4408_v5  ;;  %v4480_v5 = vld [vmem:[%s6217_s2 + $0x70c] ss:$12 sps:$4 sm:$0xff]  }
  0x83   : > { %2910 = vmatpush1.bf16.msra.mxu1 %v4403_v6  ;;  %v4481_v6 = vld [vmem:[%s6217_s2 + $0x290] ss:$12 sps:$4 sm:$0xff]  }
  0x84   : > { %2992 = vmatpush1.bf16.msra.mxu0 %v4406_v7  ;;  %2911 = vmatprep.subr.bf16.mxu1 %v4411_v10  ;;  %v4482_v7 = vld [vmem:[%s6217_s2 + $0x1d0] ss:$12 sps:$4 sm:$0xff]  }
  0x85   : > { %2993 = vmatprep.subr.bf16.mxu0 %v4414_v11  ;;  %v4485_v10 = vld [vmem:[%s6217_s2 + $0x724] ss:$12 sps:$4 sm:$0xff]   ;;  %v4486_v11 = vld [vmem:[%s6217_s2 + $0x2a8] ss:$12 sps:$4 sm:$0xff]  }
  0x87   : > { %2912 = vmatpush1.bf16.msra.mxu1 %v4409_v12  ;;  %v4483_v12 = vld [vmem:[%s6217_s2 + $0x720] ss:$12 sps:$4 sm:$0xff]  }
  0x88   : > { %2994 = vmatpush1.bf16.msra.mxu0 %v4412_v13  ;;  %2913 = vmatprep.subr.bf16.mxu1 %v4417_v14  ;;  %v4487_v13 = vld [vmem:[%s6217_s2 + $0x1e8] ss:$12 sps:$4 sm:$0xff]  }
  0x89   : > { %2995 = vmatprep.subr.bf16.mxu0 %v4420_v15  ;;  %v4490_v14 = vld [vmem:[%s6217_s2 + $0x73c] ss:$12 sps:$4 sm:$0xff]   ;;  %v4491_v15 = vld [vmem:[%s6217_s2 + $0x2c0] ss:$12 sps:$4 sm:$0xff]  }
  0x8b   : > { %2914 = vmatpush1.bf16.msra.mxu1 %v4415_v16  ;;  %v4488_v16 = vld [vmem:[%s6217_s2 + $0x738] ss:$12 sps:$4 sm:$0xff]  }
  0x8c   : > { %2996 = vmatpush1.bf16.msra.mxu0 %v4418_v17  ;;  %3981 = vmatprep.subr.bf16.mxu1 %v4426_v19  ;;  %v4492_v17 = vld [vmem:[%s6217_s2 + $0x200] ss:$12 sps:$4 sm:$0xff]   ;;  %v4496_v19 = vld [vmem:[%s6217_s2 + $0x2d8] ss:$12 sps:$4 sm:$0xff]  }
  0x8d   : > { %3006 = vmatprep.subr.bf16.mxu0 %v4425_v18  ;;  %v4495_v18 = vld [vmem:[%s6217_s2 + $0x754] ss:$12 sps:$4 sm:$0xff]  }
  0x8e   : > { %2916 = vmatmul.mubr.bf16.vlgmr.msra.gmra.mrb[0].mxu1 %v5317_v20 }
  0x8f   : > { %2998 = vmatmul.mubr.bf16.vlgmr.msra.gmra.mrb[0].mxu0 %v5321_v21  ;;  %3982 = vmatpush3.bf16.msra.mxu1 %v4427_v23  ;;  %v4497_v23 = vld [vmem:[%s6217_s2 + $0x218] ss:$12 sps:$4 sm:$0xff]  }
  0x90   : > { %3007 = vmatpush1.bf16.msra.mxu0 %v4423_v22  ;;  %3983 = vmatprep.subr.bf16.mxu1 %v4431_v25  ;;  %v4493_v22 = vld [vmem:[%s6217_s2 + $0x750] ss:$12 sps:$4 sm:$0xff]  }
  0x91   : > { %3008 = vmatprep.subr.bf16.mxu0 %v4430_v24  ;;  %3202 = vmatprep.mubr.bf16.mxu1 %v5047_v53  ;;  %v4441_v53 = vld [vmem:[%s6217_s2 + $0x110] ss:$12 sps:$4 sm:$0xff]   ;;  %v4500_v24 = vld [vmem:[%s6217_s2 + $0x76c] ss:$12 sps:$4 sm:$0xff]  }
  0x92   : > { %3038 = vmatprep.mubr.bf16.mxu0 %v5382_v40  ;;  %v4501_v25 = vld [vmem:[%s6217_s2 + $0x2f0] ss:$12 sps:$4 sm:$0xff]  }
  0x93   : > { %3984 = vmatpush3.bf16.msra.mxu1 %v4432_v27  ;;  %v4502_v27 = vld [vmem:[%s6217_s2 + $0x230] ss:$12 sps:$4 sm:$0xff]  }
  0x94   : > { %3009 = vmatpush1.bf16.msra.mxu0 %v4428_v26  ;;  %3985 = vmatprep.subr.bf16.mxu1 %v4436_v29  ;;  %v4498_v26 = vld [vmem:[%s6217_s2 + $0x768] ss:$12 sps:$4 sm:$0xff]  }
  0x95   : > { %3010 = vmatprep.subr.bf16.mxu0 %v4435_v28  ;;  %v4506_v28 = vld [vmem:[%s6217_s2 + $0x784] ss:$12 sps:$4 sm:$0xff]   ;;  %v4507_v29 = vld [vmem:[%s6217_s2 + $0x3c8] ss:$12 sps:$4 sm:$0xff]  }
  0x97   : > { %3986 = vmatpush3.bf16.msra.mxu1 %v4437_v31  ;;  %v4504_v31 = vld [vmem:[%s6217_s2 + $0x780] ss:$12 sps:$4 sm:$0xff]  }
  0x98   : > { %3011 = vmatpush1.bf16.msra.mxu0 %v4433_v30  ;;  %3987 = vmatprep.subr.bf16.mxu1 %v4441_v53  ;;  %v5530_v30 = vpack.c.bf16 %v5369_v35, %v5369_v35  ;;  %v4511_v53 = vld [vmem:[%s6217_s2 + $0x79c] ss:$12 sps:$4 sm:$0xff]   ;;  %v4509_v35 = vld [vmem:[%s6217_s2 + $0x798] ss:$12 sps:$4 sm:$0xff]  }
  0x99   : > { %3012 = vmatprep.subr.bf16.mxu0 %v4440_v32  ;;  %v4508_v32 = vld [vmem:[%s6217_s2 + $0x308] ss:$12 sps:$4 sm:$0xff]  }
  0x9b   : > { %3988 = vmatpush3.bf16.msra.mxu1 %v4442_v34  ;;  %v5545_v34 = vld [vmem:[%s5025_s9 + $0x28] sm:$0xff] }
  0x9c   : > { %3013 = vmatpush1.bf16.msra.mxu0 %v4438_v33  ;;  %3989 = vmatprep.subr.bf16.mxu1 %v4446_v37  ;;  %v4512_v33 = vld [vmem:[%s6217_s2 + $0x3e0] ss:$12 sps:$4 sm:$0xff]  }
  0x9d   : > { %3014 = vmatprep.subr.bf16.mxu0 %v4445_v36  ;;  %v238_v36 = vcombine.high %v5545_v34, %v5545_v34  ;;  %v4513_v37 = vld [vmem:[%s6217_s2 + $0x320] ss:$12 sps:$4 sm:$0xff]  }
  0x9f   : > { %3990 = vmatpush3.bf16.msra.mxu1 %v4447_v41  ;;  %v4514_v41 = vld [vmem:[%s6217_s2 + $0x7b0] ss:$12 sps:$4 sm:$0xff]  }
  0xa0   : > { %3015 = vmatpush1.bf16.msra.mxu0 %v4443_v39  ;;  %3991 = vmatprep.subr.bf16.mxu1 %v4451_v45  ;;  %v5560_v39 = vpack.c.bf16 %v238_v36, %v238_v36  ;;  %v4521_v45 = vld [vmem:[%s6217_s2 + $0x7cc] ss:$12 sps:$4 sm:$0xff]   ;;  %v4587_v36 = vld [vmem:[%s6217_s2 + $0x904] ss:$12 sps:$4 sm:$0xff]  }
  0xa1   : > { %3016 = vmatprep.subr.bf16.mxu0 %v4450_v44  ;;  %v4518_v44 = vld [vmem:[%s6217_s2 + $0x338] ss:$12 sps:$4 sm:$0xff]  }
  0xa3   : > { %3992 = vmatpush3.bf16.msra.mxu1 %v4452_v47  ;;  %v4523_v47 = vld [vmem:[%s6217_s2 + $0x350] ss:$12 sps:$4 sm:$0xff]  }
  0xa4   : > { %3017 = vmatpush1.bf16.msra.mxu0 %v4448_v46  ;;  %3993 = vmatprep.subr.bf16.mxu1 %v4456_v49  ;;  %v4519_v46 = vld [vmem:[%s6217_s2 + $0x7c8] ss:$12 sps:$4 sm:$0xff]  }
  0xa5   : > { %3018 = vmatprep.subr.bf16.mxu0 %v4455_v48  ;;  %v4526_v48 = vld [vmem:[%s6217_s2 + $0x7e4] ss:$12 sps:$4 sm:$0xff]   ;;  %v4527_v49 = vld [vmem:[%s6217_s2 + $0x428] ss:$12 sps:$4 sm:$0xff]  }
  0xa7   : > { %3994 = vmatpush3.bf16.msra.mxu1 %v4457_v51  ;;  %v4528_v51 = vld [vmem:[%s6217_s2 + $0x368] ss:$12 sps:$4 sm:$0xff]  }
  0xa8   : > { %3019 = vmatpush1.bf16.msra.mxu0 %v4453_v50  ;;  %3995 = vmatprep.subr.bf16.mxu1 %v4461_v54  ;;  %v4524_v50 = vld [vmem:[%s6217_s2 + $0x7e0] ss:$12 sps:$4 sm:$0xff]  }
  0xa9   : > { %3020 = vmatprep.subr.bf16.mxu0 %v4460_v52  ;;  %v4531_v52 = vld [vmem:[%s6217_s2 + $0x7fc] ss:$12 sps:$4 sm:$0xff]   ;;  %v4532_v54 = vld [vmem:[%s6217_s2 + $0x440] ss:$12 sps:$4 sm:$0xff]  }
  0xab   : > { %3996 = vmatpush3.bf16.msra.mxu1 %v4462_v57  ;;  %v4533_v57 = vld [vmem:[%s6217_s2 + $0x380] ss:$12 sps:$4 sm:$0xff]  }
  0xac   : > { %3021 = vmatpush1.bf16.msra.mxu0 %v4458_v56  ;;  %4003 = vmatprep.subr.bf16.mxu1 %v4466_v59  ;;  %v4529_v56 = vld [vmem:[%s6217_s2 + $0x7f8] ss:$12 sps:$4 sm:$0xff]  }
  0xad   : > { %3022 = vmatprep.subr.bf16.mxu0 %v4465_v58  ;;  %v4536_v58 = vld [vmem:[%s6217_s2 + $0x814] ss:$12 sps:$4 sm:$0xff]   ;;  %v4537_v59 = vld [vmem:[%s6217_s2 + $0x458] ss:$12 sps:$4 sm:$0xff]  }
  0xae   : > { %3203 = vmatmul.mubr.bf16.vlgmr.msra.gmra.mrb[4].mxu1 %v5101_v8  ;;  %v4476_v8 = vld [vmem:[%s6217_s2 + $0x278] ss:$12 sps:$4 sm:$0xff]  }
  0xaf   : > { %4004 = vmatpush3.bf16.msra.mxu1 %v4467_v61  ;;  %3242 = vmatprep.mubr.bf16.mxu1 %v5201_v42  ;;  %v4478_v42 = vld [vmem:[%s6217_s2 + $0x708] ss:$12 sps:$4 sm:$0xff]   ;;  %v4538_v61 = vld [vmem:[%s6217_s2 + $0x398] ss:$12 sps:$4 sm:$0xff]  }
  0xb0   : > { %3023 = vmatpush1.bf16.msra.mxu0 %v4463_v60  ;;  %4005 = vmatprep.subr.bf16.mxu1 %v4471_v63  ;;  %v4534_v60 = vld [vmem:[%s6217_s2 + $0x810] ss:$12 sps:$4 sm:$0xff]  }
  0xb1   : > { %3024 = vmatprep.subr.bf16.mxu0 %v4470_v62  ;;  %v4541_v62 = vld [vmem:[%s6217_s2 + $0x82c] ss:$12 sps:$4 sm:$0xff]   ;;  %v4542_v63 = vld [vmem:[%s6217_s2 + $0x470] ss:$12 sps:$4 sm:$0xff]  }
  0xb3   : > { %4006 = vmatpush3.bf16.msra.mxu1 %v4472_v1  ;;  %v4543_v1 = vld [vmem:[%s6217_s2 + $0x3b0] ss:$12 sps:$4 sm:$0xff]  }
  0xb4   : > { %3025 = vmatpush1.bf16.msra.mxu0 %v4468_v0  ;;  %4007 = vmatprep.subr.bf16.mxu1 %v4476_v8  ;;  %v4539_v0 = vld [vmem:[%s6217_s2 + $0x828] ss:$12 sps:$4 sm:$0xff]  }
  0xb5   : > { %3026 = vmatprep.subr.bf16.mxu0 %v4475_v2  ;;  %v4546_v2 = vld [vmem:[%s6217_s2 + $0x844] ss:$12 sps:$4 sm:$0xff]   ;;  %v4547_v8 = vld [vmem:[%s6217_s2 + $0x548] ss:$12 sps:$4 sm:$0xff]  }
  0xb7   : > { %4008 = vmatpush3.bf16.msra.mxu1 %v4477_v4  ;;  %v4548_v4 = vld [vmem:[%s6217_s2 + $0x488] ss:$12 sps:$4 sm:$0xff]  }
  0xb8   : > { %3027 = vmatpush1.bf16.msra.mxu0 %v4473_v3  ;;  %4009 = vmatprep.subr.bf16.mxu1 %v4481_v6  ;;  %v4544_v3 = vld [vmem:[%s6217_s2 + $0x840] ss:$12 sps:$4 sm:$0xff]  }
  0xb9   : > { %3028 = vmatprep.subr.bf16.mxu0 %v4480_v5  ;;  %v4551_v5 = vld [vmem:[%s6217_s2 + $0x85c] ss:$12 sps:$4 sm:$0xff]   ;;  %v4552_v6 = vld [vmem:[%s6217_s2 + $0x560] ss:$12 sps:$4 sm:$0xff]  }
  0xbb   : > { %4010 = vmatpush3.bf16.msra.mxu1 %v4482_v7  ;;  %v4553_v7 = vld [vmem:[%s6217_s2 + $0x4a0] ss:$12 sps:$4 sm:$0xff]  }
  0xbc   : > { %3029 = vmatpush1.bf16.msra.mxu0 %v4478_v42  ;;  %4011 = vmatprep.subr.bf16.mxu1 %v4486_v11  ;;  %v4549_v42 = vld [vmem:[%s6217_s2 + $0x858] ss:$12 sps:$4 sm:$0xff]   ;;  %v4554_v11 = vld [vmem:[%s6217_s2 + $0x870] ss:$12 sps:$4 sm:$0xff]  }
  0xbd   : > { %3030 = vmatprep.subr.bf16.mxu0 %v4485_v10  ;;  %v4556_v10 = vld [vmem:[%s6217_s2 + $0x874] ss:$12 sps:$4 sm:$0xff]  }
  0xbf   : > { %4012 = vmatpush3.bf16.msra.mxu1 %v4487_v13  ;;  %v4561_v13 = vld [vmem:[%s6217_s2 + $0x88c] ss:$12 sps:$4 sm:$0xff]  }
  0xc0   : > { %3031 = vmatpush1.bf16.msra.mxu0 %v4483_v12  ;;  %4013 = vmatprep.subr.bf16.mxu1 %v4491_v15  ;;  %v4558_v12 = vld [vmem:[%s6217_s2 + $0x4b8] ss:$12 sps:$4 sm:$0xff]   ;;  %v4563_v15 = vld [vmem:[%s6217_s2 + $0x4d0] ss:$12 sps:$4 sm:$0xff]  }
  0xc1   : > { %3032 = vmatprep.subr.bf16.mxu0 %v4490_v14  ;;  %v4559_v14 = vld [vmem:[%s6217_s2 + $0x888] ss:$12 sps:$4 sm:$0xff]  }
  0xc3   : > { %4014 = vmatpush3.bf16.msra.mxu1 %v4492_v17  ;;  %v4567_v17 = vld [vmem:[%s6217_s2 + $0x5a8] ss:$12 sps:$4 sm:$0xff]  }
  0xc4   : > { %3033 = vmatpush1.bf16.msra.mxu0 %v4488_v16  ;;  %4015 = vmatprep.subr.bf16.mxu1 %v4496_v19  ;;  %v4566_v16 = vld [vmem:[%s6217_s2 + $0x8a4] ss:$12 sps:$4 sm:$0xff]   ;;  %v4568_v19 = vld [vmem:[%s6217_s2 + $0x4e8] ss:$12 sps:$4 sm:$0xff]  }
  0xc5   : > { %3034 = vmatprep.subr.bf16.mxu0 %v4495_v18  ;;  %v4564_v18 = vld [vmem:[%s6217_s2 + $0x8a0] ss:$12 sps:$4 sm:$0xff]  }
  0xc7   : > { %4016 = vmatpush3.bf16.msra.mxu1 %v4497_v23  ;;  %v4572_v23 = vld [vmem:[%s6217_s2 + $0x5c0] ss:$12 sps:$4 sm:$0xff]  }
  0xc8   : > { %3035 = vmatpush1.bf16.msra.mxu0 %v4493_v22  ;;  %4017 = vmatprep.subr.bf16.mxu1 %v4501_v25  ;;  %v4571_v22 = vld [vmem:[%s6217_s2 + $0x8bc] ss:$12 sps:$4 sm:$0xff]   ;;  %v4573_v25 = vld [vmem:[%s6217_s2 + $0x500] ss:$12 sps:$4 sm:$0xff]  }
  0xc9   : > { %3036 = vmatprep.subr.bf16.mxu0 %v4500_v24  ;;  %v4569_v24 = vld [vmem:[%s6217_s2 + $0x8b8] ss:$12 sps:$4 sm:$0xff]  }
  0xcb   : > { %4018 = vmatpush3.bf16.msra.mxu1 %v4502_v27  ;;  %v4577_v27 = vld [vmem:[%s6217_s2 + $0x5d8] ss:$12 sps:$4 sm:$0xff]  }
  0xcc   : > { %3037 = vmatpush1.bf16.msra.mxu0 %v4498_v26  ;;  %4025 = vmatprep.subr.bf16.mxu1 %v4507_v29  ;;  %v4576_v26 = vld [vmem:[%s6217_s2 + $0x8d4] ss:$12 sps:$4 sm:$0xff]   ;;  %v4578_v29 = vld [vmem:[%s6217_s2 + $0x518] ss:$12 sps:$4 sm:$0xff]  }
  0xcd   : > { %3047 = vmatprep.subr.bf16.mxu0 %v4506_v28  ;;  %v4574_v28 = vld [vmem:[%s6217_s2 + $0x8d0] ss:$12 sps:$4 sm:$0xff]  }
  0xce   : > { %3243 = vmatmul.mubr.bf16.vlgmr.msra.gmra.mrb[8].mxu1 %v5317_v20  ;;  %v4517_v20 = vld [vmem:[%s6217_s2 + $0x3f8] ss:$12 sps:$4 sm:$0xff]  }
  0xcf   : > { %3039 = vmatmul.mubr.bf16.vlgmr.msra.gmra.mrb[0].mxu0 %v5530_v30  ;;  %4026 = vmatpush3.bf16.msra.mxu1 %v4508_v32  ;;  %v4582_v32 = vld [vmem:[%s6217_s2 + $0x5f0] ss:$12 sps:$4 sm:$0xff]  }
  0xd0   : > { %3048 = vmatpush1.bf16.msra.mxu0 %v4504_v31  ;;  %4027 = vmatprep.subr.bf16.mxu1 %v4512_v33  ;;  %v4581_v31 = vld [vmem:[%s6217_s2 + $0x8ec] ss:$12 sps:$4 sm:$0xff]   ;;  %v4583_v33 = vld [vmem:[%s6217_s2 + $0x530] ss:$12 sps:$4 sm:$0xff]  }
  0xd1   : > { %3049 = vmatprep.subr.bf16.mxu0 %v4511_v53  ;;  %3282 = vmatprep.mubr.bf16.mxu1 %v5050_v55  ;;  %v4522_v55 = vld [vmem:[%s6217_s2 + $0x410] ss:$12 sps:$4 sm:$0xff]   ;;  %v4579_v53 = vld [vmem:[%s6217_s2 + $0x8e8] ss:$12 sps:$4 sm:$0xff]  }
  0xd2   : > { %3079 = vmatprep.mubr.bf16.mxu0 %v5560_v39 }
  0xd3   : > { %4028 = vmatpush3.bf16.msra.mxu1 %v4513_v37  ;;  %v4588_v37 = vld [vmem:[%s6217_s2 + $0x6c8] ss:$12 sps:$4 sm:$0xff]  }
  0xd4   : > { %3050 = vmatpush1.bf16.msra.mxu0 %v4509_v35  ;;  %4029 = vmatprep.subr.bf16.mxu1 %v4517_v20  ;;  %v5732_v35 = vld [vmem:[%s5025_s9 + $0x30] sm:$0xff]  ;;  %v5744_v20 = vpack.c.bf16 %v5545_v34, %v5545_v34  ;;  %v4593_v34 = vld [vmem:[%s6217_s2 + $0x6e0] ss:$12 sps:$4 sm:$0xff]  }
  0xd5   : > { %3051 = vmatprep.subr.bf16.mxu0 %v4516_v38  ;;  %v239_v38 = vcombine.high %v5732_v35, %v5732_v35 }
  0xd7   : > { %4030 = vmatpush3.bf16.msra.mxu1 %v4518_v44  ;;  %v4589_v44 = vld [vmem:[%s6217_s2 + $0x608] ss:$12 sps:$4 sm:$0xff]  }
  0xd8   : > { %3052 = vmatpush1.bf16.msra.mxu0 %v4514_v41  ;;  %4031 = vmatprep.subr.bf16.mxu1 %v4522_v55  ;;  %v4585_v41 = vld [vmem:[%s6217_s2 + $0x900] ss:$12 sps:$4 sm:$0xff]   ;;  %v4590_v55 = vld [vmem:[%s6217_s2 + $0x918] ss:$12 sps:$4 sm:$0xff]  }
  0xd9   : > { %3053 = vmatprep.subr.bf16.mxu0 %v4521_v45  ;;  %v4592_v45 = vld [vmem:[%s6217_s2 + $0x91c] ss:$12 sps:$4 sm:$0xff]  }
  0xdb   : > { %4032 = vmatpush3.bf16.msra.mxu1 %v4523_v47  ;;  %v4594_v47 = vld [vmem:[%s6217_s2 + $0x620] ss:$12 sps:$4 sm:$0xff]  }
  0xdc   : > { %3054 = vmatpush1.bf16.msra.mxu0 %v4519_v46  ;;  %4033 = vmatprep.subr.bf16.mxu1 %v4527_v49  ;;  %v5761_v46 = vpack.c.bf16 %v239_v38, %v239_v38  ;;  %v4598_v49 = vld [vmem:[%s6217_s2 + $0x6f8] ss:$12 sps:$4 sm:$0xff]  }
  0xdd   : > { %3055 = vmatprep.subr.bf16.mxu0 %v4526_v48  ;;  %v4597_v48 = vld [vmem:[%s6217_s2 + $0x934] ss:$12 sps:$4 sm:$0xff]   ;;  %v5935_v38 = vld [vmem:[%s5025_s9 + $0x38] sm:$0xff]  ;;  %s4185_s9 = smul.u32 12, %s203_s8 }
  0xdf   : > { %4034 = vmatpush3.bf16.msra.mxu1 %v4528_v51  ;;  %v4602_v51 = vld [vmem:[%s6217_s2 + $0x94c] ss:$12 sps:$4 sm:$0xff]   ;;  %s205_s14 = scalar_lea.vmem [#allocation2], %s4185_s9 }
  0xe0   : > { %3056 = vmatpush1.bf16.msra.mxu0 %v4524_v50  ;;  %4035 = vmatprep.subr.bf16.mxu1 %v4532_v54  ;;  %v4599_v50 = vld [vmem:[%s6217_s2 + $0x638] ss:$12 sps:$4 sm:$0xff]   ;;  %v4604_v54 = vld [vmem:[%s6217_s2 + $0x650] ss:$12 sps:$4 sm:$0xff]   ;;  %s3515_s20 = sshll.u32 %s205_s14, 4  ;;  %s6173_s20 = int_to_ptr.vmem [resolvable:$true] %s3515_s20 }
  0xe1   : > { %3057 = vmatprep.subr.bf16.mxu0 %v4531_v52  ;;  %v4600_v52 = vld [vmem:[%s6217_s2 + $0x948] ss:$12 sps:$4 sm:$0xff]   ;;  %s4747_s28 = scalar_lea.vmem %s6173_s20, 192  ;;  %p4754_p0 = scmp.lt.s32.totalorder %s6173_s20, %s4752_s30 }
  0xe2   : > { %p4748_p11 = scmp.ne.s32.totalorder %s6173_s20, %s4747_s28  ;;  %p4755_p1 = scmp.lt.s32.totalorder %s4753_s5, %s4747_s28 }
  0xe3   : > { %4036 = vmatpush3.bf16.msra.mxu1 %v4533_v57  ;;  %v4608_v57 = vld [vmem:[%s6217_s2 + $0x728] ss:$12 sps:$4 sm:$0xff]  }
  0xe4   : > { %3058 = vmatpush1.bf16.msra.mxu0 %v4529_v56  ;;  %4037 = vmatprep.subr.bf16.mxu1 %v4537_v59  ;;  %v4607_v56 = vld [vmem:[%s6217_s2 + $0x964] ss:$12 sps:$4 sm:$0xff]   ;;  %v4609_v59 = vld [vmem:[%s6217_s2 + $0x668] ss:$12 sps:$4 sm:$0xff]   ;;  %p4749_p12 = pnand %p4748_p11, %p4875_p5  ;;  %p4756_p2 = por %p4755_p1, %p4754_p0 }
  0xe5   : > { %3059 = vmatprep.subr.bf16.mxu0 %v4536_v58  ;;  %v4605_v58 = vld [vmem:[%s6217_s2 + $0x960] ss:$12 sps:$4 sm:$0xff]  }
  0xe6   : > { %p4750_p13 = pneg %p4749_p12 }
  0xe7   : > { %4038 = vmatpush3.bf16.msra.mxu1 %v4538_v61  ;;  %v4613_v61 = vld [vmem:[%s6217_s2 + $0x740] ss:$12 sps:$4 sm:$0xff]  }
  0xe8   : > { %3060 = vmatpush1.bf16.msra.mxu0 %v4534_v60  ;;  %4039 = vmatprep.subr.bf16.mxu1 %v4542_v63  ;;  %v4612_v60 = vld [vmem:[%s6217_s2 + $0x97c] ss:$12 sps:$4 sm:$0xff]   ;;  %v4614_v63 = vld [vmem:[%s6217_s2 + $0x680] ss:$12 sps:$4 sm:$0xff]   ;;  %p4757_p3 = pnand %p4756_p2, %p4750_p13 }
  0xe9   : > { %3061 = vmatprep.subr.bf16.mxu0 %v4541_v62  ;;  %v4610_v62 = vld [vmem:[%s6217_s2 + $0x978] ss:$12 sps:$4 sm:$0xff]  }
  0xeb   : > { %4040 = vmatpush3.bf16.msra.mxu1 %v4543_v1  ;;  %v4618_v1 = vld [vmem:[%s6217_s2 + $0x758] ss:$12 sps:$4 sm:$0xff]  }
  0xec   : > { %3062 = vmatpush1.bf16.msra.mxu0 %v4539_v0  ;;  %4047 = vmatprep.subr.bf16.mxu1 %v4547_v8  ;;  %v4617_v0 = vld [vmem:[%s6217_s2 + $0x994] ss:$12 sps:$4 sm:$0xff]   ;;  %v4619_v8 = vld [vmem:[%s6217_s2 + $0x698] ss:$12 sps:$4 sm:$0xff]  }
  0xed   : > { %3063 = vmatprep.subr.bf16.mxu0 %v4546_v2  ;;  %v4615_v2 = vld [vmem:[%s6217_s2 + $0x990] ss:$12 sps:$4 sm:$0xff]  }
  0xee   : > { %3283 = vmatmul.mubr.bf16.vlgmr.msra.gmra.mrb[12].mxu1 %v5103_v9  ;;  %v4557_v9 = vld [vmem:[%s6217_s2 + $0x578] ss:$12 sps:$4 sm:$0xff]  }
  0xef   : > { %4048 = vmatpush3.bf16.msra.mxu1 %v4548_v4  ;;  %3322 = vmatprep.mubr.bf16.mxu1 %v5203_v43  ;;  %v4562_v43 = vld [vmem:[%s6217_s2 + $0x590] ss:$12 sps:$4 sm:$0xff]  }
  0xf0   : > { %3064 = vmatpush1.bf16.msra.mxu0 %v4544_v3  ;;  %4049 = vmatprep.subr.bf16.mxu1 %v4552_v6  ;;  %v4622_v3 = vld [vmem:[%s6217_s2 + $0x9ac] ss:$12 sps:$4 sm:$0xff]   ;;  %v4623_v4 = vld [vmem:[%s6217_s2 + $0x770] ss:$12 sps:$4 sm:$0xff]  }
  0xf1   : > { %3065 = vmatprep.subr.bf16.mxu0 %v4551_v5  ;;  %v4620_v5 = vld [vmem:[%s6217_s2 + $0x9a8] ss:$12 sps:$4 sm:$0xff]   ;;  %v4624_v6 = vld [vmem:[%s6217_s2 + $0x6b0] ss:$12 sps:$4 sm:$0xff]  }
  0xf3   : > { %4050 = vmatpush3.bf16.msra.mxu1 %v4553_v7  ;;  %v4628_v7 = vld [vmem:[%s6217_s2 + $0x848] ss:$12 sps:$4 sm:$0xff]  }
  0xf4   : > { %3066 = vmatpush1.bf16.msra.mxu0 %v4549_v42  ;;  %4051 = vmatprep.subr.bf16.mxu1 %v4557_v9  ;;  %v4627_v42 = vld [vmem:[%s6217_s2 + $0x9c4] ss:$12 sps:$4 sm:$0xff]   ;;  %v4629_v9 = vld [vmem:[%s6217_s2 + $0x788] ss:$12 sps:$4 sm:$0xff]  }
  0xf5   : > { %3067 = vmatprep.subr.bf16.mxu0 %v4556_v10  ;;  %v4625_v10 = vld [vmem:[%s6217_s2 + $0x9c0] ss:$12 sps:$4 sm:$0xff]  }
  0xf7   : > { %4052 = vmatpush3.bf16.msra.mxu1 %v4558_v12  ;;  %v4633_v12 = vld [vmem:[%s6217_s2 + $0x860] ss:$12 sps:$4 sm:$0xff]  }
  0xf8   : > { %3068 = vmatpush1.bf16.msra.mxu0 %v4554_v11  ;;  %4053 = vmatprep.subr.bf16.mxu1 %v4562_v43  ;;  %v4632_v11 = vld [vmem:[%s6217_s2 + $0x9dc] ss:$12 sps:$4 sm:$0xff]   ;;  %v4634_v43 = vld [vmem:[%s6217_s2 + $0x7a0] ss:$12 sps:$4 sm:$0xff]  }
  0xf9   : > { %3069 = vmatprep.subr.bf16.mxu0 %v4561_v13  ;;  %v4630_v13 = vld [vmem:[%s6217_s2 + $0x9d8] ss:$12 sps:$4 sm:$0xff]  }
  0xfb   : > { %4054 = vmatpush3.bf16.msra.mxu1 %v4563_v15  ;;  %v4635_v15 = vld [vmem:[%s6217_s2 + $0x9f0] ss:$12 sps:$4 sm:$0xff]  }
  0xfc   : > { %3070 = vmatpush1.bf16.msra.mxu0 %v4559_v14  ;;  %4055 = vmatprep.subr.bf16.mxu1 %v4567_v17  ;;  %v4637_v14 = vld [vmem:[%s6217_s2 + $0x9f4] ss:$12 sps:$4 sm:$0xff]   ;;  %v4642_v17 = vld [vmem:[%s6217_s2 + $0xa0c] ss:$12 sps:$4 sm:$0xff]  }
  0xfd   : > { %3071 = vmatprep.subr.bf16.mxu0 %v4566_v16  ;;  %v4639_v16 = vld [vmem:[%s6217_s2 + $0x7b8] ss:$12 sps:$4 sm:$0xff]  }
  0xff   : > { %4056 = vmatpush3.bf16.msra.mxu1 %v4568_v19  ;;  %v4644_v19 = vld [vmem:[%s6217_s2 + $0x7d0] ss:$12 sps:$4 sm:$0xff]  }
 0x100   : > { %3072 = vmatpush1.bf16.msra.mxu0 %v4564_v18  ;;  %4057 = vmatprep.subr.bf16.mxu1 %v4572_v23  ;;  %v4640_v18 = vld [vmem:[%s6217_s2 + $0xa08] ss:$12 sps:$4 sm:$0xff]  }
 0x101   : > { %3073 = vmatprep.subr.bf16.mxu0 %v4571_v22  ;;  %v4647_v22 = vld [vmem:[%s6217_s2 + $0xa24] ss:$12 sps:$4 sm:$0xff]   ;;  %v4648_v23 = vld [vmem:[%s6217_s2 + $0x8a8] ss:$12 sps:$4 sm:$0xff]  }
 0x103   : > { %4058 = vmatpush3.bf16.msra.mxu1 %v4573_v25  ;;  %v4649_v25 = vld [vmem:[%s6217_s2 + $0x7e8] ss:$12 sps:$4 sm:$0xff]  }
 0x104   : > { %3074 = vmatpush1.bf16.msra.mxu0 %v4569_v24  ;;  %4059 = vmatprep.subr.bf16.mxu1 %v4577_v27  ;;  %v4645_v24 = vld [vmem:[%s6217_s2 + $0xa20] ss:$12 sps:$4 sm:$0xff]  }
 0x105   : > { %3075 = vmatprep.subr.bf16.mxu0 %v4576_v26  ;;  %v4652_v26 = vld [vmem:[%s6217_s2 + $0xa3c] ss:$12 sps:$4 sm:$0xff]   ;;  %v4653_v27 = vld [vmem:[%s6217_s2 + $0x8c0] ss:$12 sps:$4 sm:$0xff]  }
 0x107   : > { %4060 = vmatpush3.bf16.msra.mxu1 %v4578_v29  ;;  %v4654_v29 = vld [vmem:[%s6217_s2 + $0x800] ss:$12 sps:$4 sm:$0xff]  }
 0x108   : > { %3076 = vmatpush1.bf16.msra.mxu0 %v4574_v28  ;;  %4061 = vmatprep.subr.bf16.mxu1 %v4582_v32  ;;  %v4650_v28 = vld [vmem:[%s6217_s2 + $0xa38] ss:$12 sps:$4 sm:$0xff]  }
 0x109   : > { %3077 = vmatprep.subr.bf16.mxu0 %v4581_v31  ;;  %v4657_v31 = vld [vmem:[%s6217_s2 + $0xa54] ss:$12 sps:$4 sm:$0xff]   ;;  %v4658_v32 = vld [vmem:[%s6217_s2 + $0x8d8] ss:$12 sps:$4 sm:$0xff]  }
 0x10b   : > { %4062 = vmatpush3.bf16.msra.mxu1 %v4583_v33  ;;  %v4659_v33 = vld [vmem:[%s6217_s2 + $0x818] ss:$12 sps:$4 sm:$0xff]  }
 0x10c   : > { %3078 = vmatpush1.bf16.msra.mxu0 %v4579_v53  ;;  %4069 = vmatprep.subr.bf16.mxu1 %v4588_v37  ;;  %v4655_v53 = vld [vmem:[%s6217_s2 + $0xa50] ss:$12 sps:$4 sm:$0xff]  }
 0x10d   : > { %3088 = vmatprep.subr.bf16.mxu0 %v4587_v36  ;;  %v4662_v36 = vld [vmem:[%s6217_s2 + $0xa6c] ss:$12 sps:$4 sm:$0xff]   ;;  %v4663_v37 = vld [vmem:[%s6217_s2 + $0x8f0] ss:$12 sps:$4 sm:$0xff]  }
 0x10e   : > { %3323 = vmatmul.mubr.bf16.vlgmr.msra.gmra.mrb[16].mxu1 %v5321_v21  ;;  %v4595_v21 = vld [vmem:[%s6217_s2 + $0x930] ss:$12 sps:$4 sm:$0xff]  }
 0x10f   : > { %3080 = vmatmul.mubr.bf16.vlgmr.msra.gmra.mrb[0].mxu0 %v5744_v20  ;;  %4070 = vmatpush3.bf16.msra.mxu1 %v4589_v44  ;;  %v4664_v44 = vld [vmem:[%s6217_s2 + $0x830] ss:$12 sps:$4 sm:$0xff]  }
 0x110   : > { %3089 = vmatpush1.bf16.msra.mxu0 %v4585_v41  ;;  %4071 = vmatprep.subr.bf16.mxu1 %v4593_v34  ;;  %v4660_v41 = vld [vmem:[%s6217_s2 + $0xa68] ss:$12 sps:$4 sm:$0xff]  }
 0x111   : > { %3090 = vmatprep.subr.bf16.mxu0 %v4592_v45  ;;  %3362 = vmatprep.mubr.bf16.mxu1 %v5382_v40  ;;  %v4603_v40 = vld [vmem:[%s6217_s2 + $0x710] ss:$12 sps:$4 sm:$0xff]   ;;  %v4669_v34 = vld [vmem:[%s6217_s2 + $0x9c8] ss:$12 sps:$4 sm:$0xff]  }
 0x112   : > { %3120 = vmatprep.mubr.bf16.mxu0 %v5761_v46  ;;  %v4668_v45 = vld [vmem:[%s6217_s2 + $0xa84] ss:$12 sps:$4 sm:$0xff]  }
 0x113   : > { %4072 = vmatpush3.bf16.msra.mxu1 %v4594_v47  ;;  %v5953_v47 = vpack.c.bf16 %v5732_v35, %v5732_v35  ;;  %v4674_v35 = vld [vmem:[%s6217_s2 + $0x9e0] ss:$12 sps:$4 sm:$0xff]  }
 0x114   : > { %3091 = vmatpush1.bf16.msra.mxu0 %v4590_v55  ;;  %4073 = vmatprep.subr.bf16.mxu1 %v4598_v49  ;;  %v240_v55 = vcombine.high %v5935_v38, %v5935_v38  ;;  %v4670_v49 = vld [vmem:[%s6217_s2 + $0x908] ss:$12 sps:$4 sm:$0xff]  }
 0x115   : > { %3092 = vmatprep.subr.bf16.mxu0 %v4597_v48  ;;  %v4666_v48 = vld [vmem:[%s6217_s2 + $0xa80] ss:$12 sps:$4 sm:$0xff]  }
 0x117   : > { %4074 = vmatpush3.bf16.msra.mxu1 %v4599_v50  ;;  %v5967_v50 = vpack.c.bf16 %v240_v55, %v240_v55 }
 0x118   : > { %3093 = vmatpush1.bf16.msra.mxu0 %v4595_v21  ;;  %4075 = vmatprep.subr.bf16.mxu1 %v4603_v40  ;;  %v4673_v21 = vld [vmem:[%s6217_s2 + $0xa9c] ss:$12 sps:$4 sm:$0xff]   ;;  %v4675_v40 = vld [vmem:[%s6217_s2 + $0x920] ss:$12 sps:$4 sm:$0xff]  }
 0x119   : > { %3094 = vmatprep.subr.bf16.mxu0 %v4602_v51  ;;  %v4671_v51 = vld [vmem:[%s6217_s2 + $0xa98] ss:$12 sps:$4 sm:$0xff]  }
 0x11b   : > { %4076 = vmatpush3.bf16.msra.mxu1 %v4604_v54  ;;  %v4676_v54 = vld [vmem:[%s6217_s2 + $0xab0] ss:$12 sps:$4 sm:$0xff]  }
 0x11c   : > { %3095 = vmatpush1.bf16.msra.mxu0 %v4600_v52  ;;  %4077 = vmatprep.subr.bf16.mxu1 %v4608_v57  ;;  %v4678_v52 = vld [vmem:[%s6217_s2 + $0xab4] ss:$12 sps:$4 sm:$0xff]   ;;  %v4683_v57 = vld [vmem:[%s6217_s2 + $0xacc] ss:$12 sps:$4 sm:$0xff]  }
 0x11d   : > { %3096 = vmatprep.subr.bf16.mxu0 %v4607_v56  ;;  %v4680_v56 = vld [vmem:[%s6217_s2 + $0x938] ss:$12 sps:$4 sm:$0xff]  }
 0x11f   : > { %4078 = vmatpush3.bf16.msra.mxu1 %v4609_v59  ;;  %v4685_v59 = vld [vmem:[%s6217_s2 + $0x950] ss:$12 sps:$4 sm:$0xff]  }
 0x120   : > { %3097 = vmatpush1.bf16.msra.mxu0 %v4605_v58  ;;  %4079 = vmatprep.subr.bf16.mxu1 %v4613_v61  ;;  %v4681_v58 = vld [vmem:[%s6217_s2 + $0xac8] ss:$12 sps:$4 sm:$0xff]  }
 0x121   : > { %3098 = vmatprep.subr.bf16.mxu0 %v4612_v60  ;;  %v4688_v60 = vld [vmem:[%s6217_s2 + $0xae4] ss:$12 sps:$4 sm:$0xff]   ;;  %v4689_v61 = vld [vmem:[%s6217_s2 + $0xa28] ss:$12 sps:$4 sm:$0xff]  }
 0x123   : > { %4080 = vmatpush3.bf16.msra.mxu1 %v4614_v63  ;;  %v4690_v63 = vld [vmem:[%s6217_s2 + $0x968] ss:$12 sps:$4 sm:$0xff]  }
 0x124   : > { %3099 = vmatpush1.bf16.msra.mxu0 %v4610_v62  ;;  %4081 = vmatprep.subr.bf16.mxu1 %v4618_v1  ;;  %v4686_v62 = vld [vmem:[%s6217_s2 + $0xae0] ss:$12 sps:$4 sm:$0xff]  }
 0x125   : > { %3100 = vmatprep.subr.bf16.mxu0 %v4617_v0  ;;  %v4693_v0 = vld [vmem:[%s6217_s2 + $0xafc] ss:$12 sps:$4 sm:$0xff]   ;;  %v4694_v1 = vld [vmem:[%s6217_s2 + $0xa40] ss:$12 sps:$4 sm:$0xff]  }
 0x127   : > { %4082 = vmatpush3.bf16.msra.mxu1 %v4619_v8  ;;  %v4695_v8 = vld [vmem:[%s6217_s2 + $0x980] ss:$12 sps:$4 sm:$0xff]  }
 0x128   : > { %3101 = vmatpush1.bf16.msra.mxu0 %v4615_v2  ;;  %4083 = vmatprep.subr.bf16.mxu1 %v4623_v4  ;;  %v4691_v2 = vld [vmem:[%s6217_s2 + $0xaf8] ss:$12 sps:$4 sm:$0xff]  }
 0x129   : > { %3102 = vmatprep.subr.bf16.mxu0 %v4622_v3  ;;  %v4698_v3 = vld [vmem:[%s6217_s2 + $0xb14] ss:$12 sps:$4 sm:$0xff]   ;;  %v4699_v4 = vld [vmem:[%s6217_s2 + $0xa58] ss:$12 sps:$4 sm:$0xff]  }
 0x12b   : > { %4084 = vmatpush3.bf16.msra.mxu1 %v4624_v6 }
 0x12c   : > { %3103 = vmatpush1.bf16.msra.mxu0 %v4620_v5  ;;  %4091 = vmatprep.subr.bf16.mxu1 %v4628_v7  ;;  %v4696_v7 = vld [vmem:[%s6217_s2 + $0xb10] ss:$12 sps:$4 sm:$0xff]  }
 0x12d   : > { %3104 = vmatprep.subr.bf16.mxu0 %v4627_v42 }
 0x12e   : > { %3363 = vmatmul.mubr.bf16.vlgmr.msra.gmra.mrb[20].mxu1 %v5530_v30  ;;  %v4638_v30 = vld [vmem:[%s6217_s2 + $0x878] ss:$12 sps:$4 sm:$0xff]  }
 0x12f   : > { %4092 = vmatpush3.bf16.msra.mxu1 %v4629_v9  ;;  %3402 = vmatprep.mubr.bf16.mxu1 %v5560_v39  ;;  %v4643_v39 = vld [vmem:[%s6217_s2 + $0x890] ss:$12 sps:$4 sm:$0xff]  }
 0x130   : > { %3105 = vmatpush1.bf16.msra.mxu0 %v4625_v10  ;;  %4093 = vmatprep.subr.bf16.mxu1 %v4633_v12  ;;  %v4700_v10 = vld [vmem:[%s6217_s2 + $0x998] ss:$12 sps:$4 sm:$0xff]   ;;  %v4704_v12 = vld [vmem:[%s6217_s2 + $0xa70] ss:$12 sps:$4 sm:$0xff]  }
 0x131   : > { %3106 = vmatprep.subr.bf16.mxu0 %v4632_v11  ;;  %v4703_v11 = vld [vmem:[%s6217_s2 + $0xb2c] ss:$12 sps:$4 sm:$0xff]  }
 0x133   : > { %4094 = vmatpush3.bf16.msra.mxu1 %v4634_v43  ;;  %v4705_v43 = vld [vmem:[%s6217_s2 + $0x9b0] ss:$12 sps:$4 sm:$0xff]  }
 0x134   : > { %3107 = vmatpush1.bf16.msra.mxu0 %v4630_v13  ;;  %4095 = vmatprep.subr.bf16.mxu1 %v4638_v30  ;;  %v4701_v13 = vld [vmem:[%s6217_s2 + $0xb28] ss:$12 sps:$4 sm:$0xff]  }
 0x135   : > { %3108 = vmatprep.subr.bf16.mxu0 %v4637_v14  ;;  %v4708_v14 = vld [vmem:[%s6217_s2 + $0xb44] ss:$12 sps:$4 sm:$0xff]   ;;  %v4709_v30 = vld [vmem:[%s6217_s2 + $0xb48] ss:$12 sps:$4 sm:$0xff]  }
 0x137   : > { %4096 = vmatpush3.bf16.msra.mxu1 %v4639_v16  ;;  %v4710_v16 = vld [vmem:[%s6217_s2 + $0xa88] ss:$12 sps:$4 sm:$0xff]  }
 0x138   : > { %3109 = vmatpush1.bf16.msra.mxu0 %v4635_v15  ;;  %4097 = vmatprep.subr.bf16.mxu1 %v4643_v39  ;;  %v4706_v15 = vld [vmem:[%s6217_s2 + $0xb40] ss:$12 sps:$4 sm:$0xff]  }
 0x139   : > { %3110 = vmatprep.subr.bf16.mxu0 %v4642_v17  ;;  %v4713_v17 = vld [vmem:[%s6217_s2 + $0xb5c] ss:$12 sps:$4 sm:$0xff]   ;;  %v4714_v39 = vld [vmem:[%s6217_s2 + $0xb60] ss:$12 sps:$4 sm:$0xff]  }
 0x13b   : > { %4098 = vmatpush3.bf16.msra.mxu1 %v4644_v19  ;;  %v4715_v19 = vld [vmem:[%s6217_s2 + $0xaa0] ss:$12 sps:$4 sm:$0xff]  }
 0x13c   : > { %3111 = vmatpush1.bf16.msra.mxu0 %v4640_v18  ;;  %4099 = vmatprep.subr.bf16.mxu1 %v4648_v23  ;;  %v4711_v18 = vld [vmem:[%s6217_s2 + $0xb58] ss:$12 sps:$4 sm:$0xff]  }
 0x13d   : > { %3112 = vmatprep.subr.bf16.mxu0 %v4647_v22  ;;  %v4718_v22 = vld [vmem:[%s6217_s2 + $0xb74] ss:$12 sps:$4 sm:$0xff]   ;;  %v4719_v23 = vld [vmem:[%s6217_s2 + $0xb78] ss:$12 sps:$4 sm:$0xff]  }
 0x13f   : > { %4100 = vmatpush3.bf16.msra.mxu1 %v4649_v25  ;;  %v4720_v25 = vld [vmem:[%s6217_s2 + $0xab8] ss:$12 sps:$4 sm:$0xff]  }
 0x140   : > { %3113 = vmatpush1.bf16.msra.mxu0 %v4645_v24  ;;  %4101 = vmatprep.subr.bf16.mxu1 %v4653_v27  ;;  %v4716_v24 = vld [vmem:[%s6217_s2 + $0xb70] ss:$12 sps:$4 sm:$0xff]  }
 0x141   : > { %3114 = vmatprep.subr.bf16.mxu0 %v4652_v26  ;;  %v4723_v26 = vld [vmem:[%s6217_s2 + $0xb8c] ss:$12 sps:$4 sm:$0xff]   ;;  %v4724_v27 = vld [vmem:[%s6217_s2 + $0xb90] ss:$12 sps:$4 sm:$0xff]  }
 0x143   : > { %4102 = vmatpush3.bf16.msra.mxu1 %v4654_v29  ;;  %v4725_v29 = vld [vmem:[%s6217_s2 + $0xad0] ss:$12 sps:$4 sm:$0xff]  }
 0x144   : > { %3115 = vmatpush1.bf16.msra.mxu0 %v4650_v28  ;;  %4103 = vmatprep.subr.bf16.mxu1 %v4658_v32  ;;  %v4721_v28 = vld [vmem:[%s6217_s2 + $0xb88] ss:$12 sps:$4 sm:$0xff]  }
 0x145   : > { %3116 = vmatprep.subr.bf16.mxu0 %v4657_v31  ;;  %v4728_v31 = vld [vmem:[%s6217_s2 + $0xba4] ss:$12 sps:$4 sm:$0xff]   ;;  %v4729_v32 = vld [vmem:[%s6217_s2 + $0xba8] ss:$12 sps:$4 sm:$0xff]  }
 0x147   : > { %4104 = vmatpush3.bf16.msra.mxu1 %v4659_v33  ;;  %v4730_v33 = vld [vmem:[%s6217_s2 + $0xae8] ss:$12 sps:$4 sm:$0xff]  }
 0x148   : > { %3117 = vmatpush1.bf16.msra.mxu0 %v4655_v53  ;;  %4105 = vmatprep.subr.bf16.mxu1 %v4663_v37  ;;  %v4726_v53 = vld [vmem:[%s6217_s2 + $0xba0] ss:$12 sps:$4 sm:$0xff]  }
 0x149   : > { %3118 = vmatprep.subr.bf16.mxu0 %v4662_v36  ;;  %v4733_v36 = vld [vmem:[%s6217_s2 + $0xbbc] ss:$12 sps:$4 sm:$0xff]   ;;  %v4734_v37 = vld [vmem:[%s6217_s2 + $0xbc0] ss:$12 sps:$4 sm:$0xff]  }
 0x14b   : > { %4106 = vmatpush3.bf16.msra.mxu1 %v4664_v44  ;;  %v4735_v44 = vld [vmem:[%s6217_s2 + $0xb00] ss:$12 sps:$4 sm:$0xff]  }
 0x14c   : > { %3119 = vmatpush1.bf16.msra.mxu0 %v4660_v41  ;;  %4113 = vmatprep.subr.bf16.mxu1 %v4669_v34  ;;  %v4731_v41 = vld [vmem:[%s6217_s2 + $0xbb8] ss:$12 sps:$4 sm:$0xff]  }
 0x14d   : > { %3129 = vmatprep.subr.bf16.mxu0 %v4668_v45  ;;  %v4738_v45 = vld [vmem:[%s6217_s2 + $0xbd4] ss:$12 sps:$4 sm:$0xff]   ;;  %v4739_v34 = vld [vmem:[%s6217_s2 + $0xbd8] ss:$12 sps:$4 sm:$0xff]  }
 0x14e   : > { %3403 = vmatmul.mubr.bf16.vlgmr.msra.gmra.mrb[24].mxu1 %v5744_v20  ;;  %v4679_v20 = vld [vmem:[%s6217_s2 + $0x9f8] ss:$12 sps:$4 sm:$0xff]  }
 0x14f   : > { %3121 = vmatmul.mubr.bf16.vlgmr.msra.gmra.mrb[0].mxu0 %v5953_v47  ;;  %4114 = vmatpush3.bf16.msra.mxu1 %v4670_v49 }
 0x150   : > { %3130 = vmatpush1.bf16.msra.mxu0 %v4666_v48  ;;  %4115 = vmatprep.subr.bf16.mxu1 %v4674_v35  ;;  %v4740_v35 = vld [vmem:[%s6217_s2 + $0xb18] ss:$12 sps:$4 sm:$0xff]  }
 0x151   : > { %3131 = vmatprep.subr.bf16.mxu0 %v4673_v21  ;;  %3442 = vmatprep.mubr.bf16.mxu1 %v5761_v46  ;;  %v4684_v46 = vld [vmem:[%s6217_s2 + $0xa10] ss:$12 sps:$4 sm:$0xff]  }
 0x152   : > { %3161 = vmatprep.mubr.bf16.mxu0 %v5967_v50  ;;  %v4736_v21 = vld [vmem:[%s6217_s2 + $0xbd0] ss:$12 sps:$4 sm:$0xff]  }
 0x153   : > { %4116 = vmatpush3.bf16.msra.mxu1 %v4675_v40  ;;  %v4744_v40 = vld [vmem:[%s6217_s2 + $0xbf0] ss:$12 sps:$4 sm:$0xff]  }
 0x154   : > { %3132 = vmatpush1.bf16.msra.mxu0 %v4671_v51  ;;  %4117 = vmatprep.subr.bf16.mxu1 %v4679_v20  ;;  %v4743_v51 = vld [vmem:[%s6217_s2 + $0xbec] ss:$12 sps:$4 sm:$0xff]   ;;  %v4745_v20 = vld [vmem:[%s6217_s2 + $0xb30] ss:$12 sps:$4 sm:$0xff]  }
 0x155   : > { %3133 = vmatprep.subr.bf16.mxu0 %v4678_v52  ;;  %v4741_v52 = vld [vmem:[%s6217_s2 + $0xbe8] ss:$12 sps:$4 sm:$0xff]  }
 0x157   : > { %4118 = vmatpush3.bf16.msra.mxu1 %v4680_v56  ;;  %v779_v56 = vlaneseq }
 0x158   : > { %3134 = vmatpush1.bf16.msra.mxu0 %v4676_v54  ;;  %4119 = vmatprep.subr.bf16.mxu1 %v4684_v46  ;;  %v263_v54 = vpack.c.bf16 %v5935_v38, %v5935_v38 }
 0x159   : > { %3135 = vmatprep.subr.bf16.mxu0 %v4683_v57  ;;  %v780_v57 = vshrl.u32 %v779_v56, 7 }
 0x15b   : > { %4120 = vmatpush3.bf16.msra.mxu1 %v4685_v59  ;;  %v789_v46 = vsub.s32 2, %v780_v57 }
 0x15c   : > { %3136 = vmatpush1.bf16.msra.mxu0 %v4681_v58  ;;  %4121 = vmatprep.subr.bf16.mxu1 %v4689_v61  ;;  %v777_v58 = vld [vmem:[%s6218_s3] sm:$0x7] }
 0x15d   : > { %3137 = vmatprep.subr.bf16.mxu0 %v4688_v60  ;;  %v790_v59 = vrot.slane %v777_v58, %v789_v46 }
 0x15f   : > { %4122 = vmatpush3.bf16.msra.mxu1 %v4690_v63 }
 0x160   : > { %3138 = vmatpush1.bf16.msra.mxu0 %v4686_v62  ;;  %4123 = vmatprep.subr.bf16.mxu1 %v4694_v1 }
 0x161   : > { %3139 = vmatprep.subr.bf16.mxu0 %v4693_v0  ;;  %v6033_v5 = vpop.f32.mrb[0].mxu1 }
 0x162   : > { %v6035_v6 = vpop.f32.mrb[1].mxu1 }
 0x163   : > { %v2921_v42 = vpop.f32.mrb[2].mxu1  ;;  %4124 = vmatpush3.bf16.msra.mxu1 %v4695_v8 }
 0x164   : > { %3140 = vmatpush1.bf16.msra.mxu0 %v4691_v2  ;;  %v2922_v9 = vpop.f32.mrb[3].mxu1  ;;  %4125 = vmatprep.subr.bf16.mxu1 %v4699_v4 }
 0x165   : > { %3141 = vmatprep.subr.bf16.mxu0 %v4698_v3 }
 0x167   : > { %4126 = vmatpush3.bf16.msra.mxu1 %v4700_v10 }
 0x168   : > { %3142 = vmatpush1.bf16.msra.mxu0 %v4696_v7  ;;  %4127 = vmatprep.subr.bf16.mxu1 %v4704_v12 }
 0x169   : > { %3143 = vmatprep.subr.bf16.mxu0 %v4703_v11 }
 0x16b   : > { %4128 = vmatpush3.bf16.msra.mxu1 %v4705_v43 }
 0x16c   : > { %3144 = vmatpush1.bf16.msra.mxu0 %v4701_v13  ;;  %4135 = vmatprep.subr.bf16.mxu1 %v4709_v30 }
 0x16d   : > { %3145 = vmatprep.subr.bf16.mxu0 %v4708_v14 }
 0x16e   : > { %3443 = vmatmul.mubr.bf16.vlgmr.msra.gmra.mrb[28].mxu1 %v5953_v47 }
 0x16f   : > { %4136 = vmatpush3.bf16.msra.mxu1 %v4710_v16  ;;  %3482 = vmatprep.mubr.bf16.mxu1 %v5967_v50 }
 0x170   : > { %3146 = vmatpush1.bf16.msra.mxu0 %v4706_v15  ;;  %4137 = vmatprep.subr.bf16.mxu1 %v4714_v39 }
 0x171   : > { %3147 = vmatprep.subr.bf16.mxu0 %v4713_v17 }
 0x173   : > { %4138 = vmatpush3.bf16.msra.mxu1 %v4715_v19 }
 0x174   : > { %3148 = vmatpush1.bf16.msra.mxu0 %v4711_v18  ;;  %4139 = vmatprep.subr.bf16.mxu1 %v4719_v23 }
 0x175   : > { %3149 = vmatprep.subr.bf16.mxu0 %v4718_v22 }
 0x177   : > { %4140 = vmatpush3.bf16.msra.mxu1 %v4720_v25 }
 0x178   : > { %3150 = vmatpush1.bf16.msra.mxu0 %v4716_v24  ;;  %4141 = vmatprep.subr.bf16.mxu1 %v4724_v27 }
 0x179   : > { %3151 = vmatprep.subr.bf16.mxu0 %v4723_v26 }
 0x17b   : > { %4142 = vmatpush3.bf16.msra.mxu1 %v4725_v29 }
 0x17c   : > { %3152 = vmatpush1.bf16.msra.mxu0 %v4721_v28  ;;  %4143 = vmatprep.subr.bf16.mxu1 %v4729_v32 }
 0x17d   : > { %3153 = vmatprep.subr.bf16.mxu0 %v4728_v31 }
 0x17f   : > { %4144 = vmatpush3.bf16.msra.mxu1 %v4730_v33  ;;  %v785_v33 = vsub.s32 1, %v780_v57 }
 0x180   : > { %3154 = vmatpush1.bf16.msra.mxu0 %v4726_v53  ;;  %4145 = vmatprep.subr.bf16.mxu1 %v4734_v37  ;;  %v781_v53 = vsub.s32 0, %v780_v57 }
 0x181   : > { %3155 = vmatprep.subr.bf16.mxu0 %v4733_v36  ;;  %v3997_v55 = vpop.f32.mrb[4].mxu1  ;;  %v786_v37 = vrot.slane %v777_v58, %v785_v33 }
 0x182   : > { %v3998_v47 = vpop.f32.mrb[5].mxu1  ;;  %v782_v36 = vrot.slane %v777_v58, %v781_v53 }
 0x183   : > { %v3999_v48 = vadd.f32 %v3998_v47, %v3997_v55  ;;  %v4000_v49 = vpop.f32.mrb[6].mxu1  ;;  %4146 = vmatpush3.bf16.msra.mxu1 %v4735_v44  ;;  %v4159_v44 = vadd.f32 %v6035_v6, %v786_v37 }
 0x184   : > { %3156 = vmatpush1.bf16.msra.mxu0 %v4731_v41  ;;  %v4001_v50 = vpop.f32.mrb[7].mxu1  ;;  %4147 = vmatprep.subr.bf16.mxu1 %v4739_v34  ;;  %v4157_v41 = vadd.f32 %v6033_v5, %v782_v36 }
 0x185   : > { %3157 = vmatprep.subr.bf16.mxu0 %v4738_v45  ;;  %v3205_v62 = vadd.f32 %v3999_v48, %v790_v59 }
 0x187   : > { %4148 = vmatpush3.bf16.msra.mxu1 %v4740_v35 }
 0x188   : > { %3158 = vmatpush1.bf16.msra.mxu0 %v4736_v21  ;;  %4149 = vmatprep.subr.bf16.mxu1 %v4744_v40  ;;  %v3491_v40 = vld [vmem:[%s210_s13 + $0x8] sm:$0xf] }
 0x189   : > { %3159 = vmatprep.subr.bf16.mxu0 %v4743_v51  ;;  %v3490_v51 = vld [vmem:[%s210_s13] sm:$0xff] }
 0x18b   : > { %4150 = vmatpush3.bf16.msra.mxu1 %v4745_v20 }
 0x18c   : > { %3160 = vmatpush1.bf16.msra.mxu0 %v4741_v52 }
 0x18e   : > { %3483 = vmatmul.mubr.bf16.vlgmr.msra.gmra.mrb[32].mxu1 %v263_v54 }
 0x18f   : > { %3162 = vmatmul.mubr.bf16.vlgmr.msra.gmra.mrb[0].mxu0 %v263_v54 }
 0x1a1   : > { %v4019_v60 = vpop.f32.mrb[8].mxu1 }
 0x1a2   : > { %v4020_v61 = vpop.f32.mrb[9].mxu1 }
 0x1a3   : > { %v4021_v63 = vadd.f32 %v4020_v61, %v4019_v60  ;;  %v4022_v0 = vpop.f32.mrb[10].mxu1 }
 0x1a4   : > { %v4023_v1 = vpop.f32.mrb[11].mxu1 }
 0x1a5   : > { %v3245_v2 = vadd.f32 %v4021_v63, %v3205_v62 }
 0x1c1   : > { %v4041_v38 = vpop.f32.mrb[12].mxu1 }
 0x1c2   : > { %v4042_v8 = vpop.f32.mrb[13].mxu1 }
 0x1c3   : > { %v4043_v3 = vadd.f32 %v4042_v8, %v4041_v38  ;;  %v4044_v4 = vpop.f32.mrb[14].mxu1 }
 0x1c4   : > { %v4045_v42 = vpop.f32.mrb[15].mxu1 }
 0x1c5   : > { %v3285_v7 = vadd.f32 %v4043_v3, %v3245_v2 }
 0x1e1   : > { %v4063_v10 = vpop.f32.mrb[16].mxu1 }
 0x1e2   : > { %v4064_v9 = vpop.f32.mrb[17].mxu1 }
 0x1e3   : > { %v4065_v11 = vadd.f32 %v4064_v9, %v4063_v10  ;;  %v4066_v12 = vpop.f32.mrb[18].mxu1 }
 0x1e4   : > { %v4067_v13 = vpop.f32.mrb[19].mxu1 }
 0x1e5   : > { %v3325_v43 = vadd.f32 %v4065_v11, %v3285_v7 }
 0x201   : > { %v4085_v14 = vpop.f32.mrb[20].mxu1 }
 0x202   : > { %v4086_v30 = vpop.f32.mrb[21].mxu1 }
 0x203   : > { %v4087_v15 = vadd.f32 %v4086_v30, %v4085_v14  ;;  %v4088_v16 = vpop.f32.mrb[22].mxu1 }
 0x204   : > { %v4089_v17 = vpop.f32.mrb[23].mxu1 }
 0x205   : > { %v3365_v39 = vadd.f32 %v4087_v15, %v3325_v43 }
 0x221   : > { %v4107_v18 = vpop.f32.mrb[24].mxu1 }
 0x222   : > { %v4108_v19 = vpop.f32.mrb[25].mxu1 }
 0x223   : > { %v4109_v22 = vadd.f32 %v4108_v19, %v4107_v18  ;;  %v4110_v23 = vpop.f32.mrb[26].mxu1 }
 0x224   : > { %v4111_v24 = vpop.f32.mrb[27].mxu1 }
 0x225   : > { %v3405_v25 = vadd.f32 %v4109_v22, %v3365_v39 }
 0x241   : > { %v4129_v26 = vpop.f32.mrb[28].mxu1 }
 0x242   : > { %v4130_v27 = vpop.f32.mrb[29].mxu1 }
 0x243   : > { %v4131_v28 = vadd.f32 %v4130_v27, %v4129_v26  ;;  %v4132_v29 = vpop.f32.mrb[30].mxu1 }
 0x244   : > { %v4133_v31 = vpop.f32.mrb[31].mxu1 }
 0x245   : > { %v3445_v32 = vadd.f32 %v4131_v28, %v3405_v25 }
 0x261   : > { %v4151_v34 = vpop.f32.mrb[32].mxu1 }
 0x262   : > { %v3163_v45 = vpop.f32.mrb[0].mxu0  ;;  %v4152_v48 = vpop.f32.mrb[33].mxu1 }
 0x263   : > { %v4158_v55 = vadd.f32 %v4157_v41, %v3163_v45  ;;  %v3165_v47 = vpop.f32.mrb[1].mxu0  ;;  %v4153_v21 = vadd.f32 %v4152_v48, %v4151_v34  ;;  %v4154_v50 = vpop.f32.mrb[34].mxu1 }
 0x264   : > { %v4160_v49 = vadd.f32 %v4159_v44, %v3165_v47  ;;  %v3167_v35 = vpop.f32.mrb[2].mxu0  ;;  %v4155_v6 = vpop.f32.mrb[35].mxu1 }
 0x265   : > { %v3168_v5 = vpop.f32.mrb[3].mxu0  ;;  %v3485_v20 = vadd.f32 %v4153_v21, %v3445_v32 }
 0x266   : > { %v3494_v52 = vcombine.low %v4158_v55, %v4160_v49 }
 0x267   : > { %v3497_v56 = vadd.f32 %v3491_v40, %v3485_v20 }
 0x268   : > { %v3496_v54 = vadd.f32 %v3494_v52, %v3490_v51 }
 0x269   : > { %3499 = vst [vmem:[%s205_s14 + $0x8] sm:$0xf] %v3497_v56 }
 0x26a   : > { %3498 = vst [vmem:[%s205_s14] sm:$0xff] %v3496_v54 }
 0x26b   : > { %4760 = shalt.err (!%p4757_p3)
}
 0x26c   : > { %s4761_s6 = scalar_lea.hbm %s6171_s27, 192  ;;  %s4765_s9 = scalar_lea.hbm %s6219_s4, 384 }
 0x26d   : > { %p4762_p4 = scmp.ne.s32.totalorder %s6171_s27, %s4761_s6  ;;  %p4766_p9 = scmp.lt.u32.totalorder %s6171_s27, %s6219_s4 }
 0x26e   : > { %p4767_p10 = scmp.lt.u32.totalorder %s4765_s9, %s4761_s6  ;;  %p4769_p12 = scmp.lt.u32.totalorder %s4761_s6, %s6171_s27 }
 0x26f   : > { %p4763_p7 = pnand %p4762_p4, %p4875_p5 }
 0x270   : > { %p4768_p11 = por %p4767_p10, %p4766_p9 }
 0x271   : > { %p4764_p8 = pneg %p4763_p7 }
 0x272   : > { %p4770_p13 = por %p4769_p12, %p4768_p11 }
 0x274   : > { %p4771_p0 = pnand %p4770_p13, %p4764_p8 }
 0x276   : > { %4774 = shalt.err (!%p4771_p0)
}
 0x277   : > { %4188 = dma.vmem_to_hbm [thread:$0]  (%p4875_p5), %s6173_s20, 192, %s6171_s27, %s3501_s19  }
 0x278 PF: > { %p4194_p1 = scmp.ge.s32.totalorder %s4809_s18, 2  ;;  %s3527_s13 = sand.u32 1, %s4797_s15  }
 0x279   : > { %s3528_s7 = scalar_lea.sflag [#allocation3], %s3527_s13 }
 0x27a   : > { %p4191_p2 = pnand %p4194_p1, %p4879_p6 }
 0x27c   : > { %4792 = dma.done.wait (!%p4191_p2), %s3528_s7, 192  }
 0x27d   : > { %4794 = vsyncadd (!%p4191_p2), %s3528_s7, 4294967104  ;;  %p14_p3 = scmp.ge.s32.totalorder %s4862_s21, 4   ;;  %s6222_s15 = smov %s4801_s16 }
 0x27e   : > { %s6223_s16 = smov %s4805_s17  ;;  %s6224_s17 = smov %s4873_s24 }
 0x27f   : > { %s6225_s18 = smov %s4862_s21  ;;  %16 = sbr.rel (!%p14_p3) target bundleno = 3 (0x3), region = 74 }
 0x286   :  { %3533 = vsyncpa [#allocation3], 1 }
 0x287   :  { %3535 = vsyncpa [#allocation3 + $0x1], 1 }

// kernel: dual_forward.2
= control target key start
LH: loop header
LB: loop body
LE: loop exit
PB: predicated region body
PF: predicated region fallthrough
CT: control target
= control target key end

     0   :  { %s8182_s0 = inlined_call_operand.hbm [shape: s32[2], index: 0, kind: input, shape index: {}]   ;;  %s8183_s1 = inlined_call_operand.vmem [shape: f32[2,8,384], index: 1, kind: input, shape index: {}]   ;;  %s8184_s2 = inlined_call_operand.vmem [shape: f32[2,3,8], index: 2, kind: input, shape index: {}]   ;;  %s8185_s3 = inlined_call_operand.hbm [shape: bf16[384,1536], index: 3, kind: input, shape index: {}]   ;;  %s8186_s4 = inlined_call_operand.hbm [shape: bf16[512,384], index: 4, kind: input, shape index: {}]   ;;  %s8187_s5 = inlined_call_operand.hbm [shape: f32[1,384], index: 5, kind: input, shape index: {}]   ;;  %s8188_s6 = inlined_call_operand.hbm [shape: bf16[384,768], index: 6, kind: input, shape index: {}]   ;;  %s8189_s7 = inlined_call_operand.hbm [shape: f32[1,384], index: 7, kind: input, shape index: {}]   ;;  %s8190_s8 = inlined_call_operand.vmem [shape: f32[2,3,384], index: 8, kind: output, shape index: {}]  }
   0x1   :  { %s7457_s29 = scalar_lea.hbm %s8182_s0, 16 }
   0x2   :  { %p7458_p0 = scmp.ne.s32.totalorder %s8182_s0, %s7457_s29  ;;  %p7461_p1 = scmp.lt.u32.totalorder %s7457_s29, %s8182_s0 }
   0x4   :  { %p7463_p2 = pnand %p7461_p1, %p7458_p0 }
   0x6   :  { %7466 = shalt.err (!%p7463_p2)  }
   0x7   :  { %s7629_s12 = smov [#allocation3]  }
   0x8   :  { %14 = dma.hbm_to_smem %s8182_s0, 16, %s7629_s12, [#allocation2] }
   0x9   :  { %7611 = dma.done.wait [#allocation2], 16 }
   0xa   :  { %7612 = vsyncadd [#allocation2], 4294967280 }
   0xb   :  { %16 = sfence }
   0xc   :  { %17 = vsyncpa [#allocation5], 0 }
   0xd   :  { %18 = vsyncpa [#allocation7], 0 }
   0xe   :  { %19 = vsyncpa [#allocation10], 0  ;;  %s7702_s15 = smov 0  }
   0xf LB: > { %s7630_s16 = smov [#allocation6]   ;;  %s7708_s18 = sadd.s32 4294967295, %s7627_s15   ;;  %s7627_s15 = sphi %s7702_s15, %s25_s15  }
  0x10   : > { %s238_s17 = sshll.u32 %s7630_s16, 4  ;;  %p5780_p3 = scmp.ge.s32.totalorder %s7627_s15, 1  ;;  %s7713_s17 = int_to_ptr.vmem [resolvable:$true] %s238_s17 }
  0x11   : > { %p213_p4 = scmp.lt.s32.totalorder %s7627_s15, 3  ;;  %p8191_p5 = scmp.eq.s32.totalorder %s7708_s18, 0 }
  0x12   : > { %s7631_s19 = smov [#allocation9]   ;;  %s7632_s22 = smov [#allocation4]  }
  0x13   : > { %p7715_p6 = pnand %p5780_p3, %p213_p4  ;;  %s262_s20 = sshll.u32 %s7631_s19, 4  ;;  %s7721_s20 = int_to_ptr.vmem [resolvable:$true] %s262_s20 }
  0x14   : > { %s7729_s23 = sshll.u32 %s7632_s22, 4  ;;  %s7467_s26 = scalar_lea.hbm %s8186_s4, 12288  ;;  %s226_s23 = int_to_ptr.vmem [resolvable:$true] %s7729_s23 }
  0x15   : > { %s8193_s0 = scalar_select %p7715_p6, 1, 0 }
  0x16   : > { %p6571_p7 = pneg %p7715_p6  ;;  %p7468_p9 = scmp.ne.s32.totalorder %s8186_s4, %s7467_s26 }
  0x17   : > { %p7474_p13 = scmp.lt.u32.totalorder %s7467_s26, %s8186_s4 }
  0x18   : > { %p7725_p8 = pnand %p8191_p5, %p6571_p7 }
  0x1a   : > { %p7739_p10 = pneg %p7725_p8 }
  0x1c   : > { %p7470_p11 = pnand %p7739_p10, %p7468_p9 }
  0x1e   : > { %p7471_p12 = pneg %p7470_p11 }
  0x20   : > { %p7476_p0 = pnand %p7474_p13, %p7471_p12 }
  0x22   : > { %7479 = shalt.err (!%p7476_p0)
}
  0x23   : > { %s7480_s10 = scalar_lea.vmem %s7713_s17, 12288  ;;  %p7488_p4 = scmp.lt.s32.totalorder %s7713_s17, %s7713_s17 }
  0x24   : > { %p7481_p1 = scmp.ne.s32.totalorder %s7713_s17, %s7480_s10  ;;  %p7489_p7 = scmp.lt.s32.totalorder %s7480_s10, %s7480_s10 }
  0x26   : > { %p7483_p2 = pnand %p7481_p1, %p7739_p10  ;;  %p7490_p9 = por %p7489_p7, %p7488_p4 }
  0x28   : > { %p7484_p3 = pneg %p7483_p2 }
  0x2a   : > { %p7491_p11 = pnand %p7490_p9, %p7484_p3 }
  0x2c   : > { %7494 = shalt.err (!%p7491_p11)
}
  0x2d   : > { %s7633_s11 = smov 192   ;;  %s7634_s12 = smov 12  }
  0x2e   : > { %6577 = dma.hbm_to_vmem [thread:$0]  (!%p7725_p8), %s8186_s4, 12288, %s7713_s17, [#allocation7], %s7633_s11, %s7633_s11, %s7634_s12  }
  0x2f   : > { %s7495_s22 = scalar_lea.hbm %s8188_s6, 18432 }
  0x30   : > { %p7496_p12 = scmp.ne.s32.totalorder %s8188_s6, %s7495_s22  ;;  %p7502_p1 = scmp.lt.u32.totalorder %s7495_s22, %s8188_s6 }
  0x32   : > { %p7498_p13 = pnand %p7496_p12, %p7739_p10 }
  0x34   : > { %p7499_p0 = pneg %p7498_p13 }
  0x36   : > { %p7504_p2 = pnand %p7502_p1, %p7499_p0 }
  0x38   : > { %7507 = shalt.err (!%p7504_p2)
}
  0x39   : > { %s7508_s17 = scalar_lea.vmem %s7721_s20, 18432  ;;  %p7516_p9 = scmp.lt.s32.totalorder %s7721_s20, %s7721_s20 }
  0x3a   : > { %p7509_p3 = scmp.ne.s32.totalorder %s7721_s20, %s7508_s17  ;;  %p7517_p11 = scmp.lt.s32.totalorder %s7508_s17, %s7508_s17 }
  0x3c   : > { %p7511_p4 = pnand %p7509_p3, %p7739_p10  ;;  %p7518_p12 = por %p7517_p11, %p7516_p9 }
  0x3e   : > { %p7512_p7 = pneg %p7511_p4 }
  0x40   : > { %p7519_p13 = pnand %p7518_p12, %p7512_p7 }
  0x42   : > { %7522 = shalt.err (!%p7519_p13)
}
  0x43   : > { %s7635_s28 = smov 384   ;;  %s7636_s30 = smov 24  }
  0x44   : > { %6583 = dma.hbm_to_vmem [thread:$0]  (!%p7725_p8), %s8188_s6, 18432, %s7721_s20, [#allocation10], %s7635_s28, %s7635_s28, %s7636_s30  }
  0x45   : > { %s7523_s13 = scalar_lea.hbm %s8185_s3, 36864 }
  0x46   : > { %p7524_p0 = scmp.ne.s32.totalorder %s8185_s3, %s7523_s13  ;;  %p7530_p3 = scmp.lt.u32.totalorder %s7523_s13, %s8185_s3 }
  0x48   : > { %p7526_p1 = pnand %p7524_p0, %p7739_p10 }
  0x4a   : > { %p7527_p2 = pneg %p7526_p1 }
  0x4c   : > { %p7532_p4 = pnand %p7530_p3, %p7527_p2 }
  0x4e   : > { %7535 = shalt.err (!%p7532_p4)
}
  0x4f   : > { %s7536_s24 = scalar_lea.vmem %s226_s23, 36864  ;;  %p7544_p12 = scmp.lt.s32.totalorder %s226_s23, %s226_s23 }
  0x50   : > { %p7537_p7 = scmp.ne.s32.totalorder %s226_s23, %s7536_s24  ;;  %p7545_p13 = scmp.lt.s32.totalorder %s7536_s24, %s7536_s24 }
  0x52   : > { %p7539_p9 = pnand %p7537_p7, %p7739_p10  ;;  %p7546_p5 = por %p7545_p13, %p7544_p12 }
  0x54   : > { %p7540_p11 = pneg %p7539_p9 }
  0x56   : > { %p7547_p6 = pnand %p7546_p5, %p7540_p11 }
  0x58   : > { %7550 = shalt.err (!%p7547_p6)
}
  0x59   : > { %s7637_s20 = smov 768   ;;  %s7638_s25 = smov 48  }
  0x5a   : > { %6574 = dma.hbm_to_vmem [thread:$0]  (!%p7725_p8), %s8185_s3, 36864, %s226_s23, [#allocation5], %s7637_s20, %s7637_s20, %s7638_s25  }
  0x5b   : > { %s7639_s17 = smov [#allocation8]   ;;  %s7640_s30 = smov [#allocation11]  }
  0x5c   : > { %s252_s28 = sshll.u32 %s7639_s17, 4  ;;  %s276_s9 = sshll.u32 %s7640_s30, 4  ;;  %s253_s28 = int_to_ptr.vmem [resolvable:$true] %s252_s28  ;;  %s7802_s9 = int_to_ptr.vmem [resolvable:$true] %s276_s9 }
  0x5d   : > { %s7551_s12 = scalar_lea.hbm %s8187_s5, 48 }
  0x5e   : > { %p7552_p5 = scmp.ne.s32.totalorder %s8187_s5, %s7551_s12  ;;  %p7558_p1 = scmp.lt.u32.totalorder %s7551_s12, %s8187_s5 }
  0x60   : > { %p7554_p6 = pnand %p7552_p5, %p7739_p10 }
  0x62   : > { %p7555_p0 = pneg %p7554_p6 }
  0x64   : > { %p7560_p2 = pnand %p7558_p1, %p7555_p0 }
  0x66   : > { %7563 = shalt.err (!%p7560_p2)
}
  0x67   : > { %s7564_s19 = scalar_lea.vmem %s253_s28, 48  ;;  %s7571_s22 = scalar_lea.vmem %s253_s28, 64 }
  0x68   : > { %p7565_p3 = scmp.ne.s32.totalorder %s253_s28, %s7564_s19  ;;  %p7572_p9 = scmp.lt.s32.totalorder %s253_s28, %s253_s28 }
  0x69   : > { %p7573_p11 = scmp.lt.s32.totalorder %s7571_s22, %s7564_s19 }
  0x6a   : > { %p7567_p4 = pnand %p7565_p3, %p7739_p10 }
  0x6b   : > { %p7574_p12 = por %p7573_p11, %p7572_p9 }
  0x6c   : > { %p7568_p7 = pneg %p7567_p4 }
  0x6e   : > { %p7575_p13 = pnand %p7574_p12, %p7568_p7 }
  0x70   : > { %7578 = shalt.err (!%p7575_p13)
}
  0x71   : > { %6580 = dma.hbm_to_vmem [thread:$0]  (!%p7725_p8), %s8187_s5, 48, %s253_s28, [#allocation7]  }
  0x72   : > { %s7579_s27 = scalar_lea.hbm %s8189_s7, 48 }
  0x73   : > { %p7580_p5 = scmp.ne.s32.totalorder %s8189_s7, %s7579_s27  ;;  %p7586_p1 = scmp.lt.u32.totalorder %s7579_s27, %s8189_s7 }
  0x75   : > { %p7582_p6 = pnand %p7580_p5, %p7739_p10 }
  0x77   : > { %p7583_p0 = pneg %p7582_p6 }
  0x79   : > { %p7588_p2 = pnand %p7586_p1, %p7583_p0 }
  0x7b   : > { %7591 = shalt.err (!%p7588_p2)
}
  0x7c   : > { %s7592_s28 = scalar_lea.vmem %s7802_s9, 48  ;;  %s7599_s12 = scalar_lea.vmem %s7802_s9, 64 }
  0x7d   : > { %p7593_p3 = scmp.ne.s32.totalorder %s7802_s9, %s7592_s28  ;;  %p7600_p9 = scmp.lt.s32.totalorder %s7802_s9, %s7802_s9 }
  0x7e   : > { %p7601_p11 = scmp.lt.s32.totalorder %s7599_s12, %s7592_s28 }
  0x7f   : > { %p7595_p4 = pnand %p7593_p3, %p7739_p10 }
  0x80   : > { %p7602_p12 = por %p7601_p11, %p7600_p9 }
  0x81   : > { %p7596_p7 = pneg %p7595_p4 }
  0x83   : > { %p7603_p13 = pnand %p7602_p12, %p7596_p7 }
  0x85   : > { %7606 = shalt.err (!%p7603_p13)
}
  0x86   : > { %6586 = dma.hbm_to_vmem [thread:$0]  (!%p7725_p8), %s8189_s7, 48, %s7802_s9, [#allocation10]  }
  0x87   : > { %p8196_p5 = scmp.ne.s32.totalorder %s8193_s0, 0 }
  0x88   : > { %p8197_p10 = scmp.eq.s32.totalorder (!%p8196_p5), %s7708_s18, 0 }
  0x89   : > { %304 = sbr.rel (%p8196_p5) target bundleno = 2416 (0x970), region = 48 }
  0x90   : > { %7614 = dma.done.wait (%p8197_p10), [#allocation5], 36864   ;;  %p8198_p6 = pmov %p8197_p10 }
  0x92   : > { %7616 = vsyncadd (%p8198_p6), [#allocation5], 4294930432  ;;  %p8199_p0 = pmov %p8198_p6 }
  0x94   : > { %7618 = dma.done.wait (%p8199_p0), [#allocation7], 12336   ;;  %p8200_p1 = pmov %p8199_p0 }
  0x95   : > { %p8201_p2 = pmov %p8199_p0 }
  0x96   : > { %7620 = vsyncadd (%p8200_p1), [#allocation7], 4294954960 }
  0x97   : > { %7622 = dma.done.wait (%p8201_p2), [#allocation10], 18480   ;;  %p8202_p8 = pmov %p8199_p0 }
  0x98   : > { %v7641_v0 = vmov 0   ;;  %v6646_v1 = vld [vmem:[#allocation4 + $0x4] ss:$48 sps:$4 sm:$0xff]   ;;  %v6650_v3 = vld [vmem:[#allocation4] ss:$48 sps:$4 sm:$0xff]   ;;  %p356_p3 = scmp.lt.s32.totalorder %s7708_s18, 1 }
  0x99   : > { %7624 = vsyncadd (%p8202_p8), [#allocation10], 4294948816  ;;  %2178 = vmatprep.mubr.bf16.mxu0 %v7641_v0  ;;  %v6648_v2 = vld [vmem:[#allocation4 + $0x604] ss:$48 sps:$4 sm:$0xff]   ;;  %2105 = vmatprep.subr.bf16.mxu1 %v6646_v1  ;;  %v6651_v4 = vld [vmem:[#allocation4 + $0x600] ss:$48 sps:$4 sm:$0xff]  }
  0x9a   : > { %2146 = vmatprep.subr.bf16.mxu0 %v6648_v2  ;;  %v6652_v5 = vld [vmem:[#allocation4 + $0x64] ss:$48 sps:$4 sm:$0xff]   ;;  %2106 = vmatpush1.bf16.msra.mxu1 %v6650_v3  ;;  %v6656_v7 = vld [vmem:[#allocation4 + $0x60] ss:$48 sps:$4 sm:$0xff]   ;;  %s7863_s0 = scalar_select %p356_p3, %s7708_s18, 1  ;;  %vm7643_vm0 = vmmov 0  }
  0x9b   : > { %2147 = vmatpush1.bf16.msra.mxu0 %v6651_v4  ;;  %v6654_v6 = vld [vmem:[#allocation4 + $0x664] ss:$48 sps:$4 sm:$0xff]   ;;  %2107 = vmatprep.subr.bf16.mxu1 %v6652_v5  ;;  %v6657_v8 = vld [vmem:[#allocation4 + $0x660] ss:$48 sps:$4 sm:$0xff]   ;;  %vm2669_vm1 = vcmask 523264   ;;  %s7644_s23 = smov 64  }
  0x9c   : > { %2148 = vmatprep.subr.bf16.mxu0 %v6654_v6  ;;  %v6658_v9 = vld [vmem:[#allocation4 + $0xc4] ss:$48 sps:$4 sm:$0xff]   ;;  %v6662_v11 = vld [vmem:[#allocation4 + $0xc0] ss:$48 sps:$4 sm:$0xff]   ;;  %s6549_s21 = smul.u32 24, %s7863_s0  ;;  %vm3153_vm2 = vcmask 1043456  }
  0x9d   : > { %v6660_v10 = vld [vmem:[#allocation4 + $0x6c4] ss:$48 sps:$4 sm:$0xff]   ;;  %v6663_v12 = vld [vmem:[#allocation4 + $0x6c0] ss:$48 sps:$4 sm:$0xff]   ;;  %s3040_s19 = sld [smem:[#allocation3 + %s7708_s18]]  ;;  %vm3053_vm4 = vcmask 64512  }
  0x9e   : > { %2108 = vmatpush1.bf16.msra.mxu1 %v6656_v7  ;;  %v6664_v13 = vld [vmem:[#allocation4 + $0x124] ss:$48 sps:$4 sm:$0xff]   ;;  %v6668_v15 = vld [vmem:[#allocation4 + $0x120] ss:$48 sps:$4 sm:$0xff]   ;;  %s7869_s16 = scalar_lea.vmem %s8183_s1, %s6549_s21  ;;  %v6744_v7 = vld [vmem:[#allocation4 + $0xc] ss:$48 sps:$4 sm:$0xff]  }
  0x9f   : > { %2149 = vmatpush1.bf16.msra.mxu0 %v6657_v8  ;;  %2109 = vmatprep.subr.bf16.mxu1 %v6658_v9  ;;  %v6666_v14 = vld [vmem:[#allocation4 + $0x724] ss:$48 sps:$4 sm:$0xff]   ;;  %v6669_v16 = vld [vmem:[#allocation4 + $0x720] ss:$48 sps:$4 sm:$0xff]   ;;  %v372_v50 = vld [vmem:[%s7869_s16 + $0x8] sm:$0xff]  ;;  %s5794_s18 = sshll.u32 %s7863_s0, 2 }
  0xa0   : > { %2150 = vmatprep.subr.bf16.mxu0 %v6660_v10  ;;  %v6670_v17 = vld [vmem:[#allocation4 + $0x184] ss:$48 sps:$4 sm:$0xff]   ;;  %v6674_v19 = vld [vmem:[#allocation4 + $0x180] ss:$48 sps:$4 sm:$0xff]   ;;  %v7876_v53 = vpack.c.bf16 %v372_v50, %v372_v50  ;;  %v6742_v10 = vld [vmem:[#allocation4 + $0x8] ss:$48 sps:$4 sm:$0xff]   ;;  %s364_s20 = scalar_lea.vmem %s8184_s2, %s5794_s18 }
  0xa1   : > { %v6672_v18 = vld [vmem:[#allocation4 + $0x784] ss:$48 sps:$4 sm:$0xff]   ;;  %v6675_v20 = vld [vmem:[#allocation4 + $0x780] ss:$48 sps:$4 sm:$0xff]   ;;  %s6550_s25 = smul.u32 12, %s7863_s0 }
  0xa2   : > { %2110 = vmatpush1.bf16.msra.mxu1 %v6662_v11  ;;  %v6676_v21 = vld [vmem:[#allocation4 + $0x1e4] ss:$48 sps:$4 sm:$0xff]   ;;  %v6680_v23 = vld [vmem:[#allocation4 + $0x1e0] ss:$48 sps:$4 sm:$0xff]   ;;  %2137 = vmatprep.mubr.bf16.mxu1 %v7876_v53 }
  0xa3   : > { %2151 = vmatpush1.bf16.msra.mxu0 %v6663_v12  ;;  %2111 = vmatprep.subr.bf16.mxu1 %v6664_v13  ;;  %v6678_v22 = vld [vmem:[#allocation4 + $0x7e4] ss:$48 sps:$4 sm:$0xff]   ;;  %v6681_v24 = vld [vmem:[#allocation4 + $0x7e0] ss:$48 sps:$4 sm:$0xff]   ;;  %v6750_v12 = vld [vmem:[#allocation4 + $0x6c] ss:$48 sps:$4 sm:$0xff]   ;;  %s369_s17 = scalar_lea.vmem %s8190_s8, %s6550_s25 }
  0xa4   : > { %2152 = vmatprep.subr.bf16.mxu0 %v6666_v14  ;;  %v6682_v25 = vld [vmem:[#allocation4 + $0x244] ss:$48 sps:$4 sm:$0xff]   ;;  %v6686_v27 = vld [vmem:[#allocation4 + $0x240] ss:$48 sps:$4 sm:$0xff]   ;;  %v6748_v14 = vld [vmem:[#allocation4 + $0x68] ss:$48 sps:$4 sm:$0xff]  }
  0xa5   : > { %v6684_v26 = vld [vmem:[#allocation4 + $0x844] ss:$48 sps:$4 sm:$0xff]   ;;  %v6687_v28 = vld [vmem:[#allocation4 + $0x840] ss:$48 sps:$4 sm:$0xff]  }
  0xa6   : > { %2112 = vmatpush1.bf16.msra.mxu1 %v6668_v15  ;;  %v6688_v29 = vld [vmem:[#allocation4 + $0x2a4] ss:$48 sps:$4 sm:$0xff]   ;;  %v6692_v31 = vld [vmem:[#allocation4 + $0x2a0] ss:$48 sps:$4 sm:$0xff]  }
  0xa7   : > { %2153 = vmatpush1.bf16.msra.mxu0 %v6669_v16  ;;  %2113 = vmatprep.subr.bf16.mxu1 %v6670_v17  ;;  %v6690_v30 = vld [vmem:[#allocation4 + $0x8a4] ss:$48 sps:$4 sm:$0xff]   ;;  %v6693_v32 = vld [vmem:[#allocation4 + $0x8a0] ss:$48 sps:$4 sm:$0xff]   ;;  %v6756_v16 = vld [vmem:[#allocation4 + $0xcc] ss:$48 sps:$4 sm:$0xff]  }
  0xa8   : > { %2154 = vmatprep.subr.bf16.mxu0 %v6672_v18  ;;  %v373_v33 = vld [vmem:[%s7869_s16 + $0x10] sm:$0xff]  ;;  %v371_v6 = vld [vmem:[%s7869_s16] sm:$0xff]  ;;  %v6754_v18 = vld [vmem:[#allocation4 + $0xc8] ss:$48 sps:$4 sm:$0xff]  }
  0xa9   : > { %v6694_v34 = vld [vmem:[#allocation4 + $0x304] ss:$48 sps:$4 sm:$0xff]   ;;  %v6696_v36 = vld [vmem:[#allocation4 + $0x10] ss:$48 sps:$4 sm:$0xff]   ;;  %v7872_v38 = vpack.c.bf16 %v373_v33, %v373_v33  ;;  %v7881_v9 = vpack.c.bf16 %v371_v6, %v371_v6 }
  0xaa   : > { %2114 = vmatpush1.bf16.msra.mxu1 %v6674_v19  ;;  %v6698_v35 = vld [vmem:[#allocation4 + $0x14] ss:$48 sps:$4 sm:$0xff]   ;;  %v6699_v37 = vld [vmem:[#allocation4 + $0x300] ss:$48 sps:$4 sm:$0xff]  }
  0xab   : > { %2155 = vmatpush1.bf16.msra.mxu0 %v6675_v20  ;;  %2115 = vmatprep.subr.bf16.mxu1 %v6676_v21  ;;  %v6700_v39 = vld [vmem:[#allocation4 + $0x364] ss:$48 sps:$4 sm:$0xff]   ;;  %v6702_v41 = vld [vmem:[#allocation4 + $0x70] ss:$48 sps:$4 sm:$0xff]   ;;  %v6762_v20 = vld [vmem:[#allocation4 + $0x12c] ss:$48 sps:$4 sm:$0xff]  }
  0xac   : > { %2156 = vmatprep.subr.bf16.mxu0 %v6678_v22  ;;  %v6704_v40 = vld [vmem:[#allocation4 + $0x74] ss:$48 sps:$4 sm:$0xff]   ;;  %v6705_v42 = vld [vmem:[#allocation4 + $0x360] ss:$48 sps:$4 sm:$0xff]   ;;  %v6760_v22 = vld [vmem:[#allocation4 + $0x128] ss:$48 sps:$4 sm:$0xff]  }
  0xad   : > { %v6706_v43 = vld [vmem:[#allocation4 + $0x3c4] ss:$48 sps:$4 sm:$0xff]   ;;  %v6708_v45 = vld [vmem:[#allocation4 + $0xd0] ss:$48 sps:$4 sm:$0xff]  }
  0xae   : > { %2116 = vmatpush1.bf16.msra.mxu1 %v6680_v23  ;;  %v6710_v44 = vld [vmem:[#allocation4 + $0xd4] ss:$48 sps:$4 sm:$0xff]   ;;  %v6711_v46 = vld [vmem:[#allocation4 + $0x3c0] ss:$48 sps:$4 sm:$0xff]  }
  0xaf   : > { %2157 = vmatpush1.bf16.msra.mxu0 %v6681_v24  ;;  %2117 = vmatprep.subr.bf16.mxu1 %v6682_v25  ;;  %v6712_v47 = vld [vmem:[#allocation4 + $0x424] ss:$48 sps:$4 sm:$0xff]   ;;  %v6714_v49 = vld [vmem:[#allocation4 + $0x130] ss:$48 sps:$4 sm:$0xff]   ;;  %v6768_v24 = vld [vmem:[#allocation4 + $0x18c] ss:$48 sps:$4 sm:$0xff]  }
  0xb0   : > { %2158 = vmatprep.subr.bf16.mxu0 %v6684_v26  ;;  %v6716_v48 = vld [vmem:[#allocation4 + $0x134] ss:$48 sps:$4 sm:$0xff]   ;;  %v6717_v51 = vld [vmem:[#allocation4 + $0x420] ss:$48 sps:$4 sm:$0xff]   ;;  %v6766_v26 = vld [vmem:[#allocation4 + $0x188] ss:$48 sps:$4 sm:$0xff]  }
  0xb1   : > { %v6718_v52 = vld [vmem:[#allocation4 + $0x484] ss:$48 sps:$4 sm:$0xff]   ;;  %v6720_v55 = vld [vmem:[#allocation4 + $0x190] ss:$48 sps:$4 sm:$0xff]  }
  0xb2   : > { %2118 = vmatpush1.bf16.msra.mxu1 %v6686_v27  ;;  %v6722_v54 = vld [vmem:[#allocation4 + $0x194] ss:$48 sps:$4 sm:$0xff]   ;;  %v6723_v56 = vld [vmem:[#allocation4 + $0x480] ss:$48 sps:$4 sm:$0xff]  }
  0xb3   : > { %2159 = vmatpush1.bf16.msra.mxu0 %v6687_v28  ;;  %2119 = vmatprep.subr.bf16.mxu1 %v6688_v29  ;;  %v6724_v57 = vld [vmem:[#allocation4 + $0x4e4] ss:$48 sps:$4 sm:$0xff]   ;;  %v6726_v59 = vld [vmem:[#allocation4 + $0x1f0] ss:$48 sps:$4 sm:$0xff]   ;;  %v6774_v28 = vld [vmem:[#allocation4 + $0x1ec] ss:$48 sps:$4 sm:$0xff]  }
  0xb4   : > { %2160 = vmatprep.subr.bf16.mxu0 %v6690_v30  ;;  %v6728_v58 = vld [vmem:[#allocation4 + $0x1f4] ss:$48 sps:$4 sm:$0xff]   ;;  %v6729_v60 = vld [vmem:[#allocation4 + $0x4e0] ss:$48 sps:$4 sm:$0xff]   ;;  %v6772_v30 = vld [vmem:[#allocation4 + $0x1e8] ss:$48 sps:$4 sm:$0xff]  }
  0xb5   : > { %v6730_v61 = vld [vmem:[#allocation4 + $0x544] ss:$48 sps:$4 sm:$0xff]   ;;  %v6732_v63 = vld [vmem:[#allocation4 + $0x250] ss:$48 sps:$4 sm:$0xff]  }
  0xb6   : > { %2120 = vmatpush1.bf16.msra.mxu1 %v6692_v31  ;;  %v6734_v62 = vld [vmem:[#allocation4 + $0x254] ss:$48 sps:$4 sm:$0xff]   ;;  %v6735_v1 = vld [vmem:[#allocation4 + $0x540] ss:$48 sps:$4 sm:$0xff]  }
  0xb7   : > { %2161 = vmatpush1.bf16.msra.mxu0 %v6693_v32  ;;  %2121 = vmatprep.subr.bf16.mxu1 %v6694_v34  ;;  %v6736_v2 = vld [vmem:[#allocation4 + $0x5a4] ss:$48 sps:$4 sm:$0xff]   ;;  %v6738_v4 = vld [vmem:[#allocation4 + $0x2b0] ss:$48 sps:$4 sm:$0xff]   ;;  %v6780_v32 = vld [vmem:[#allocation4 + $0x24c] ss:$48 sps:$4 sm:$0xff]  }
  0xb8   : > { %2269 = vmatprep.subr.bf16.mxu0 %v6698_v35  ;;  %v6740_v3 = vld [vmem:[#allocation4 + $0x2b4] ss:$48 sps:$4 sm:$0xff]   ;;  %v6741_v5 = vld [vmem:[#allocation4 + $0x5a0] ss:$48 sps:$4 sm:$0xff]   ;;  %v6778_v34 = vld [vmem:[#allocation4 + $0x248] ss:$48 sps:$4 sm:$0xff]  }
  0xb9   : > { %v6747_v8 = vld [vmem:[#allocation4 + $0x314] ss:$48 sps:$4 sm:$0xff]   ;;  %v6745_v11 = vld [vmem:[#allocation4 + $0x310] ss:$48 sps:$4 sm:$0xff]  }
  0xba   : > { %2179 = vmatmul.mubr.bf16.vlgmr.msra.gmra.mrb[0].mxu0 %v7872_v38  ;;  %2122 = vmatpush1.bf16.msra.mxu1 %v6699_v37  ;;  %v6753_v13 = vld [vmem:[#allocation4 + $0x374] ss:$48 sps:$4 sm:$0xff]   ;;  %v6751_v15 = vld [vmem:[#allocation4 + $0x370] ss:$48 sps:$4 sm:$0xff]  }
  0xbb   : > { %2270 = vmatpush1.bf16.msra.mxu0 %v6696_v36  ;;  %2123 = vmatprep.subr.bf16.mxu1 %v6700_v39  ;;  %v6759_v17 = vld [vmem:[#allocation4 + $0x3d4] ss:$48 sps:$4 sm:$0xff]   ;;  %v6757_v19 = vld [vmem:[#allocation4 + $0x3d0] ss:$48 sps:$4 sm:$0xff]   ;;  %v6786_v36 = vld [vmem:[#allocation4 + $0x2ac] ss:$48 sps:$4 sm:$0xff]  }
  0xbc   : > { %2271 = vmatprep.subr.bf16.mxu0 %v6704_v40  ;;  %2301 = vmatprep.mubr.bf16.mxu0 %v7876_v53  ;;  %v6765_v21 = vld [vmem:[#allocation4 + $0x434] ss:$48 sps:$4 sm:$0xff]   ;;  %v6763_v23 = vld [vmem:[#allocation4 + $0x430] ss:$48 sps:$4 sm:$0xff]   ;;  %v6784_v39 = vld [vmem:[#allocation4 + $0x2a8] ss:$48 sps:$4 sm:$0xff]  }
  0xbd   : > { %v6771_v25 = vld [vmem:[#allocation4 + $0x494] ss:$48 sps:$4 sm:$0xff]   ;;  %v6769_v27 = vld [vmem:[#allocation4 + $0x490] ss:$48 sps:$4 sm:$0xff]  }
  0xbe   : > { %2124 = vmatpush1.bf16.msra.mxu1 %v6705_v42  ;;  %v6777_v29 = vld [vmem:[#allocation4 + $0x4f4] ss:$48 sps:$4 sm:$0xff]   ;;  %v6775_v31 = vld [vmem:[#allocation4 + $0x4f0] ss:$48 sps:$4 sm:$0xff]  }
  0xbf   : > { %2272 = vmatpush1.bf16.msra.mxu0 %v6702_v41  ;;  %2125 = vmatprep.subr.bf16.mxu1 %v6706_v43  ;;  %v6783_v33 = vld [vmem:[#allocation4 + $0x554] ss:$48 sps:$4 sm:$0xff]   ;;  %v6781_v35 = vld [vmem:[#allocation4 + $0x550] ss:$48 sps:$4 sm:$0xff]   ;;  %v6792_v41 = vld [vmem:[#allocation4 + $0x30c] ss:$48 sps:$4 sm:$0xff]  }
  0xc0   : > { %2273 = vmatprep.subr.bf16.mxu0 %v6710_v44  ;;  %v6789_v37 = vld [vmem:[#allocation4 + $0x5b4] ss:$48 sps:$4 sm:$0xff]   ;;  %v6787_v40 = vld [vmem:[#allocation4 + $0x5b0] ss:$48 sps:$4 sm:$0xff]   ;;  %v6790_v43 = vld [vmem:[#allocation4 + $0x308] ss:$48 sps:$4 sm:$0xff]  }
  0xc1   : > { %v6795_v42 = vld [vmem:[#allocation4 + $0x614] ss:$48 sps:$4 sm:$0xff]   ;;  %v6793_v44 = vld [vmem:[#allocation4 + $0x610] ss:$48 sps:$4 sm:$0xff]  }
  0xc2   : > { %2126 = vmatpush1.bf16.msra.mxu1 %v6711_v46  ;;  %v6801_v46 = vld [vmem:[#allocation4 + $0x674] ss:$48 sps:$4 sm:$0xff]   ;;  %v6829_v6 = vld [vmem:[#allocation4 + $0x850] ss:$48 sps:$4 sm:$0xff]  }
  0xc3   : > { %2274 = vmatpush1.bf16.msra.mxu0 %v6708_v45  ;;  %2127 = vmatprep.subr.bf16.mxu1 %v6712_v47  ;;  %v6798_v45 = vld [vmem:[#allocation4 + $0x36c] ss:$48 sps:$4 sm:$0xff]   ;;  %v6796_v47 = vld [vmem:[#allocation4 + $0x368] ss:$48 sps:$4 sm:$0xff]   ;;  %v6807_v50 = vld [vmem:[#allocation4 + $0x6d4] ss:$48 sps:$4 sm:$0xff]  }
  0xc4   : > { %2275 = vmatprep.subr.bf16.mxu0 %v6716_v48  ;;  %v6799_v48 = vld [vmem:[#allocation4 + $0x670] ss:$48 sps:$4 sm:$0xff]  }
  0xc6   : > { %2128 = vmatpush1.bf16.msra.mxu1 %v6717_v51  ;;  %v6802_v51 = vld [vmem:[#allocation4 + $0x3c8] ss:$48 sps:$4 sm:$0xff]  }
  0xc7   : > { %2276 = vmatpush1.bf16.msra.mxu0 %v6714_v49  ;;  %2129 = vmatprep.subr.bf16.mxu1 %v6718_v52  ;;  %v6804_v49 = vld [vmem:[#allocation4 + $0x3cc] ss:$48 sps:$4 sm:$0xff]   ;;  %v6805_v52 = vld [vmem:[#allocation4 + $0x6d0] ss:$48 sps:$4 sm:$0xff]  }
  0xc8   : > { %2277 = vmatprep.subr.bf16.mxu0 %v6722_v54  ;;  %v6810_v54 = vld [vmem:[#allocation4 + $0x42c] ss:$48 sps:$4 sm:$0xff]  }
  0xca   : > { %2130 = vmatpush1.bf16.msra.mxu1 %v6723_v56  ;;  %v6808_v56 = vld [vmem:[#allocation4 + $0x428] ss:$48 sps:$4 sm:$0xff]  }
  0xcb   : > { %2278 = vmatpush1.bf16.msra.mxu0 %v6720_v55  ;;  %2131 = vmatprep.subr.bf16.mxu1 %v6724_v57  ;;  %v6813_v55 = vld [vmem:[#allocation4 + $0x734] ss:$48 sps:$4 sm:$0xff]   ;;  %v6811_v57 = vld [vmem:[#allocation4 + $0x730] ss:$48 sps:$4 sm:$0xff]  }
  0xcc   : > { %2279 = vmatprep.subr.bf16.mxu0 %v6728_v58  ;;  %v6816_v58 = vld [vmem:[#allocation4 + $0x48c] ss:$48 sps:$4 sm:$0xff]  }
  0xce   : > { %2132 = vmatpush1.bf16.msra.mxu1 %v6729_v60  ;;  %v6814_v60 = vld [vmem:[#allocation4 + $0x488] ss:$48 sps:$4 sm:$0xff]  }
  0xcf   : > { %2280 = vmatpush1.bf16.msra.mxu0 %v6726_v59  ;;  %2133 = vmatprep.subr.bf16.mxu1 %v6730_v61  ;;  %v6819_v59 = vld [vmem:[#allocation4 + $0x794] ss:$48 sps:$4 sm:$0xff]   ;;  %v6817_v61 = vld [vmem:[#allocation4 + $0x790] ss:$48 sps:$4 sm:$0xff]  }
  0xd0   : > { %2281 = vmatprep.subr.bf16.mxu0 %v6734_v62  ;;  %v6822_v62 = vld [vmem:[#allocation4 + $0x4ec] ss:$48 sps:$4 sm:$0xff]  }
  0xd2   : > { %2134 = vmatpush1.bf16.msra.mxu1 %v6735_v1  ;;  %v6820_v1 = vld [vmem:[#allocation4 + $0x4e8] ss:$48 sps:$4 sm:$0xff]  }
  0xd3   : > { %2282 = vmatpush1.bf16.msra.mxu0 %v6732_v63  ;;  %2135 = vmatprep.subr.bf16.mxu1 %v6736_v2  ;;  %v6825_v63 = vld [vmem:[#allocation4 + $0x7f4] ss:$48 sps:$4 sm:$0xff]   ;;  %v6823_v2 = vld [vmem:[#allocation4 + $0x7f0] ss:$48 sps:$4 sm:$0xff]  }
  0xd4   : > { %2283 = vmatprep.subr.bf16.mxu0 %v6740_v3  ;;  %v6828_v3 = vld [vmem:[#allocation4 + $0x54c] ss:$48 sps:$4 sm:$0xff]  }
  0xd6   : > { %2136 = vmatpush1.bf16.msra.mxu1 %v6741_v5  ;;  %v6826_v5 = vld [vmem:[#allocation4 + $0x548] ss:$48 sps:$4 sm:$0xff]  }
  0xd7   : > { %2284 = vmatpush1.bf16.msra.mxu0 %v6738_v4  ;;  %2187 = vmatprep.subr.bf16.mxu1 %v6744_v7  ;;  %v6831_v4 = vld [vmem:[#allocation4 + $0x854] ss:$48 sps:$4 sm:$0xff]   ;;  %v6834_v7 = vld [vmem:[#allocation4 + $0x5ac] ss:$48 sps:$4 sm:$0xff]  }
  0xd8   : > { %2285 = vmatprep.subr.bf16.mxu0 %v6747_v8  ;;  %v6837_v8 = vld [vmem:[#allocation4 + $0x8b4] ss:$48 sps:$4 sm:$0xff]  }
  0xd9   : > { %2138 = vmatmul.mubr.bf16.vlgmr.msra.gmra.mrb[0].mxu1 %v7881_v9 }
  0xda   : > { %2188 = vmatpush1.bf16.msra.mxu1 %v6742_v10  ;;  %2219 = vmatprep.mubr.bf16.mxu1 %v7876_v53  ;;  %v6832_v10 = vld [vmem:[#allocation4 + $0x5a8] ss:$48 sps:$4 sm:$0xff]  }
  0xdb   : > { %2286 = vmatpush1.bf16.msra.mxu0 %v6745_v11  ;;  %2189 = vmatprep.subr.bf16.mxu1 %v6750_v12  ;;  %v6835_v11 = vld [vmem:[#allocation4 + $0x8b0] ss:$48 sps:$4 sm:$0xff]   ;;  %v6840_v12 = vld [vmem:[#allocation4 + $0x60c] ss:$48 sps:$4 sm:$0xff]  }
  0xdc   : > { %2287 = vmatprep.subr.bf16.mxu0 %v6753_v13  ;;  %v6927_v13 = vld [vmem:[#allocation4 + $0x24] ss:$48 sps:$4 sm:$0xff]  }
  0xde   : > { %2190 = vmatpush1.bf16.msra.mxu1 %v6748_v14  ;;  %v6838_v14 = vld [vmem:[#allocation4 + $0x608] ss:$48 sps:$4 sm:$0xff]  }
  0xdf   : > { %2288 = vmatpush1.bf16.msra.mxu0 %v6751_v15  ;;  %2191 = vmatprep.subr.bf16.mxu1 %v6756_v16  ;;  %v6843_v15 = vld [vmem:[#allocation4 + $0x66c] ss:$48 sps:$4 sm:$0xff]   ;;  %v6925_v16 = vld [vmem:[#allocation4 + $0x20] ss:$48 sps:$4 sm:$0xff]  }
  0xe0   : > { %2289 = vmatprep.subr.bf16.mxu0 %v6759_v17  ;;  %v6933_v17 = vld [vmem:[#allocation4 + $0x84] ss:$48 sps:$4 sm:$0xff]  }
  0xe2   : > { %2192 = vmatpush1.bf16.msra.mxu1 %v6754_v18  ;;  %v6841_v18 = vld [vmem:[#allocation4 + $0x668] ss:$48 sps:$4 sm:$0xff]  }
  0xe3   : > { %2290 = vmatpush1.bf16.msra.mxu0 %v6757_v19  ;;  %2193 = vmatprep.subr.bf16.mxu1 %v6762_v20  ;;  %v6846_v19 = vld [vmem:[#allocation4 + $0x6cc] ss:$48 sps:$4 sm:$0xff]   ;;  %v6931_v20 = vld [vmem:[#allocation4 + $0x80] ss:$48 sps:$4 sm:$0xff]  }
  0xe4   : > { %2291 = vmatprep.subr.bf16.mxu0 %v6765_v21  ;;  %v6939_v21 = vld [vmem:[#allocation4 + $0xe4] ss:$48 sps:$4 sm:$0xff]  }
  0xe6   : > { %2194 = vmatpush1.bf16.msra.mxu1 %v6760_v22  ;;  %v6844_v22 = vld [vmem:[#allocation4 + $0x6c8] ss:$48 sps:$4 sm:$0xff]  }
  0xe7   : > { %2292 = vmatpush1.bf16.msra.mxu0 %v6763_v23  ;;  %2195 = vmatprep.subr.bf16.mxu1 %v6768_v24  ;;  %v6849_v23 = vld [vmem:[#allocation4 + $0x72c] ss:$48 sps:$4 sm:$0xff]   ;;  %v6937_v24 = vld [vmem:[#allocation4 + $0xe0] ss:$48 sps:$4 sm:$0xff]  }
  0xe8   : > { %2293 = vmatprep.subr.bf16.mxu0 %v6771_v25  ;;  %v6945_v25 = vld [vmem:[#allocation4 + $0x144] ss:$48 sps:$4 sm:$0xff]  }
  0xea   : > { %2196 = vmatpush1.bf16.msra.mxu1 %v6766_v26  ;;  %v6847_v26 = vld [vmem:[#allocation4 + $0x728] ss:$48 sps:$4 sm:$0xff]  }
  0xeb   : > { %2294 = vmatpush1.bf16.msra.mxu0 %v6769_v27  ;;  %2197 = vmatprep.subr.bf16.mxu1 %v6774_v28  ;;  %v6852_v27 = vld [vmem:[#allocation4 + $0x78c] ss:$48 sps:$4 sm:$0xff]   ;;  %v6943_v28 = vld [vmem:[#allocation4 + $0x140] ss:$48 sps:$4 sm:$0xff]  }
  0xec   : > { %2295 = vmatprep.subr.bf16.mxu0 %v6777_v29  ;;  %v6948_v29 = vld [vmem:[#allocation4 + $0x1a4] ss:$48 sps:$4 sm:$0xff]  }
  0xee   : > { %2198 = vmatpush1.bf16.msra.mxu1 %v6772_v30  ;;  %v6850_v30 = vld [vmem:[#allocation4 + $0x788] ss:$48 sps:$4 sm:$0xff]  }
  0xef   : > { %2296 = vmatpush1.bf16.msra.mxu0 %v6775_v31  ;;  %2199 = vmatprep.subr.bf16.mxu1 %v6780_v32  ;;  %v6855_v31 = vld [vmem:[#allocation4 + $0x7ec] ss:$48 sps:$4 sm:$0xff]   ;;  %v6946_v32 = vld [vmem:[#allocation4 + $0x1a0] ss:$48 sps:$4 sm:$0xff]  }
  0xf0   : > { %2297 = vmatprep.subr.bf16.mxu0 %v6783_v33  ;;  %v6951_v33 = vld [vmem:[#allocation4 + $0x204] ss:$48 sps:$4 sm:$0xff]  }
  0xf2   : > { %2200 = vmatpush1.bf16.msra.mxu1 %v6778_v34  ;;  %v6853_v34 = vld [vmem:[#allocation4 + $0x7e8] ss:$48 sps:$4 sm:$0xff]  }
  0xf3   : > { %2298 = vmatpush1.bf16.msra.mxu0 %v6781_v35  ;;  %2201 = vmatprep.subr.bf16.mxu1 %v6786_v36  ;;  %v6858_v35 = vld [vmem:[#allocation4 + $0x84c] ss:$48 sps:$4 sm:$0xff]   ;;  %v6949_v36 = vld [vmem:[#allocation4 + $0x200] ss:$48 sps:$4 sm:$0xff]  }
  0xf4   : > { %2299 = vmatprep.subr.bf16.mxu0 %v6789_v37  ;;  %v6856_v37 = vld [vmem:[#allocation4 + $0x848] ss:$48 sps:$4 sm:$0xff]  }
  0xf6   : > { %2202 = vmatpush1.bf16.msra.mxu1 %v6784_v39  ;;  %v6954_v39 = vld [vmem:[#allocation4 + $0x264] ss:$48 sps:$4 sm:$0xff]  }
  0xf7   : > { %2300 = vmatpush1.bf16.msra.mxu0 %v6787_v40  ;;  %2203 = vmatprep.subr.bf16.mxu1 %v6792_v41  ;;  %v6861_v40 = vld [vmem:[#allocation4 + $0x8ac] ss:$48 sps:$4 sm:$0xff]   ;;  %v6952_v41 = vld [vmem:[#allocation4 + $0x260] ss:$48 sps:$4 sm:$0xff]  }
  0xf8   : > { %2310 = vmatprep.subr.bf16.mxu0 %v6795_v42  ;;  %v6957_v42 = vld [vmem:[#allocation4 + $0x2c4] ss:$48 sps:$4 sm:$0xff]  }
  0xfa   : > { %2302 = vmatmul.mubr.bf16.vlgmr.msra.gmra.mrb[4].mxu0 %v7881_v9  ;;  %2204 = vmatpush1.bf16.msra.mxu1 %v6790_v43  ;;  %v6859_v43 = vld [vmem:[#allocation4 + $0x8a8] ss:$48 sps:$4 sm:$0xff]  }
  0xfb   : > { %2311 = vmatpush1.bf16.msra.mxu0 %v6793_v44  ;;  %2205 = vmatprep.subr.bf16.mxu1 %v6798_v45  ;;  %v6864_v44 = vld [vmem:[#allocation4 + $0x1c] ss:$48 sps:$4 sm:$0xff]   ;;  %v6955_v45 = vld [vmem:[#allocation4 + $0x2c0] ss:$48 sps:$4 sm:$0xff]  }
  0xfc   : > { %2312 = vmatprep.subr.bf16.mxu0 %v6801_v46  ;;  %2342 = vmatprep.mubr.bf16.mxu0 %v7641_v0  ;;  %v6960_v46 = vld [vmem:[#allocation4 + $0x324] ss:$48 sps:$4 sm:$0xff]  }
  0xfe   : > { %2206 = vmatpush1.bf16.msra.mxu1 %v6796_v47  ;;  %v6862_v47 = vld [vmem:[#allocation4 + $0x18] ss:$48 sps:$4 sm:$0xff]  }
  0xff   : > { %2313 = vmatpush1.bf16.msra.mxu0 %v6799_v48  ;;  %2207 = vmatprep.subr.bf16.mxu1 %v6804_v49  ;;  %v6867_v48 = vld [vmem:[#allocation4 + $0x7c] ss:$48 sps:$4 sm:$0xff]   ;;  %v6958_v49 = vld [vmem:[#allocation4 + $0x320] ss:$48 sps:$4 sm:$0xff]  }
 0x100   : > { %2314 = vmatprep.subr.bf16.mxu0 %v6807_v50  ;;  %v6865_v50 = vld [vmem:[#allocation4 + $0x78] ss:$48 sps:$4 sm:$0xff]  }
 0x102   : > { %2208 = vmatpush1.bf16.msra.mxu1 %v6802_v51  ;;  %v6963_v51 = vld [vmem:[#allocation4 + $0x384] ss:$48 sps:$4 sm:$0xff]  }
 0x103   : > { %2315 = vmatpush1.bf16.msra.mxu0 %v6805_v52  ;;  %2209 = vmatprep.subr.bf16.mxu1 %v6810_v54  ;;  %v6870_v52 = vld [vmem:[#allocation4 + $0xdc] ss:$48 sps:$4 sm:$0xff]   ;;  %v6961_v54 = vld [vmem:[#allocation4 + $0x380] ss:$48 sps:$4 sm:$0xff]  }
 0x104   : > { %2316 = vmatprep.subr.bf16.mxu0 %v6813_v55  ;;  %v6966_v55 = vld [vmem:[#allocation4 + $0x3e4] ss:$48 sps:$4 sm:$0xff]  }
 0x106   : > { %2210 = vmatpush1.bf16.msra.mxu1 %v6808_v56  ;;  %v6868_v56 = vld [vmem:[#allocation4 + $0xd8] ss:$48 sps:$4 sm:$0xff]  }
 0x107   : > { %2317 = vmatpush1.bf16.msra.mxu0 %v6811_v57  ;;  %2211 = vmatprep.subr.bf16.mxu1 %v6816_v58  ;;  %v6873_v57 = vld [vmem:[#allocation4 + $0x13c] ss:$48 sps:$4 sm:$0xff]   ;;  %v6964_v58 = vld [vmem:[#allocation4 + $0x3e0] ss:$48 sps:$4 sm:$0xff]  }
 0x108   : > { %2318 = vmatprep.subr.bf16.mxu0 %v6819_v59  ;;  %v6969_v59 = vld [vmem:[#allocation4 + $0x444] ss:$48 sps:$4 sm:$0xff]  }
 0x10a   : > { %2212 = vmatpush1.bf16.msra.mxu1 %v6814_v60  ;;  %v6871_v60 = vld [vmem:[#allocation4 + $0x138] ss:$48 sps:$4 sm:$0xff]  }
 0x10b   : > { %2319 = vmatpush1.bf16.msra.mxu0 %v6817_v61  ;;  %2213 = vmatprep.subr.bf16.mxu1 %v6822_v62  ;;  %v6876_v61 = vld [vmem:[#allocation4 + $0x19c] ss:$48 sps:$4 sm:$0xff]   ;;  %v6967_v62 = vld [vmem:[#allocation4 + $0x440] ss:$48 sps:$4 sm:$0xff]  }
 0x10c   : > { %2320 = vmatprep.subr.bf16.mxu0 %v6825_v63  ;;  %v6972_v63 = vld [vmem:[#allocation4 + $0x4a4] ss:$48 sps:$4 sm:$0xff]  }
 0x10e   : > { %2214 = vmatpush1.bf16.msra.mxu1 %v6820_v1  ;;  %v6874_v1 = vld [vmem:[#allocation4 + $0x198] ss:$48 sps:$4 sm:$0xff]  }
 0x10f   : > { %2321 = vmatpush1.bf16.msra.mxu0 %v6823_v2  ;;  %2215 = vmatprep.subr.bf16.mxu1 %v6828_v3  ;;  %v6879_v2 = vld [vmem:[#allocation4 + $0x1fc] ss:$48 sps:$4 sm:$0xff]   ;;  %v6970_v3 = vld [vmem:[#allocation4 + $0x4a0] ss:$48 sps:$4 sm:$0xff]  }
 0x110   : > { %2322 = vmatprep.subr.bf16.mxu0 %v6831_v4  ;;  %v6975_v4 = vld [vmem:[#allocation4 + $0x504] ss:$48 sps:$4 sm:$0xff]  }
 0x112   : > { %2216 = vmatpush1.bf16.msra.mxu1 %v6826_v5  ;;  %v6877_v5 = vld [vmem:[#allocation4 + $0x1f8] ss:$48 sps:$4 sm:$0xff]  }
 0x113   : > { %2323 = vmatpush1.bf16.msra.mxu0 %v6829_v6  ;;  %2217 = vmatprep.subr.bf16.mxu1 %v6834_v7  ;;  %v6882_v6 = vld [vmem:[#allocation4 + $0x25c] ss:$48 sps:$4 sm:$0xff]   ;;  %v6973_v7 = vld [vmem:[#allocation4 + $0x500] ss:$48 sps:$4 sm:$0xff]  }
 0x114   : > { %2324 = vmatprep.subr.bf16.mxu0 %v6837_v8  ;;  %v6978_v8 = vld [vmem:[#allocation4 + $0x564] ss:$48 sps:$4 sm:$0xff]  }
 0x116   : > { %2218 = vmatpush1.bf16.msra.mxu1 %v6832_v10  ;;  %v6880_v10 = vld [vmem:[#allocation4 + $0x258] ss:$48 sps:$4 sm:$0xff]  }
 0x117   : > { %2325 = vmatpush1.bf16.msra.mxu0 %v6835_v11  ;;  %2228 = vmatprep.subr.bf16.mxu1 %v6840_v12  ;;  %v6885_v11 = vld [vmem:[#allocation4 + $0x2bc] ss:$48 sps:$4 sm:$0xff]   ;;  %v6976_v12 = vld [vmem:[#allocation4 + $0x560] ss:$48 sps:$4 sm:$0xff]  }
 0x118   : > { %2433 = vmatprep.subr.bf16.mxu0 %v6927_v13  ;;  %v6981_v13 = vld [vmem:[#allocation4 + $0x5c4] ss:$48 sps:$4 sm:$0xff]  }
 0x119   : > { %2220 = vmatmul.mubr.bf16.vlgmr.msra.gmra.mrb[4].mxu1 %v7881_v9 }
 0x11a   : > { %2343 = vmatmul.mubr.bf16.vlgmr.msra.gmra.mrb[4].mxu0 %v7872_v38  ;;  %2229 = vmatpush1.bf16.msra.mxu1 %v6838_v14  ;;  %v6883_v14 = vld [vmem:[#allocation4 + $0x2b8] ss:$48 sps:$4 sm:$0xff]  }
 0x11b   : > { %2260 = vmatprep.mubr.bf16.mxu1 %v7641_v0  ;;  %2230 = vmatprep.subr.bf16.mxu1 %v6843_v15  ;;  %v6888_v15 = vld [vmem:[#allocation4 + $0x31c] ss:$48 sps:$4 sm:$0xff]  }
 0x11c   : > { %2434 = vmatpush1.bf16.msra.mxu0 %v6925_v16  ;;  %2465 = vmatprep.mubr.bf16.mxu0 %v7876_v53  ;;  %v6979_v16 = vld [vmem:[#allocation4 + $0x5c0] ss:$48 sps:$4 sm:$0xff]  }
 0x11d   : > { %2435 = vmatprep.subr.bf16.mxu0 %v6933_v17  ;;  %v6984_v17 = vld [vmem:[#allocation4 + $0x624] ss:$48 sps:$4 sm:$0xff]  }
 0x11e   : > { %2231 = vmatpush1.bf16.msra.mxu1 %v6841_v18  ;;  %v6886_v18 = vld [vmem:[#allocation4 + $0x318] ss:$48 sps:$4 sm:$0xff]  }
 0x11f   : > { %2232 = vmatprep.subr.bf16.mxu1 %v6846_v19  ;;  %v6891_v19 = vld [vmem:[#allocation4 + $0x37c] ss:$48 sps:$4 sm:$0xff]  }
 0x120   : > { %2436 = vmatpush1.bf16.msra.mxu0 %v6931_v20  ;;  %v6982_v20 = vld [vmem:[#allocation4 + $0x620] ss:$48 sps:$4 sm:$0xff]  }
 0x121   : > { %2437 = vmatprep.subr.bf16.mxu0 %v6939_v21  ;;  %v6987_v21 = vld [vmem:[#allocation4 + $0x684] ss:$48 sps:$4 sm:$0xff]  }
 0x122   : > { %2233 = vmatpush1.bf16.msra.mxu1 %v6844_v22  ;;  %v6889_v22 = vld [vmem:[#allocation4 + $0x378] ss:$48 sps:$4 sm:$0xff]  }
 0x123   : > { %2234 = vmatprep.subr.bf16.mxu1 %v6849_v23  ;;  %v6894_v23 = vld [vmem:[#allocation4 + $0x3dc] ss:$48 sps:$4 sm:$0xff]  }
 0x124   : > { %2438 = vmatpush1.bf16.msra.mxu0 %v6937_v24  ;;  %v6985_v24 = vld [vmem:[#allocation4 + $0x680] ss:$48 sps:$4 sm:$0xff]  }
 0x125   : > { %2439 = vmatprep.subr.bf16.mxu0 %v6945_v25  ;;  %v6990_v25 = vld [vmem:[#allocation4 + $0x6e4] ss:$48 sps:$4 sm:$0xff]  }
 0x126   : > { %2235 = vmatpush1.bf16.msra.mxu1 %v6847_v26  ;;  %v6892_v26 = vld [vmem:[#allocation4 + $0x3d8] ss:$48 sps:$4 sm:$0xff]  }
 0x127   : > { %2236 = vmatprep.subr.bf16.mxu1 %v6852_v27  ;;  %v6897_v27 = vld [vmem:[#allocation4 + $0x43c] ss:$48 sps:$4 sm:$0xff]  }
 0x128   : > { %2440 = vmatpush1.bf16.msra.mxu0 %v6943_v28  ;;  %v6988_v28 = vld [vmem:[#allocation4 + $0x6e0] ss:$48 sps:$4 sm:$0xff]  }
 0x129   : > { %2441 = vmatprep.subr.bf16.mxu0 %v6948_v29  ;;  %v6993_v29 = vld [vmem:[#allocation4 + $0x744] ss:$48 sps:$4 sm:$0xff]  }
 0x12a   : > { %2237 = vmatpush1.bf16.msra.mxu1 %v6850_v30  ;;  %v6895_v30 = vld [vmem:[#allocation4 + $0x438] ss:$48 sps:$4 sm:$0xff]  }
 0x12b   : > { %2238 = vmatprep.subr.bf16.mxu1 %v6855_v31  ;;  %v6900_v31 = vld [vmem:[#allocation4 + $0x49c] ss:$48 sps:$4 sm:$0xff]  }
 0x12c   : > { %2442 = vmatpush1.bf16.msra.mxu0 %v6946_v32  ;;  %v6991_v32 = vld [vmem:[#allocation4 + $0x740] ss:$48 sps:$4 sm:$0xff]  }
 0x12d   : > { %2443 = vmatprep.subr.bf16.mxu0 %v6951_v33  ;;  %v6996_v33 = vld [vmem:[#allocation4 + $0x7a4] ss:$48 sps:$4 sm:$0xff]  }
 0x12e   : > { %2239 = vmatpush1.bf16.msra.mxu1 %v6853_v34  ;;  %v6898_v34 = vld [vmem:[#allocation4 + $0x498] ss:$48 sps:$4 sm:$0xff]  }
 0x12f   : > { %2240 = vmatprep.subr.bf16.mxu1 %v6858_v35  ;;  %v6903_v35 = vld [vmem:[#allocation4 + $0x4fc] ss:$48 sps:$4 sm:$0xff]  }
 0x130   : > { %2444 = vmatpush1.bf16.msra.mxu0 %v6949_v36  ;;  %v6994_v36 = vld [vmem:[#allocation4 + $0x7a0] ss:$48 sps:$4 sm:$0xff]  }
 0x131   : > { %2445 = vmatprep.subr.bf16.mxu0 %v6954_v39  ;;  %v6901_v39 = vld [vmem:[#allocation4 + $0x4f8] ss:$48 sps:$4 sm:$0xff]  }
 0x132   : > { %2241 = vmatpush1.bf16.msra.mxu1 %v6856_v37  ;;  %v6999_v37 = vld [vmem:[#allocation4 + $0x804] ss:$48 sps:$4 sm:$0xff]  }
 0x133   : > { %2242 = vmatprep.subr.bf16.mxu1 %v6861_v40  ;;  %v6906_v40 = vld [vmem:[#allocation4 + $0x55c] ss:$48 sps:$4 sm:$0xff]  }
 0x134   : > { %2446 = vmatpush1.bf16.msra.mxu0 %v6952_v41  ;;  %v6997_v41 = vld [vmem:[#allocation4 + $0x800] ss:$48 sps:$4 sm:$0xff]  }
 0x135   : > { %2447 = vmatprep.subr.bf16.mxu0 %v6957_v42  ;;  %v7002_v42 = vld [vmem:[#allocation4 + $0x864] ss:$48 sps:$4 sm:$0xff]  }
 0x136   : > { %2243 = vmatpush1.bf16.msra.mxu1 %v6859_v43  ;;  %v6904_v43 = vld [vmem:[#allocation4 + $0x558] ss:$48 sps:$4 sm:$0xff]  }
 0x137   : > { %2351 = vmatprep.subr.bf16.mxu1 %v6864_v44  ;;  %v6909_v44 = vld [vmem:[#allocation4 + $0x5bc] ss:$48 sps:$4 sm:$0xff]  }
 0x138   : > { %2448 = vmatpush1.bf16.msra.mxu0 %v6955_v45  ;;  %v7000_v45 = vld [vmem:[#allocation4 + $0x860] ss:$48 sps:$4 sm:$0xff]  }
 0x139   : > { %2449 = vmatprep.subr.bf16.mxu0 %v6960_v46  ;;  %2261 = vmatmul.mubr.bf16.vlgmr.msra.gmra.mrb[4].mxu1 %v7872_v38  ;;  %v7005_v46 = vld [vmem:[#allocation4 + $0x8c4] ss:$48 sps:$4 sm:$0xff]  }
 0x13a   : > { %2352 = vmatpush1.bf16.msra.mxu1 %v6862_v47  ;;  %2383 = vmatprep.mubr.bf16.mxu1 %v7876_v53  ;;  %v6907_v47 = vld [vmem:[#allocation4 + $0x5b8] ss:$48 sps:$4 sm:$0xff]  }
 0x13b   : > { %2353 = vmatprep.subr.bf16.mxu1 %v6867_v48  ;;  %v6912_v48 = vld [vmem:[#allocation4 + $0x61c] ss:$48 sps:$4 sm:$0xff]  }
 0x13c   : > { %2450 = vmatpush1.bf16.msra.mxu0 %v6958_v49  ;;  %v7003_v49 = vld [vmem:[#allocation4 + $0x8c0] ss:$48 sps:$4 sm:$0xff]  }
 0x13d   : > { %2451 = vmatprep.subr.bf16.mxu0 %v6963_v51  ;;  %v6915_v51 = vld [vmem:[#allocation4 + $0x67c] ss:$48 sps:$4 sm:$0xff]  }
 0x13e   : > { %2354 = vmatpush1.bf16.msra.mxu1 %v6865_v50  ;;  %v6910_v50 = vld [vmem:[#allocation4 + $0x618] ss:$48 sps:$4 sm:$0xff]  }
 0x13f   : > { %2355 = vmatprep.subr.bf16.mxu1 %v6870_v52  ;;  %v6913_v52 = vld [vmem:[#allocation4 + $0x678] ss:$48 sps:$4 sm:$0xff]  }
 0x140   : > { %2452 = vmatpush1.bf16.msra.mxu0 %v6961_v54  ;;  %v7642_v54 = vmov 0.0  }
 0x141   : > { %2453 = vmatprep.subr.bf16.mxu0 %v6966_v55  ;;  %v6918_v55 = vld [vmem:[#allocation4 + $0x6dc] ss:$48 sps:$4 sm:$0xff]  }
 0x142   : > { %2356 = vmatpush1.bf16.msra.mxu1 %v6868_v56  ;;  %v6916_v56 = vld [vmem:[#allocation4 + $0x6d8] ss:$48 sps:$4 sm:$0xff]  }
 0x143   : > { %2357 = vmatprep.subr.bf16.mxu1 %v6873_v57  ;;  %v6921_v57 = vld [vmem:[#allocation4 + $0x73c] ss:$48 sps:$4 sm:$0xff]  }
 0x144   : > { %2454 = vmatpush1.bf16.msra.mxu0 %v6964_v58  ;;  %v6919_v58 = vld [vmem:[#allocation4 + $0x738] ss:$48 sps:$4 sm:$0xff]  }
 0x145   : > { %2455 = vmatprep.subr.bf16.mxu0 %v6969_v59  ;;  %v6924_v59 = vld [vmem:[#allocation4 + $0x79c] ss:$48 sps:$4 sm:$0xff]  }
 0x146   : > { %2358 = vmatpush1.bf16.msra.mxu1 %v6871_v60  ;;  %v6922_v60 = vld [vmem:[#allocation4 + $0x798] ss:$48 sps:$4 sm:$0xff]  }
 0x147   : > { %2359 = vmatprep.subr.bf16.mxu1 %v6876_v61  ;;  %v6930_v61 = vld [vmem:[#allocation4 + $0x7fc] ss:$48 sps:$4 sm:$0xff]  }
 0x148   : > { %2456 = vmatpush1.bf16.msra.mxu0 %v6967_v62  ;;  %v6928_v62 = vld [vmem:[#allocation4 + $0x7f8] ss:$48 sps:$4 sm:$0xff]  }
 0x149   : > { %2457 = vmatprep.subr.bf16.mxu0 %v6972_v63  ;;  %v6936_v63 = vld [vmem:[#allocation4 + $0x85c] ss:$48 sps:$4 sm:$0xff]  }
 0x14a   : > { %2360 = vmatpush1.bf16.msra.mxu1 %v6874_v1  ;;  %v6934_v1 = vld [vmem:[#allocation4 + $0x858] ss:$48 sps:$4 sm:$0xff]  }
 0x14b   : > { %2361 = vmatprep.subr.bf16.mxu1 %v6879_v2 }
 0x14c   : > { %2458 = vmatpush1.bf16.msra.mxu0 %v6970_v3  ;;  %v6942_v3 = vld [vmem:[#allocation4 + $0x8bc] ss:$48 sps:$4 sm:$0xff]  }
 0x14d   : > { %2459 = vmatprep.subr.bf16.mxu0 %v6975_v4 }
 0x14e   : > { %2362 = vmatpush1.bf16.msra.mxu1 %v6877_v5 }
 0x14f   : > { %2363 = vmatprep.subr.bf16.mxu1 %v6882_v6 }
 0x150   : > { %2460 = vmatpush1.bf16.msra.mxu0 %v6973_v7  ;;  %v6940_v7 = vld [vmem:[#allocation4 + $0x8b8] ss:$48 sps:$4 sm:$0xff]  }
 0x151   : > { %2461 = vmatprep.subr.bf16.mxu0 %v6978_v8 }
 0x152   : > { %2364 = vmatpush1.bf16.msra.mxu1 %v6880_v10 }
 0x153   : > { %2365 = vmatprep.subr.bf16.mxu1 %v6885_v11 }
 0x154   : > { %2462 = vmatpush1.bf16.msra.mxu0 %v6976_v12 }
 0x155   : > { %2463 = vmatprep.subr.bf16.mxu0 %v6981_v13 }
 0x156   : > { %2366 = vmatpush1.bf16.msra.mxu1 %v6883_v14 }
 0x157   : > { %2367 = vmatprep.subr.bf16.mxu1 %v6888_v15  ;;  %v7008_v15 = vld [vmem:[#allocation4 + $0x2c] ss:$48 sps:$4 sm:$0xff]  }
 0x158   : > { %2464 = vmatpush1.bf16.msra.mxu0 %v6979_v16  ;;  %v7006_v16 = vld [vmem:[#allocation4 + $0x28] ss:$48 sps:$4 sm:$0xff]  }
 0x159   : > { %2474 = vmatprep.subr.bf16.mxu0 %v6984_v17  ;;  %v7011_v17 = vld [vmem:[#allocation4 + $0x8c] ss:$48 sps:$4 sm:$0xff]  }
 0x15a   : > { %2368 = vmatpush1.bf16.msra.mxu1 %v6886_v18  ;;  %v7009_v18 = vld [vmem:[#allocation4 + $0x88] ss:$48 sps:$4 sm:$0xff]  }
 0x15b   : > { %2466 = vmatmul.mubr.bf16.vlgmr.msra.gmra.mrb[8].mxu0 %v7881_v9  ;;  %2369 = vmatprep.subr.bf16.mxu1 %v6891_v19  ;;  %v7014_v19 = vld [vmem:[#allocation4 + $0xec] ss:$48 sps:$4 sm:$0xff]  }
 0x15c   : > { %2475 = vmatpush1.bf16.msra.mxu0 %v6982_v20  ;;  %2506 = vmatprep.mubr.bf16.mxu0 %v7641_v0  ;;  %v7012_v20 = vld [vmem:[#allocation4 + $0xe8] ss:$48 sps:$4 sm:$0xff]  }
 0x15d   : > { %2476 = vmatprep.subr.bf16.mxu0 %v6987_v21 }
 0x15e   : > { %2370 = vmatpush1.bf16.msra.mxu1 %v6889_v22  ;;  %v7015_v22 = vld [vmem:[#allocation4 + $0x148] ss:$48 sps:$4 sm:$0xff]  }
 0x15f   : > { %2371 = vmatprep.subr.bf16.mxu1 %v6894_v23 }
 0x160   : > { %2477 = vmatpush1.bf16.msra.mxu0 %v6985_v24 }
 0x161   : > { %2478 = vmatprep.subr.bf16.mxu0 %v6990_v25 }
 0x162   : > { %2372 = vmatpush1.bf16.msra.mxu1 %v6892_v26 }
 0x163   : > { %2373 = vmatprep.subr.bf16.mxu1 %v6897_v27 }
 0x164   : > { %2479 = vmatpush1.bf16.msra.mxu0 %v6988_v28  ;;  %v7020_v28 = vld [vmem:[#allocation4 + $0x1ac] ss:$48 sps:$4 sm:$0xff]  }
 0x165   : > { %2480 = vmatprep.subr.bf16.mxu0 %v6993_v29  ;;  %v7018_v29 = vld [vmem:[#allocation4 + $0x1a8] ss:$48 sps:$4 sm:$0xff]  }
 0x166   : > { %2374 = vmatpush1.bf16.msra.mxu1 %v6895_v30  ;;  %v7021_v30 = vld [vmem:[#allocation4 + $0x208] ss:$48 sps:$4 sm:$0xff]  }
 0x167   : > { %2375 = vmatprep.subr.bf16.mxu1 %v6900_v31  ;;  %v7023_v31 = vld [vmem:[#allocation4 + $0x20c] ss:$48 sps:$4 sm:$0xff]  }
 0x168   : > { %2481 = vmatpush1.bf16.msra.mxu0 %v6991_v32  ;;  %v7026_v32 = vld [vmem:[#allocation4 + $0x26c] ss:$48 sps:$4 sm:$0xff]  }
 0x169   : > { %2482 = vmatprep.subr.bf16.mxu0 %v6996_v33 }
 0x16a   : > { %2376 = vmatpush1.bf16.msra.mxu1 %v6898_v34  ;;  %v7024_v34 = vld [vmem:[#allocation4 + $0x268] ss:$48 sps:$4 sm:$0xff]  }
 0x16b   : > { %2377 = vmatprep.subr.bf16.mxu1 %v6903_v35  ;;  %v7029_v35 = vld [vmem:[#allocation4 + $0x2cc] ss:$48 sps:$4 sm:$0xff]  }
 0x16c   : > { %2483 = vmatpush1.bf16.msra.mxu0 %v6994_v36  ;;  %v7027_v36 = vld [vmem:[#allocation4 + $0x2c8] ss:$48 sps:$4 sm:$0xff]  }
 0x16d   : > { %2484 = vmatprep.subr.bf16.mxu0 %v6999_v37  ;;  %v7032_v37 = vld [vmem:[#allocation4 + $0x32c] ss:$48 sps:$4 sm:$0xff]  }
 0x16e   : > { %2378 = vmatpush1.bf16.msra.mxu1 %v6901_v39  ;;  %v7030_v39 = vld [vmem:[#allocation4 + $0x328] ss:$48 sps:$4 sm:$0xff]  }
 0x16f   : > { %2379 = vmatprep.subr.bf16.mxu1 %v6906_v40  ;;  %v7035_v40 = vld [vmem:[#allocation4 + $0x38c] ss:$48 sps:$4 sm:$0xff]  }
 0x170   : > { %2485 = vmatpush1.bf16.msra.mxu0 %v6997_v41  ;;  %v7033_v41 = vld [vmem:[#allocation4 + $0x388] ss:$48 sps:$4 sm:$0xff]  }
 0x171   : > { %2486 = vmatprep.subr.bf16.mxu0 %v7002_v42  ;;  %v7038_v42 = vld [vmem:[#allocation4 + $0x3ec] ss:$48 sps:$4 sm:$0xff]  }
 0x172   : > { %2380 = vmatpush1.bf16.msra.mxu1 %v6904_v43  ;;  %v7036_v43 = vld [vmem:[#allocation4 + $0x3e8] ss:$48 sps:$4 sm:$0xff]  }
 0x173   : > { %2381 = vmatprep.subr.bf16.mxu1 %v6909_v44  ;;  %v7041_v44 = vld [vmem:[#allocation4 + $0x44c] ss:$48 sps:$4 sm:$0xff]  }
 0x174   : > { %2487 = vmatpush1.bf16.msra.mxu0 %v7000_v45  ;;  %v7039_v45 = vld [vmem:[#allocation4 + $0x448] ss:$48 sps:$4 sm:$0xff]  }
 0x175   : > { %2488 = vmatprep.subr.bf16.mxu0 %v7005_v46 }
 0x176   : > { %2382 = vmatpush1.bf16.msra.mxu1 %v6907_v47  ;;  %v7044_v47 = vld [vmem:[#allocation4 + $0x4ac] ss:$48 sps:$4 sm:$0xff]  }
 0x177   : > { %2392 = vmatprep.subr.bf16.mxu1 %v6912_v48 }
 0x178   : > { %2489 = vmatpush1.bf16.msra.mxu0 %v7003_v49 }
 0x179   : > { %6422 = vmatprep.subr.bf16.mxu0 %v7642_v54  ;;  %2384 = vmatmul.mubr.bf16.vlgmr.msra.gmra.mrb[8].mxu1 %v7881_v9 }
 0x17a   : > { %2393 = vmatpush1.bf16.msra.mxu1 %v6910_v50  ;;  %2424 = vmatprep.mubr.bf16.mxu1 %v7641_v0 }
 0x17b   : > { %2394 = vmatprep.subr.bf16.mxu1 %v6915_v51  ;;  %2507 = vmatmul.mubr.bf16.vlgmr.msra.gmra.mrb[8].mxu0 %v7872_v38  ;;  %v7042_v51 = vld [vmem:[#allocation4 + $0x4a8] ss:$48 sps:$4 sm:$0xff]  }
 0x17c   : > { %6424 = vmatprep.mubr.msk.bf16.mxu0 %vm7643_vm0, %v7642_v54 }
 0x17e   : > { %2395 = vmatpush1.bf16.msra.mxu1 %v6913_v52  ;;  %v7047_v52 = vld [vmem:[#allocation4 + $0x50c] ss:$48 sps:$4 sm:$0xff]  }
 0x17f   : > { %2396 = vmatprep.subr.bf16.mxu1 %v6918_v55  ;;  %v7045_v55 = vld [vmem:[#allocation4 + $0x508] ss:$48 sps:$4 sm:$0xff]  }
 0x182   : > { %2397 = vmatpush1.bf16.msra.mxu1 %v6916_v56  ;;  %v7050_v56 = vld [vmem:[#allocation4 + $0x56c] ss:$48 sps:$4 sm:$0xff]  }
 0x183   : > { %2398 = vmatprep.subr.bf16.mxu1 %v6921_v57  ;;  %v7048_v57 = vld [vmem:[#allocation4 + $0x568] ss:$48 sps:$4 sm:$0xff]  }
 0x186   : > { %2399 = vmatpush1.bf16.msra.mxu1 %v6919_v58  ;;  %v7053_v58 = vld [vmem:[#allocation4 + $0x5cc] ss:$48 sps:$4 sm:$0xff]  }
 0x187   : > { %2400 = vmatprep.subr.bf16.mxu1 %v6924_v59  ;;  %v7051_v59 = vld [vmem:[#allocation4 + $0x5c8] ss:$48 sps:$4 sm:$0xff]  }
 0x18a   : > { %2401 = vmatpush1.bf16.msra.mxu1 %v6922_v60  ;;  %v7056_v60 = vld [vmem:[#allocation4 + $0x62c] ss:$48 sps:$4 sm:$0xff]  }
 0x18b   : > { %2402 = vmatprep.subr.bf16.mxu1 %v6930_v61  ;;  %v7054_v61 = vld [vmem:[#allocation4 + $0x628] ss:$48 sps:$4 sm:$0xff]  }
 0x18d   : > { %v2180_v2 = vpop.f32.mrb[0].mxu0 }
 0x18e   : > { %v2182_v4 = vpop.f32.mrb[1].mxu0  ;;  %2403 = vmatpush1.bf16.msra.mxu1 %v6928_v62  ;;  %v7059_v62 = vld [vmem:[#allocation4 + $0x68c] ss:$48 sps:$4 sm:$0xff]  }
 0x18f   : > { %v2184_v5 = vpop.f32.mrb[2].mxu0  ;;  %2404 = vmatprep.subr.bf16.mxu1 %v6936_v63  ;;  %v7057_v63 = vld [vmem:[#allocation4 + $0x688] ss:$48 sps:$4 sm:$0xff]  }
 0x190   : > { %v2185_v6 = vpop.f32.mrb[3].mxu0  ;;  %v7068_v5 = vld [vmem:[#allocation4 + $0x7ac] ss:$48 sps:$4 sm:$0xff]  }
 0x191   : > { %v7066_v6 = vld [vmem:[#allocation4 + $0x7a8] ss:$48 sps:$4 sm:$0xff]  }
 0x192   : > { %2405 = vmatpush1.bf16.msra.mxu1 %v6934_v1  ;;  %v7062_v1 = vld [vmem:[#allocation4 + $0x6ec] ss:$48 sps:$4 sm:$0xff]  }
 0x193   : > { %2406 = vmatprep.subr.bf16.mxu1 %v6942_v3  ;;  %v7065_v3 = vld [vmem:[#allocation4 + $0x74c] ss:$48 sps:$4 sm:$0xff]  }
 0x196   : > { %2407 = vmatpush1.bf16.msra.mxu1 %v6940_v7  ;;  %v7071_v7 = vld [vmem:[#allocation4 + $0x80c] ss:$48 sps:$4 sm:$0xff]  }
 0x197   : > { %2515 = vmatprep.subr.bf16.mxu1 %v7008_v15 }
 0x199   : > { %2425 = vmatmul.mubr.bf16.vlgmr.msra.gmra.mrb[8].mxu1 %v7872_v38 }
 0x19a   : > { %2547 = vmatprep.mubr.bf16.mxu1 %v7876_v53  ;;  %2516 = vmatpush1.bf16.msra.mxu1 %v7006_v16  ;;  %v7017_v53 = vld [vmem:[#allocation4 + $0x14c] ss:$48 sps:$4 sm:$0xff]  }
 0x19b   : > { %2517 = vmatprep.subr.bf16.mxu1 %v7011_v17 }
 0x19e   : > { %2518 = vmatpush1.bf16.msra.mxu1 %v7009_v18 }
 0x19f   : > { %2519 = vmatprep.subr.bf16.mxu1 %v7014_v19 }
 0x1a2   : > { %2520 = vmatpush1.bf16.msra.mxu1 %v7012_v20 }
 0x1a3   : > { %2521 = vmatprep.subr.bf16.mxu1 %v7017_v53 }
 0x1a6   : > { %2522 = vmatpush1.bf16.msra.mxu1 %v7015_v22 }
 0x1a7   : > { %2523 = vmatprep.subr.bf16.mxu1 %v7020_v28 }
 0x1aa   : > { %2524 = vmatpush1.bf16.msra.mxu1 %v7018_v29 }
 0x1ab   : > { %2525 = vmatprep.subr.bf16.mxu1 %v7023_v31 }
 0x1ac   : > { %v2139_v8 = vpop.f32.mrb[0].mxu1 }
 0x1ad   : > { %v2181_v10 = vadd.f32 %v2180_v2, %v2139_v8  ;;  %v2141_v11 = vpop.f32.mrb[1].mxu1  ;;  %v7060_v2 = vld [vmem:[#allocation4 + $0x6e8] ss:$48 sps:$4 sm:$0xff]   ;;  %v7074_v8 = vld [vmem:[#allocation4 + $0x86c] ss:$48 sps:$4 sm:$0xff]  }
 0x1ae   : > { %v7903_v12 = vadd.f32 %v2182_v4, %v2141_v11  ;;  %v2143_v13 = vpop.f32.mrb[2].mxu1  ;;  %2526 = vmatpush1.bf16.msra.mxu1 %v7021_v30  ;;  %v7063_v4 = vld [vmem:[#allocation4 + $0x748] ss:$48 sps:$4 sm:$0xff]   ;;  %v7077_v11 = vld [vmem:[#allocation4 + $0x8cc] ss:$48 sps:$4 sm:$0xff]  }
 0x1af   : > { %v2144_v14 = vpop.f32.mrb[3].mxu1  ;;  %v2613_v33 = vpack.c.bf16 %v2181_v10, %v2181_v10  ;;  %2527 = vmatprep.subr.bf16.mxu1 %v7026_v32  ;;  %v7075_v13 = vld [vmem:[#allocation4 + $0x8c8] ss:$48 sps:$4 sm:$0xff]  }
 0x1b0   : > { %v2615_v32 = vpack.c.bf16 %v7903_v12, %v7903_v12 }
 0x1b2   : > { %2528 = vmatpush1.bf16.msra.mxu1 %v7024_v34 }
 0x1b3   : > { %2529 = vmatprep.subr.bf16.mxu1 %v7029_v35 }
 0x1b6   : > { %2530 = vmatpush1.bf16.msra.mxu1 %v7027_v36 }
 0x1b7   : > { %2531 = vmatprep.subr.bf16.mxu1 %v7032_v37 }
 0x1ba   : > { %2532 = vmatpush1.bf16.msra.mxu1 %v7030_v39 }
 0x1bb   : > { %2533 = vmatprep.subr.bf16.mxu1 %v7035_v40 }
 0x1be   : > { %2534 = vmatpush1.bf16.msra.mxu1 %v7033_v41 }
 0x1bf   : > { %2535 = vmatprep.subr.bf16.mxu1 %v7038_v42 }
 0x1c2   : > { %2536 = vmatpush1.bf16.msra.mxu1 %v7036_v43 }
 0x1c3   : > { %2537 = vmatprep.subr.bf16.mxu1 %v7041_v44 }
 0x1c6   : > { %2538 = vmatpush1.bf16.msra.mxu1 %v7039_v45 }
 0x1c7   : > { %2539 = vmatprep.subr.bf16.mxu1 %v7044_v47 }
 0x1ca   : > { %2540 = vmatpush1.bf16.msra.mxu1 %v7042_v51 }
 0x1cb   : > { %2541 = vmatprep.subr.bf16.mxu1 %v7047_v52 }
 0x1ce   : > { %2542 = vmatpush1.bf16.msra.mxu1 %v7045_v55 }
 0x1cf   : > { %2543 = vmatprep.subr.bf16.mxu1 %v7050_v56 }
 0x1d2   : > { %2544 = vmatpush1.bf16.msra.mxu1 %v7048_v57 }
 0x1d3   : > { %2545 = vmatprep.subr.bf16.mxu1 %v7053_v58 }
 0x1d6   : > { %2546 = vmatpush1.bf16.msra.mxu1 %v7051_v59 }
 0x1d7   : > { %2556 = vmatprep.subr.bf16.mxu1 %v7056_v60 }
 0x1d9   : > { %2548 = vmatmul.mubr.bf16.vlgmr.msra.gmra.mrb[12].mxu1 %v7881_v9  ;;  %v7069_v9 = vld [vmem:[#allocation4 + $0x808] ss:$48 sps:$4 sm:$0xff]  }
 0x1da   : > { %2557 = vmatpush1.bf16.msra.mxu1 %v7054_v61  ;;  %2588 = vmatprep.mubr.bf16.mxu1 %v7641_v0 }
 0x1db   : > { %2558 = vmatprep.subr.bf16.mxu1 %v7059_v62 }
 0x1de   : > { %2559 = vmatpush1.bf16.msra.mxu1 %v7057_v63 }
 0x1df   : > { %2560 = vmatprep.subr.bf16.mxu1 %v7062_v1 }
 0x1e2   : > { %2561 = vmatpush1.bf16.msra.mxu1 %v7060_v2 }
 0x1e3   : > { %2562 = vmatprep.subr.bf16.mxu1 %v7065_v3  ;;  %v3038_v3 = vlaneseq }
 0x1e6   : > { %2563 = vmatpush1.bf16.msra.mxu1 %v7063_v4  ;;  %v3039_v4 = vand.u32 127, %v3038_v3 }
 0x1e7   : > { %2564 = vmatprep.subr.bf16.mxu1 %v7068_v5  ;;  %v3041_v5 = vstv %s3040_s19 }
 0x1e8   : > { %vm7993_vm3 = vcmp.lt.s32.totalorder %v3039_v4, %v3041_v5 }
 0x1ea   : > { %2565 = vmatpush1.bf16.msra.mxu1 %v7066_v6 }
 0x1eb   : > { %2566 = vmatprep.subr.bf16.mxu1 %v7071_v7 }
 0x1ed   : > { %v2344_v21 = vpop.f32.mrb[4].mxu0 }
 0x1ee   : > { %v2637_v23 = vpack.c.bf16 %v2344_v21, %v2344_v21  ;;  %2622 = vrot.lane.b32.xlu0 %v2344_v21, %s7644_s23  ;;  %v7906_v24 = vpop.f32.mrb[5].mxu0  ;;  %2567 = vmatpush1.bf16.msra.mxu1 %v7069_v9 }
 0x1ef   : > { %v2348_v25 = vpop.f32.mrb[6].mxu0  ;;  %2626 = vrot.lane.b32.xlu1 %v7906_v24, %s7644_s23  ;;  %2568 = vmatprep.subr.bf16.mxu1 %v7074_v8  ;;  %v2639_v21 = vpack.c.bf16 %v7906_v24, %v7906_v24 }
 0x1f0   : > { %v2674_v26 = vsel %vm2669_vm1, %v2637_v23, 0  ;;  %v2349_v27 = vpop.f32.mrb[7].mxu0 }
 0x1f1   : > { %6423 = vmatpush3.bf16.xpose.msra.mxu0 %v2674_v26  ;;  %v2766_v25 = vsel %vm2669_vm1, %v2639_v21, 0 }
 0x1f2   : > { %2598 = vrot.lane.b32.xlu0 %v2181_v10, %s7644_s23  ;;  %6428 = vmatprep.subr.bf16.mxu0 %v7642_v54  ;;  %v7072_v10 = vld [vmem:[#allocation4 + $0x868] ss:$48 sps:$4 sm:$0xff]  }
 0x1f3   : > { %2569 = vmatpush1.bf16.msra.mxu1 %v7072_v10 }
 0x1f4   : > { %2570 = vmatprep.subr.bf16.mxu1 %v7077_v11 }
 0x1f7   : > { %2571 = vmatpush1.bf16.msra.mxu1 %v7075_v13 }
 0x1f8   : > { %6425 = vmatmul.mubr.msk.bf16.vlgmr.msra.gmra.mrb[12].mxu0 %vm2669_vm1, %v2613_v33  ;;  %6452 = vmatprep.subr.bf16.mxu1 %v7642_v54 }
 0x1f9   : > { %6430 = vmatprep.mubr.msk.bf16.mxu0 %vm7643_vm0, %v7642_v54 }
 0x1fa   : > { %2589 = vmatmul.mubr.bf16.vlgmr.msra.gmra.mrb[12].mxu1 %v7872_v38 }
 0x1fb   : > { %6454 = vmatprep.mubr.msk.bf16.mxu1 %vm7643_vm0, %v7642_v54 }
 0x20c   : > { %v7916_v46 = vpop.f32.mrb[4].mxu1 }
 0x20d   : > { %v7918_v48 = vpop.f32.mrb[5].mxu1  ;;  %v2617_v55 = vpack.c.bf16 %v7916_v46, %v7916_v46 }
 0x20e   : > { %v2266_v49 = vpop.f32.mrb[6].mxu1  ;;  %v2619_v60 = vpack.c.bf16 %v7918_v48, %v7918_v48 }
 0x20f   : > { %v2267_v50 = vpop.f32.mrb[7].mxu1 }
 0x24e   : > { %v7926_v14 = vpop.f32.mrb[8].mxu0 }
 0x24f   : > { %v7928_v15 = vpop.f32.mrb[9].mxu0  ;;  %v2661_v59 = vpack.c.bf16 %v7926_v14, %v7926_v14 }
 0x250   : > { %v6631_v16 = vpack.i.bf16 %v7928_v15, %v7926_v14  ;;  %v2512_v17 = vpop.f32.mrb[10].mxu0 }
 0x251   : > { %v2513_v18 = vpop.f32.mrb[11].mxu0  ;;  %v3155_v62 = vsel %vm3153_vm2, %v2661_v59, 0 }
 0x260   : > { %v2623_v19 = vpop.permute.xlu0 %2622 }
 0x261   : > { %v2638_v20 = vpack.c.bf16 %v2623_v19, %v2623_v19  ;;  %v2627_v23 = vpop.permute.xlu1 %2626 }
 0x262   : > { %v2640_v27 = vpack.c.bf16 %v2627_v23, %v2627_v23 }
 0x263   : > { %v2720_v53 = vsel %vm2669_vm1, %v2638_v20, 0 }
 0x264   : > { %6429 = vmatpush3.bf16.xpose.msra.mxu0 %v2720_v53  ;;  %v2599_v38 = vpop.permute.xlu0 %2598  ;;  %v2812_v33 = vsel %vm2669_vm1, %v2640_v27, 0 }
 0x265   : > { %6434 = vmatprep.subr.bf16.mxu0 %v7642_v54  ;;  %v2614_v22 = vpack.c.bf16 %v2599_v38, %v2599_v38 }
 0x26b   : > { %6431 = vmatmul.mubr.msk.bf16.vlgmr.msra.gmra.mrb[16].mxu0 %vm2669_vm1, %v2614_v22 }
 0x26c   : > { %6435 = vmatpush3.bf16.xpose.msra.mxu0 %v2766_v25  ;;  %6436 = vmatprep.mubr.msk.bf16.mxu0 %vm7643_vm0, %v7642_v54  ;;  %v2426_v26 = vpop.f32.mrb[8].mxu1 }
 0x26d   : > { %6440 = vmatprep.subr.bf16.mxu0 %v7642_v54  ;;  %v6621_v28 = vpack.i.bf16 %v2426_v26, %v7903_v12  ;;  %v2428_v29 = vpop.f32.mrb[9].mxu1  ;;  %v2641_v39 = vpack.c.bf16 %v2426_v26, %v2426_v26 }
 0x26e   : > { %v6626_v30 = vpack.i.bf16 %v2428_v29, %v7916_v46  ;;  %v2430_v24 = vpop.f32.mrb[10].mxu1  ;;  %v2643_v51 = vpack.c.bf16 %v2428_v29, %v2428_v29 }
 0x26f   : > { %6622 = vrot.lane.b32.xlu1 %v6621_v28, %s7644_s23  ;;  %v2431_v31 = vpop.f32.mrb[11].mxu1  ;;  %v2858_v47 = vsel %vm2669_vm1, %v2641_v39, 0 }
 0x270   : > { %6627 = vrot.lane.b32.xlu0 %v6626_v30, %s7644_s23  ;;  %v2950_v57 = vsel %vm2669_vm1, %v2643_v51, 0 }
 0x273   : > { %6437 = vmatmul.mubr.msk.bf16.vlgmr.msra.gmra.mrb[20].mxu0 %vm2669_vm1, %v2615_v32  ;;  %2610 = vrot.lane.b32.xlu1 %v7918_v48, %s7644_s23 }
 0x274   : > { %6441 = vmatpush3.bf16.xpose.msra.mxu0 %v2812_v33  ;;  %6442 = vmatprep.mubr.msk.bf16.mxu0 %vm7643_vm0, %v7642_v54 }
 0x275   : > { %6446 = vmatprep.subr.bf16.mxu0 %v7642_v54 }
 0x2cb   : > { %v7954_v34 = vpop.f32.mrb[12].mxu0 }
 0x2cc   : > { %v6426_v35 = vpop.f32.mrb[13].mxu0  ;;  %v8006_v25 = vsel %vm7993_vm3, %v7954_v34, -3.4028235e+38 }
 0x2cd   : > { %v2713_v36 = vpop.f32.mrb[14].mxu0  ;;  %v7987_v63 = vpop.f32.mrb[12].mxu1  ;;  %v3054_v27 = vsel %vm3053_vm4, %v8006_v25, -inf }
 0x2ce   : > { %v6427_v12 = vpop.f32.mrb[15].mxu0  ;;  %v7989_v1 = vpop.f32.mrb[13].mxu1 }
 0x2cf   : > { %v2594_v48 = vpop.f32.mrb[14].mxu1 }
 0x2d0   : > { %v2595_v2 = vpop.f32.mrb[15].mxu1 }
 0x2e1   : > { %v6623_v37 = vpop.permute.xlu1 %6622 }
 0x2e2   : > { %v6625_v40 = vunpack.i.h.bf16 %v6623_v37  ;;  %v6624_v41 = vunpack.i.l.bf16 %v6623_v37  ;;  %v6628_v42 = vpop.permute.xlu0 %6627 }
 0x2e3   : > { %v6630_v45 = vunpack.i.h.bf16 %v6628_v42  ;;  %v6629_v50 = vunpack.i.l.bf16 %v6628_v42 }
 0x2e4   : > { %v2642_v43 = vpack.c.bf16 %v6625_v40, %v6625_v40  ;;  %v2616_v44 = vpack.c.bf16 %v6624_v41, %v6624_v41 }
 0x2e5   : > { %v2644_v52 = vpack.c.bf16 %v6630_v45, %v6630_v45  ;;  %v2618_v56 = vpack.c.bf16 %v6629_v50, %v6629_v50  ;;  %v2611_v46 = vpop.permute.xlu1 %2610 }
 0x2e6   : > { %6443 = vmatmul.mubr.msk.bf16.vlgmr.msra.gmra.mrb[24].mxu0 %vm2669_vm1, %v2616_v44  ;;  %v2904_v49 = vsel %vm2669_vm1, %v2642_v43, 0  ;;  %v2620_v61 = vpack.c.bf16 %v2611_v46, %v2611_v46 }
 0x2e7   : > { %6447 = vmatpush3.bf16.xpose.msra.mxu0 %v2858_v47  ;;  %6453 = vmatpush3.bf16.xpose.msra.mxu1 %v2904_v49  ;;  %v2996_v58 = vsel %vm2669_vm1, %v2644_v52, 0 }
 0x2e8   : > { %6448 = vmatprep.mubr.msk.bf16.mxu0 %vm7643_vm0, %v7642_v54  ;;  %6458 = vmatprep.subr.bf16.mxu0 %v7642_v54 }
 0x2e9   : > { %6464 = vmatprep.subr.bf16.mxu1 %v7642_v54 }
 0x2ee   : > { %6449 = vmatmul.mubr.msk.bf16.vlgmr.msra.gmra.mrb[28].mxu0 %vm2669_vm1, %v2617_v55  ;;  %6455 = vmatmul.mubr.msk.bf16.vlgmr.msra.gmra.mrb[16].mxu1 %vm2669_vm1, %v2618_v56 }
 0x2ef   : > { %6459 = vmatpush3.bf16.xpose.msra.mxu0 %v2950_v57  ;;  %6465 = vmatpush3.bf16.xpose.msra.mxu1 %v2996_v58 }
 0x2f0   : > { %6460 = vmatprep.mubr.msk.bf16.mxu0 %vm7643_vm0, %v7642_v54  ;;  %6466 = vmatprep.mubr.msk.bf16.mxu1 %vm7643_vm0, %v7642_v54 }
 0x2f1   : > { %6470 = vmatprep.subr.bf16.mxu0 %v7642_v54  ;;  %6476 = vmatprep.subr.bf16.mxu1 %v7642_v54 }
 0x2f6   : > { %6461 = vmatmul.mubr.msk.bf16.vlgmr.msra.gmra.mrb[32].mxu0 %vm2669_vm1, %v2619_v60  ;;  %6467 = vmatmul.mubr.msk.bf16.vlgmr.msra.gmra.mrb[20].mxu1 %vm2669_vm1, %v2620_v61 }
 0x2f7   : > { %6471 = vmatpush3.bf16.msra.mxu0 %v3155_v62  ;;  %6478 = vmatprep.mubr.msk.bf16.mxu1 %vm7643_vm0, %v7642_v54 }
 0x2f8   : > { %6472 = vmatprep.mubr.msk.bf16.mxu0 %vm7643_vm0, %v7642_v54  ;;  %6482 = vmatprep.subr.bf16.mxu0 %v7642_v54 }
 0x33e   : > { %v2756_v7 = vpop.f32.mrb[16].mxu0 }
 0x33f   : > { %v3046_v9 = vsel %vm7993_vm3, %v2756_v7, -3.4028235e+38  ;;  %v6432_v8 = vpop.f32.mrb[17].mxu0 }
 0x340   : > { %v2759_v10 = vpop.f32.mrb[18].mxu0  ;;  %v3057_v11 = vsel %vm3053_vm4, %v3046_v9, -inf }
 0x341   : > { %v6433_v13 = vpop.f32.mrb[19].mxu0  ;;  %3058 = vmax.xlane.f32.xlu0 %v3057_v11 }
 0x346   : > { %v2802_v17 = vpop.f32.mrb[20].mxu0 }
 0x347   : > { %v6438_v18 = vpop.f32.mrb[21].mxu0  ;;  %v3047_v49 = vsel %vm7993_vm3, %v2802_v17, -3.4028235e+38 }
 0x348   : > { %v2805_v19 = vpop.f32.mrb[22].mxu0  ;;  %v3060_v56 = vsel %vm3053_vm4, %v3047_v49, -inf }
 0x349   : > { %v6439_v20 = vpop.f32.mrb[23].mxu0 }
 0x3b9   : > { %v2848_v53 = vpop.f32.mrb[24].mxu0 }
 0x3ba   : > { %v3048_v38 = vsel %vm7993_vm3, %v2848_v53, -3.4028235e+38  ;;  %v6444_v21 = vpop.f32.mrb[25].mxu0 }
 0x3bb   : > { %v2851_v22 = vpop.f32.mrb[26].mxu0  ;;  %v3063_v23 = vsel %vm3053_vm4, %v3048_v38, -inf }
 0x3bc   : > { %3064 = vmax.xlane.f32.xlu1 %v3063_v23  ;;  %v6445_v26 = vpop.f32.mrb[27].mxu0 }
 0x3c0   : > { %3055 = vmax.xlane.f32.xlu1 %v3054_v27 }
 0x3c1   : > { %v2894_v28 = vpop.f32.mrb[28].mxu0  ;;  %v2940_v29 = vpop.f32.mrb[16].mxu1 }
 0x3c2   : > { %v8012_v30 = vsel %vm7993_vm3, %v2894_v28, -3.4028235e+38  ;;  %v3050_v24 = vsel %vm7993_vm3, %v2940_v29, -3.4028235e+38  ;;  %v6450_v31 = vpop.f32.mrb[29].mxu0  ;;  %v6456_v32 = vpop.f32.mrb[17].mxu1 }
 0x3c3   : > { %v2897_v33 = vpop.f32.mrb[30].mxu0  ;;  %v2943_v34 = vpop.f32.mrb[18].mxu1  ;;  %v3066_v35 = vsel %vm3053_vm4, %v8012_v30, -inf  ;;  %v3069_v36 = vsel %vm3053_vm4, %v3050_v24, -inf }
 0x3c4   : > { %3067 = vmax.xlane.f32.xlu1 %v3066_v35  ;;  %v6451_v12 = vpop.f32.mrb[31].mxu0  ;;  %3070 = vmax.xlane.f32.xlu0 %v3069_v36  ;;  %v6457_v37 = vpop.f32.mrb[19].mxu1 }
 0x3c9   : > { %v2986_v39 = vpop.f32.mrb[32].mxu0  ;;  %v3032_v40 = vpop.f32.mrb[20].mxu1 }
 0x3ca   : > { %v3052_v41 = vsel %vm7993_vm3, %v3032_v40, -3.4028235e+38  ;;  %v6462_v42 = vpop.f32.mrb[33].mxu0  ;;  %v6468_v43 = vpop.f32.mrb[21].mxu1  ;;  %v3051_v57 = vsel %vm7993_vm3, %v2986_v39, -3.4028235e+38 }
 0x3cb   : > { %v2989_v44 = vpop.f32.mrb[34].mxu0  ;;  %v3035_v45 = vpop.f32.mrb[22].mxu1  ;;  %v3075_v47 = vsel %vm3053_vm4, %v3052_v41, -inf  ;;  %v3072_v59 = vsel %vm3053_vm4, %v3051_v57, -inf }
 0x3cc   : > { %v6463_v50 = vpop.f32.mrb[35].mxu0  ;;  %3076 = vmax.xlane.f32.xlu0 %v3075_v47  ;;  %v6469_v51 = vpop.f32.mrb[23].mxu1 }
 0x3ce   : > { %v3059_v52 = vpop.xlane.xlu0 %3058 }
 0x3cf   : > { %v3079_v55 = vsub.f32 %v3046_v9, %v3059_v52 }
 0x3d0   : > { %3061 = vmax.xlane.f32.xlu0 %v3060_v56 }
 0x3d1   : > { %v3088_v58 = vmul.f32 1.442695, %v3079_v55 }
 0x3d3   : > { %7422 = vpow2.f32 %v3088_v58 }
 0x3d4   : > { %3073 = vmax.xlane.f32.xlu0 %v3072_v59 }
 0x3dd   : > { %v8028_v46 = vpop.eup %7422 }
 0x3de   : > { %v3105_v60 = vsel %vm3053_vm4, %v8028_v46, 0.0 }
 0x3df   : > { %3106 = vadd.xlane.f32.xlu1 %v3105_v60 }
 0x449   : > { %v3065_v61 = vpop.xlane.xlu1 %3064 }
 0x44a   : > { %v3081_v62 = vsub.f32 %v3048_v38, %v3065_v61 }
 0x44c   : > { %v3092_v48 = vmul.f32 1.442695, %v3081_v62 }
 0x44d   : > { %v3056_v19 = vpop.xlane.xlu1 %3055 }
 0x44e   : > { %7424 = vpow2.f32 %v3092_v48  ;;  %v3078_v26 = vsub.f32 %v8006_v25, %v3056_v19 }
 0x451   : > { %v3071_v2 = vpop.xlane.xlu0 %3070  ;;  %v3068_v38 = vpop.xlane.xlu1 %3067 }
 0x452   : > { %v3083_v4 = vsub.f32 %v3050_v24, %v3071_v2  ;;  %v3082_v21 = vsub.f32 %v8012_v30, %v3068_v38 }
 0x454   : > { %v3096_v5 = vmul.f32 1.442695, %v3083_v4  ;;  %v3094_v23 = vmul.f32 1.442695, %v3082_v21 }
 0x456   : > { %7426 = vpow2.f32 %v3096_v5 }
 0x458   : > { %v8032_v6 = vpop.eup %7424 }
 0x459   : > { %v3077_v7 = vpop.xlane.xlu0 %3076  ;;  %v3111_v9 = vsel %vm3053_vm4, %v8032_v6, 0.0 }
 0x45a   : > { %v3085_v8 = vsub.f32 %v3052_v41, %v3077_v7  ;;  %3112 = vadd.xlane.f32.xlu0 %v3111_v9 }
 0x45c   : > { %v3100_v10 = vmul.f32 1.442695, %v3085_v8 }
 0x45d   : > { %v3062_v20 = vpop.xlane.xlu0 %3061 }
 0x45e   : > { %7428 = vpow2.f32 %v3100_v10  ;;  %v3080_v53 = vsub.f32 %v3047_v49, %v3062_v20  ;;  %v2663_v10 = vpack.c.bf16 %v7928_v15, %v7928_v15  ;;  %v2665_v15 = vpack.c.bf16 %v7987_v63, %v7987_v63 }
 0x460   : > { %v8036_v11 = vpop.eup %7426  ;;  %v3090_v22 = vmul.f32 1.442695, %v3080_v53  ;;  %v3339_v21 = vsel %vm3153_vm2, %v2665_v15, 0 }
 0x461   : > { %v3117_v13 = vsel %vm3053_vm4, %v8036_v11, 0.0  ;;  %v3074_v14 = vpop.xlane.xlu0 %3073 }
 0x462   : > { %3118 = vadd.xlane.f32.xlu1 %v3117_v13  ;;  %7430 = vpow2.f32 %v3090_v22  ;;  %v3084_v27 = vsub.f32 %v3051_v57, %v3074_v14 }
 0x463   : > { %7432 = vpow2.f32 %v3094_v23  ;;  %v2667_v23 = vpack.c.bf16 %v7989_v1, %v7989_v1 }
 0x464   : > { %v3098_v29 = vmul.f32 1.442695, %v3084_v27 }
 0x465   : > { %v3431_v14 = vsel %vm3153_vm2, %v2667_v23, 0 }
 0x468   : > { %v8040_v17 = vpop.eup %7428 }
 0x469   : > { %v3123_v18 = vsel %vm3053_vm4, %v8040_v17, 0.0 }
 0x46a   : > { %3124 = vadd.xlane.f32.xlu1 %v3123_v18 }
 0x46c   : > { %v8054_v28 = vpop.eup %7430  ;;  %v3107_v35 = vpop.xlane.xlu1 %3106 }
 0x46d   : > { %v3108_v24 = vsel %vm3053_vm4, %v8054_v28, 0.0  ;;  %v8058_v31 = vpop.eup %7432 }
 0x46e   : > { %v3114_v30 = vsel %vm3053_vm4, %v8058_v31, 0.0 }
 0x470   : > { %6632 = vrot.lane.b32.xlu0 %v6631_v16, %s7644_s23  ;;  %v3086_v16 = vmul.f32 1.442695, %v3078_v26 }
 0x472   : > { %7434 = vpow2.f32 %v3086_v16 }
 0x473   : > { %7436 = vpow2.f32 %v3098_v29  ;;  %v7083_v29 = vld [vmem:[#allocation6 + $0x184] ss:$12 sps:$4 sm:$0xff]  }
 0x474   : > { %2658 = vrot.lane.b32.xlu0 %v7989_v1, %s7644_s23  ;;  %7438 = vrcp.f32 %v3107_v35  ;;  %v7086_v1 = vld [vmem:[#allocation6 + $0x1c] ss:$12 sps:$4 sm:$0xff]  }
 0x475   : > { %v7090_v35 = vld [vmem:[#allocation6 + $0x30] ss:$12 sps:$4 sm:$0xff]  }
 0x47b   : > { %2654 = vrot.lane.b32.xlu1 %v7987_v63, %s7644_s23 }
 0x47c   : > { %v7435_v25 = vpop.eup %7434 }
 0x47d   : > { %v3102_v32 = vsel %vm3053_vm4, %v7435_v25, 0.0  ;;  %v8063_v33 = vpop.eup %7436 }
 0x47e   : > { %v3120_v34 = vsel %vm3053_vm4, %v8063_v33, 0.0  ;;  %v7439_v12 = vpop.eup %7438 }
 0x47f   : > { %v3135_v41 = vmul.f32 %v7439_v12, %v8028_v46  ;;  %v7098_v12 = vld [vmem:[#allocation6 + $0x4c] ss:$12 sps:$4 sm:$0xff]  }
 0x481   : > { %v3143_v47 = vpack.c.bf16 %v3135_v41, %v3135_v41  ;;  %v7104_v41 = vld [vmem:[#allocation6 + $0x64] ss:$12 sps:$4 sm:$0xff]  }
 0x493   : > { %3109 = vadd.xlane.f32.xlu0 %v3108_v24  ;;  %v7078_v24 = vld [vmem:[#allocation6] ss:$12 sps:$4 sm:$0xff]  }
 0x497   : > { %3115 = vadd.xlane.f32.xlu0 %v3114_v30  ;;  %v7089_v30 = vld [vmem:[#allocation6 + $0x19c] ss:$12 sps:$4 sm:$0xff]  }
 0x49f   : > { %3103 = vadd.xlane.f32.xlu1 %v3102_v32  ;;  %v7087_v32 = vld [vmem:[#allocation6 + $0x198] ss:$12 sps:$4 sm:$0xff]  }
 0x4a3   : > { %3121 = vadd.xlane.f32.xlu1 %v3120_v34  ;;  %v7095_v34 = vld [vmem:[#allocation6 + $0x1b4] ss:$12 sps:$4 sm:$0xff]  }
 0x4e7   : > { %v3113_v36 = vpop.xlane.xlu0 %3112 }
 0x4e8   : > { %7440 = vrcp.f32 %v3113_v36  ;;  %v7093_v36 = vld [vmem:[#allocation6 + $0x1b0] ss:$12 sps:$4 sm:$0xff]  }
 0x4eb   : > { %v6633_v37 = vpop.permute.xlu0 %6632 }
 0x4ec   : > { %v6635_v39 = vunpack.i.h.bf16 %v6633_v37  ;;  %v6634_v40 = vunpack.i.l.bf16 %v6633_v37  ;;  %v7101_v37 = vld [vmem:[#allocation6 + $0x1cc] ss:$12 sps:$4 sm:$0xff]  }
 0x4ee   : > { %v2662_v42 = vpack.c.bf16 %v6634_v40, %v6634_v40  ;;  %v2664_v43 = vpack.c.bf16 %v6635_v39, %v6635_v39  ;;  %v7096_v39 = vld [vmem:[#allocation6 + $0x48] ss:$12 sps:$4 sm:$0xff]  }
 0x4ef   : > { %v3119_v44 = vpop.xlane.xlu1 %3118  ;;  %v2659_v59 = vpop.permute.xlu0 %2658  ;;  %v7099_v40 = vld [vmem:[#allocation6 + $0x1c8] ss:$12 sps:$4 sm:$0xff]  }
 0x4f0   : > { %v3201_v45 = vsel %vm3153_vm2, %v2662_v42, 0  ;;  %7442 = vrcp.f32 %v3119_v44  ;;  %v3293_v50 = vsel %vm3153_vm2, %v2664_v43, 0  ;;  %v2668_v61 = vpack.c.bf16 %v2659_v59, %v2659_v59  ;;  %v7107_v42 = vld [vmem:[#allocation6 + $0x1e4] ss:$12 sps:$4 sm:$0xff]   ;;  %v7102_v43 = vld [vmem:[#allocation6 + $0x60] ss:$12 sps:$4 sm:$0xff]  }
 0x4f1   : > { %6477 = vmatpush3.bf16.msra.mxu1 %v3201_v45  ;;  %v7105_v44 = vld [vmem:[#allocation6 + $0x1e0] ss:$12 sps:$4 sm:$0xff]   ;;  %v7110_v45 = vld [vmem:[#allocation6 + $0x7c] ss:$12 sps:$4 sm:$0xff]  }
 0x4f2   : > { %6488 = vmatprep.subr.bf16.mxu1 %v7642_v54  ;;  %v7441_v49 = vpop.eup %7440  ;;  %v3477_v2 = vsel %vm3153_vm2, %v2668_v61, 0  ;;  %v7120_v59 = vld [vmem:[#allocation6 + $0xa8] ss:$12 sps:$4 sm:$0xff]   ;;  %v7131_v61 = vld [vmem:[#allocation6 + $0x244] ss:$12 sps:$4 sm:$0xff]  }
 0x4f3   : > { %v3137_v51 = vmul.f32 %v7441_v49, %v8032_v6  ;;  %v7108_v49 = vld [vmem:[#allocation6 + $0x78] ss:$12 sps:$4 sm:$0xff]  }
 0x4f4   : > { %6479 = vmatmul.mubr.msk.bf16.vlgmr.msra.gmra.mrb[24].mxu1 %vm3053_vm4, %v3143_v47  ;;  %v7113_v47 = vld [vmem:[#allocation6 + $0x1fc] ss:$12 sps:$4 sm:$0xff]  }
 0x4f5   : > { %6489 = vmatpush3.bf16.msra.mxu1 %v3293_v50  ;;  %6490 = vmatprep.mubr.msk.bf16.mxu1 %vm7643_vm0, %v7642_v54  ;;  %v3145_v55 = vpack.c.bf16 %v3137_v51, %v3137_v51  ;;  %v7111_v50 = vld [vmem:[#allocation6 + $0x1f8] ss:$12 sps:$4 sm:$0xff]   ;;  %v7116_v51 = vld [vmem:[#allocation6 + $0x94] ss:$12 sps:$4 sm:$0xff]  }
 0x4f6   : > { %6500 = vmatprep.subr.bf16.mxu1 %v7642_v54 }
 0x4f7   : > { %v3125_v52 = vpop.xlane.xlu1 %3124 }
 0x4f8   : > { %7444 = vrcp.f32 %v3125_v52  ;;  %v7119_v52 = vld [vmem:[#allocation6 + $0x214] ss:$12 sps:$4 sm:$0xff]  }
 0x4fa   : > { %v7443_v56 = vpop.eup %7442 }
 0x4fb   : > { %v2655_v57 = vpop.permute.xlu1 %2654  ;;  %v3139_v46 = vmul.f32 %v7443_v56, %v8036_v11  ;;  %v7117_v56 = vld [vmem:[#allocation6 + $0x210] ss:$12 sps:$4 sm:$0xff]  }
 0x4fc   : > { %v2666_v58 = vpack.c.bf16 %v2655_v57, %v2655_v57  ;;  %6491 = vmatmul.mubr.msk.bf16.vlgmr.msra.gmra.mrb[28].mxu1 %vm3053_vm4, %v3145_v55  ;;  %v7114_v55 = vld [vmem:[#allocation6 + $0x90] ss:$12 sps:$4 sm:$0xff]   ;;  %v7122_v57 = vld [vmem:[#allocation6 + $0xac] ss:$12 sps:$4 sm:$0xff]  }
 0x4fd   : > { %6502 = vmatprep.mubr.msk.bf16.mxu1 %vm7643_vm0, %v7642_v54  ;;  %v3147_v62 = vpack.c.bf16 %v3139_v46, %v3139_v46  ;;  %v7123_v46 = vld [vmem:[#allocation6 + $0x228] ss:$12 sps:$4 sm:$0xff]  }
 0x4fe   : > { %v3385_v60 = vsel %vm3153_vm2, %v2666_v58, 0  ;;  %v7125_v58 = vld [vmem:[#allocation6 + $0x22c] ss:$12 sps:$4 sm:$0xff]  }
 0x4ff   : > { %6501 = vmatpush3.bf16.msra.mxu1 %v3385_v60  ;;  %v7128_v60 = vld [vmem:[#allocation6 + $0xc4] ss:$12 sps:$4 sm:$0xff]  }
 0x500   : > { %6512 = vmatprep.subr.bf16.mxu1 %v7642_v54 }
 0x502   : > { %v7445_v48 = vpop.eup %7444 }
 0x503   : > { %v3141_v4 = vmul.f32 %v7445_v48, %v8040_v17  ;;  %v3247_v17 = vsel %vm3153_vm2, %v2663_v10, 0  ;;  %v7129_v48 = vld [vmem:[#allocation6 + $0x240] ss:$12 sps:$4 sm:$0xff]   ;;  %v7141_v10 = vld [vmem:[#allocation6 + $0x270] ss:$12 sps:$4 sm:$0xff]  }
 0x504   : > { %6503 = vmatmul.mubr.msk.bf16.vlgmr.msra.gmra.mrb[32].mxu1 %vm3053_vm4, %v3147_v62  ;;  %v7126_v62 = vld [vmem:[#allocation6 + $0xc0] ss:$12 sps:$4 sm:$0xff]  }
 0x505   : > { %6513 = vmatpush3.bf16.msra.mxu1 %v3477_v2  ;;  %6514 = vmatprep.mubr.msk.bf16.mxu1 %vm7643_vm0, %v7642_v54  ;;  %v3149_v5 = vpack.c.bf16 %v3141_v4, %v3141_v4  ;;  %v7134_v2 = vld [vmem:[#allocation6 + $0xdc] ss:$12 sps:$4 sm:$0xff]  }
 0x506   : > { %4224 = vmatprep.subr.bf16.mxu1 %v7083_v29  ;;  %v7137_v4 = vld [vmem:[#allocation6 + $0x25c] ss:$12 sps:$4 sm:$0xff]  }
 0x507   : > { %v7162_v29 = vld [vmem:[#allocation6 + $0x150] ss:$12 sps:$4 sm:$0xff]  }
 0x50c   : > { %6515 = vmatmul.mubr.msk.bf16.vlgmr.msra.gmra.mrb[36].mxu1 %vm3053_vm4, %v3149_v5  ;;  %v7132_v5 = vld [vmem:[#allocation6 + $0xd8] ss:$12 sps:$4 sm:$0xff]  }
 0x520   : > { %v3110_v7 = vpop.xlane.xlu0 %3109 }
 0x524   : > { %v3116_v9 = vpop.xlane.xlu0 %3115 }
 0x52c   : > { %v3104_v6 = vpop.xlane.xlu1 %3103 }
 0x52d   : > { %7446 = vrcp.f32 %v3104_v6  ;;  %v7135_v6 = vld [vmem:[#allocation6 + $0x258] ss:$12 sps:$4 sm:$0xff]  }
 0x52e   : > { %7448 = vrcp.f32 %v3110_v7  ;;  %v7140_v7 = vld [vmem:[#allocation6 + $0xf4] ss:$12 sps:$4 sm:$0xff]  }
 0x52f   : > { %7450 = vrcp.f32 %v3116_v9  ;;  %v7143_v9 = vld [vmem:[#allocation6 + $0x274] ss:$12 sps:$4 sm:$0xff]  }
 0x530   : > { %v3122_v20 = vpop.xlane.xlu1 %3121 }
 0x531   : > { %7452 = vrcp.f32 %v3122_v20  ;;  %v7155_v20 = vld [vmem:[#allocation6 + $0x2a4] ss:$12 sps:$4 sm:$0xff]  }
 0x537   : > { %v7447_v8 = vpop.eup %7446 }
 0x538   : > { %v3134_v11 = vmul.f32 %v7447_v8, %v7435_v25  ;;  %v7449_v18 = vpop.eup %7448  ;;  %v7084_v25 = vld [vmem:[#allocation6 + $0x18] ss:$12 sps:$4 sm:$0xff]   ;;  %v7138_v8 = vld [vmem:[#allocation6 + $0xf0] ss:$12 sps:$4 sm:$0xff]  }
 0x539   : > { %v3136_v19 = vmul.f32 %v7449_v18, %v8054_v28  ;;  %v7451_v38 = vpop.eup %7450  ;;  %v7080_v28 = vld [vmem:[#allocation6 + $0x4] ss:$12 sps:$4 sm:$0xff]   ;;  %v7144_v18 = vld [vmem:[#allocation6 + $0x108] ss:$12 sps:$4 sm:$0xff]  }
 0x53a   : > { %v3142_v13 = vpack.c.bf16 %v3134_v11, %v3134_v11  ;;  %v3138_v22 = vmul.f32 %v7451_v38, %v8058_v31  ;;  %v7081_v31 = vld [vmem:[#allocation6 + $0x180] ss:$12 sps:$4 sm:$0xff]  }
 0x53b   : > { %v3144_v53 = vpack.c.bf16 %v3136_v19, %v3136_v19  ;;  %v7453_v63 = vpop.eup %7452  ;;  %4225 = vmatpush1.bf16.msra.mxu1 %v7081_v31  ;;  %v7146_v11 = vld [vmem:[#allocation6 + $0x10c] ss:$12 sps:$4 sm:$0xff]   ;;  %v7152_v19 = vld [vmem:[#allocation6 + $0x124] ss:$12 sps:$4 sm:$0xff]  }
 0x53c   : > { %6473 = vmatmul.mubr.msk.bf16.vlgmr.msra.gmra.mrb[36].mxu0 %vm3053_vm4, %v3142_v13  ;;  %v3146_v26 = vpack.c.bf16 %v3138_v22, %v3138_v22  ;;  %v3140_v16 = vmul.f32 %v7453_v63, %v8063_v33  ;;  %4226 = vmatprep.subr.bf16.mxu1 %v7089_v30  ;;  %v7092_v33 = vld [vmem:[#allocation6 + $0x34] ss:$12 sps:$4 sm:$0xff]   ;;  %v7149_v13 = vld [vmem:[#allocation6 + $0x28c] ss:$12 sps:$4 sm:$0xff]   ;;  %v7161_v63 = vld [vmem:[#allocation6 + $0x2bc] ss:$12 sps:$4 sm:$0xff]  }
 0x53d   : > { %6483 = vmatpush3.bf16.msra.mxu0 %v3247_v17  ;;  %6484 = vmatprep.mubr.msk.bf16.mxu0 %vm7643_vm0, %v7642_v54  ;;  %v7147_v17 = vld [vmem:[#allocation6 + $0x288] ss:$12 sps:$4 sm:$0xff]   ;;  %v7150_v38 = vld [vmem:[#allocation6 + $0x120] ss:$12 sps:$4 sm:$0xff]  }
 0x53e   : > { %6494 = vmatprep.subr.bf16.mxu0 %v7642_v54  ;;  %v3148_v27 = vpack.c.bf16 %v3140_v16, %v3140_v16  ;;  %v7159_v16 = vld [vmem:[#allocation6 + $0x2b8] ss:$12 sps:$4 sm:$0xff]   ;;  %v7167_v30 = vld [vmem:[#allocation6 + $0x2d4] ss:$12 sps:$4 sm:$0xff]  }
 0x53f   : > { %4227 = vmatpush1.bf16.msra.mxu1 %v7087_v32  ;;  %v7168_v32 = vld [vmem:[#allocation6 + $0x168] ss:$12 sps:$4 sm:$0xff]  }
 0x540   : > { %4228 = vmatprep.subr.bf16.mxu1 %v7095_v34  ;;  %v7171_v34 = vld [vmem:[#allocation6 + $0x2e8] ss:$12 sps:$4 sm:$0xff]  }
 0x543   : > { %4229 = vmatpush1.bf16.msra.mxu1 %v7093_v36 }
 0x544   : > { %6485 = vmatmul.mubr.msk.bf16.vlgmr.msra.gmra.mrb[40].mxu0 %vm3053_vm4, %v3144_v53  ;;  %4230 = vmatprep.subr.bf16.mxu1 %v7101_v37 }
 0x545   : > { %6495 = vmatpush3.bf16.msra.mxu0 %v3339_v21  ;;  %6496 = vmatprep.mubr.msk.bf16.mxu0 %vm7643_vm0, %v7642_v54  ;;  %v7153_v21 = vld [vmem:[#allocation6 + $0x2a0] ss:$12 sps:$4 sm:$0xff]  }
 0x546   : > { %6506 = vmatprep.subr.bf16.mxu0 %v7642_v54 }
 0x547   : > { %4231 = vmatpush1.bf16.msra.mxu1 %v7099_v40  ;;  %v7174_v40 = vld [vmem:[#allocation6 + $0xc8] ss:$12 sps:$4 sm:$0xff]  }
 0x548   : > { %4232 = vmatprep.subr.bf16.mxu1 %v7107_v42 }
 0x54b   : > { %4233 = vmatpush1.bf16.msra.mxu1 %v7105_v44 }
 0x54c   : > { %6497 = vmatmul.mubr.msk.bf16.vlgmr.msra.gmra.mrb[44].mxu0 %vm3053_vm4, %v3146_v26  ;;  %4234 = vmatprep.subr.bf16.mxu1 %v7113_v47  ;;  %v7158_v26 = vld [vmem:[#allocation6 + $0x13c] ss:$12 sps:$4 sm:$0xff]  }
 0x54d   : > { %6507 = vmatpush3.bf16.msra.mxu0 %v3431_v14  ;;  %6508 = vmatprep.mubr.msk.bf16.mxu0 %vm7643_vm0, %v7642_v54  ;;  %v7156_v14 = vld [vmem:[#allocation6 + $0x138] ss:$12 sps:$4 sm:$0xff]  }
 0x54e   : > { %4183 = vmatprep.subr.bf16.mxu0 %v7080_v28 }
 0x54f   : > { %4235 = vmatpush1.bf16.msra.mxu1 %v7111_v50 }
 0x550   : > { %4236 = vmatprep.subr.bf16.mxu1 %v7119_v52 }
 0x553   : > { %4237 = vmatpush1.bf16.msra.mxu1 %v7117_v56 }
 0x554   : > { %6509 = vmatmul.mubr.msk.bf16.vlgmr.msra.gmra.mrb[48].mxu0 %vm3053_vm4, %v3148_v27  ;;  %4238 = vmatprep.subr.bf16.mxu1 %v7125_v58 }
 0x555   : > { %4184 = vmatpush1.bf16.msra.mxu0 %v7078_v24  ;;  %v7164_v24 = vld [vmem:[#allocation6 + $0x154] ss:$12 sps:$4 sm:$0xff]  }
 0x556   : > { %4185 = vmatprep.subr.bf16.mxu0 %v7086_v1  ;;  %v7165_v1 = vld [vmem:[#allocation6 + $0x2d0] ss:$12 sps:$4 sm:$0xff]  }
 0x557   : > { %4239 = vmatpush1.bf16.msra.mxu1 %v7123_v46 }
 0x558   : > { %4240 = vmatprep.subr.bf16.mxu1 %v7131_v61 }
 0x559   : > { %4186 = vmatpush1.bf16.msra.mxu0 %v7084_v25 }
 0x55a   : > { %4187 = vmatprep.subr.bf16.mxu0 %v7092_v33  ;;  %v7170_v33 = vld [vmem:[#allocation6 + $0x16c] ss:$12 sps:$4 sm:$0xff]  }
 0x55b   : > { %4241 = vmatpush1.bf16.msra.mxu1 %v7129_v48 }
 0x55c   : > { %4242 = vmatprep.subr.bf16.mxu1 %v7137_v4 }
 0x55d   : > { %4188 = vmatpush1.bf16.msra.mxu0 %v7090_v35  ;;  %v7173_v35 = vld [vmem:[#allocation6 + $0x2ec] ss:$12 sps:$4 sm:$0xff]  }
 0x55e   : > { %4189 = vmatprep.subr.bf16.mxu0 %v7098_v12 }
 0x55f   : > { %4243 = vmatpush1.bf16.msra.mxu1 %v7135_v6 }
 0x560   : > { %4244 = vmatprep.subr.bf16.mxu1 %v7143_v9 }
 0x561   : > { %4190 = vmatpush1.bf16.msra.mxu0 %v7096_v39 }
 0x562   : > { %4191 = vmatprep.subr.bf16.mxu0 %v7104_v41  ;;  %v7175_v41 = vld [vmem:[#allocation6 + $0x248] ss:$12 sps:$4 sm:$0xff]  }
 0x563   : > { %4245 = vmatpush1.bf16.msra.mxu1 %v7141_v10 }
 0x564   : > { %4246 = vmatprep.subr.bf16.mxu1 %v7149_v13 }
 0x565   : > { %4192 = vmatpush1.bf16.msra.mxu0 %v7102_v43 }
 0x566   : > { %4193 = vmatprep.subr.bf16.mxu0 %v7110_v45 }
 0x567   : > { %4247 = vmatpush1.bf16.msra.mxu1 %v7147_v17 }
 0x568   : > { %4248 = vmatprep.subr.bf16.mxu1 %v7155_v20 }
 0x569   : > { %4194 = vmatpush1.bf16.msra.mxu0 %v7108_v49 }
 0x56a   : > { %4195 = vmatprep.subr.bf16.mxu0 %v7116_v51 }
 0x56b   : > { %4249 = vmatpush1.bf16.msra.mxu1 %v7153_v21 }
 0x56c   : > { %4250 = vmatprep.subr.bf16.mxu1 %v7161_v63  ;;  %v7180_v63 = vld [vmem:[#allocation6 + $0x20] ss:$12 sps:$4 sm:$0xff]  }
 0x56d   : > { %4196 = vmatpush1.bf16.msra.mxu0 %v7114_v55 }
 0x56e   : > { %4197 = vmatprep.subr.bf16.mxu0 %v7122_v57 }
 0x56f   : > { %4251 = vmatpush1.bf16.msra.mxu1 %v7159_v16  ;;  %v7182_v16 = vld [vmem:[#allocation6 + $0xf8] ss:$12 sps:$4 sm:$0xff]  }
 0x570   : > { %4252 = vmatprep.subr.bf16.mxu1 %v7167_v30  ;;  %v7189_v30 = vld [vmem:[#allocation6 + $0x1d0] ss:$12 sps:$4 sm:$0xff]  }
 0x571   : > { %4198 = vmatpush1.bf16.msra.mxu0 %v7120_v59 }
 0x572   : > { %4199 = vmatprep.subr.bf16.mxu0 %v7128_v60 }
 0x573   : > { %4253 = vmatpush1.bf16.msra.mxu1 %v7165_v1  ;;  %v7188_v1 = vld [vmem:[#allocation6 + $0x50] ss:$12 sps:$4 sm:$0xff]  }
 0x574   : > { %4254 = vmatprep.subr.bf16.mxu1 %v7173_v35  ;;  %v7194_v35 = vld [vmem:[#allocation6 + $0x140] ss:$12 sps:$4 sm:$0xff]  }
 0x575   : > { %4200 = vmatpush1.bf16.msra.mxu0 %v7126_v62 }
 0x576   : > { %4201 = vmatprep.subr.bf16.mxu0 %v7134_v2 }
 0x577   : > { %4255 = vmatpush1.bf16.msra.mxu1 %v7171_v34  ;;  %v7193_v34 = vld [vmem:[#allocation6 + $0x1e8] ss:$12 sps:$4 sm:$0xff]  }
 0x578   : > { %6398 = vmatprep.subr.bf16.mxu1 %v7175_v41  ;;  %v7200_v41 = vld [vmem:[#allocation6 + $0x98] ss:$12 sps:$4 sm:$0xff]  }
 0x579   : > { %4202 = vmatpush1.bf16.msra.mxu0 %v7132_v5 }
 0x57a   : > { %4203 = vmatprep.subr.bf16.mxu0 %v7140_v7 }
 0x57d   : > { %4204 = vmatpush1.bf16.msra.mxu0 %v7138_v8 }
 0x57e   : > { %4205 = vmatprep.subr.bf16.mxu0 %v7146_v11 }
 0x581   : > { %4206 = vmatpush1.bf16.msra.mxu0 %v7144_v18 }
 0x582   : > { %4207 = vmatprep.subr.bf16.mxu0 %v7152_v19 }
 0x585   : > { %4208 = vmatpush1.bf16.msra.mxu0 %v7150_v38  ;;  %v7177_v38 = vld [vmem:[#allocation6 + $0x188] ss:$12 sps:$4 sm:$0xff]  }
 0x586   : > { %4209 = vmatprep.subr.bf16.mxu0 %v7158_v26  ;;  %v7179_v26 = vld [vmem:[#allocation6 + $0x260] ss:$12 sps:$4 sm:$0xff]  }
 0x589   : > { %4210 = vmatpush1.bf16.msra.mxu0 %v7156_v14  ;;  %v7181_v14 = vld [vmem:[#allocation6 + $0x1a0] ss:$12 sps:$4 sm:$0xff]  }
 0x58a   : > { %4211 = vmatprep.subr.bf16.mxu0 %v7164_v24  ;;  %v7186_v24 = vld [vmem:[#allocation6 + $0x110] ss:$12 sps:$4 sm:$0xff]  }
 0x58d   : > { %4212 = vmatpush1.bf16.msra.mxu0 %v7162_v29  ;;  %v7185_v29 = vld [vmem:[#allocation6 + $0x1b8] ss:$12 sps:$4 sm:$0xff]  }
 0x58e   : > { %4213 = vmatprep.subr.bf16.mxu0 %v7170_v33  ;;  %v7192_v33 = vld [vmem:[#allocation6 + $0x68] ss:$12 sps:$4 sm:$0xff]  }
 0x591   : > { %4214 = vmatpush1.bf16.msra.mxu0 %v7168_v32  ;;  %v7191_v32 = vld [vmem:[#allocation6 + $0x2a8] ss:$12 sps:$4 sm:$0xff]  }
 0x592   : > { %6376 = vmatprep.subr.bf16.mxu0 %v7174_v40  ;;  %v7199_v40 = vld [vmem:[#allocation6 + $0x2d8] ss:$12 sps:$4 sm:$0xff]  }
 0x5c7   : > { %v3237_v15 = vpop.f32.mrb[24].mxu1 }
 0x5c8   : > { %v6480_v53 = vpop.f32.mrb[25].mxu1 }
 0x5c9   : > { %v3240_v22 = vpop.f32.mrb[26].mxu1  ;;  %v7176_v53 = vld [vmem:[#allocation6 + $0x8] ss:$12 sps:$4 sm:$0xff]  }
 0x5ca   : > { %v6481_v23 = vpop.f32.mrb[27].mxu1 }
 0x5cb   : > { %v7178_v23 = vld [vmem:[#allocation6 + $0xe0] ss:$12 sps:$4 sm:$0xff]  }
 0x5cf   : > { %v3329_v27 = vpop.f32.mrb[28].mxu1 }
 0x5d0   : > { %v6492_v28 = vpop.f32.mrb[29].mxu1 }
 0x5d1   : > { %v3332_v31 = vpop.f32.mrb[30].mxu1  ;;  %v7184_v28 = vld [vmem:[#allocation6 + $0x38] ss:$12 sps:$4 sm:$0xff]  }
 0x5d2   : > { %v6493_v25 = vpop.f32.mrb[31].mxu1  ;;  %v7187_v31 = vld [vmem:[#allocation6 + $0x290] ss:$12 sps:$4 sm:$0xff]  }
 0x5d3   : > { %v7190_v25 = vld [vmem:[#allocation6 + $0x128] ss:$12 sps:$4 sm:$0xff]  }
 0x5d7   : > { %v3421_v36 = vpop.f32.mrb[32].mxu1 }
 0x5d8   : > { %v6641_v12 = vpack.i.bf16 %v3421_v36, %v3237_v15  ;;  %v6504_v37 = vpop.f32.mrb[33].mxu1  ;;  %v7195_v36 = vld [vmem:[#allocation6 + $0x2c0] ss:$12 sps:$4 sm:$0xff]  }
 0x5d9   : > { %v3424_v39 = vpop.f32.mrb[34].mxu1  ;;  %v7197_v37 = vld [vmem:[#allocation6 + $0x200] ss:$12 sps:$4 sm:$0xff]  }
 0x5da   : > { %6642 = vrot.lane.b32.xlu1 %v6641_v12, %s7644_s23  ;;  %v6505_v42 = vpop.f32.mrb[35].mxu1  ;;  %v7196_v12 = vld [vmem:[#allocation6 + $0x80] ss:$12 sps:$4 sm:$0xff]   ;;  %v7198_v39 = vld [vmem:[#allocation6 + $0x158] ss:$12 sps:$4 sm:$0xff]  }
 0x5db   : > { %v7201_v42 = vld [vmem:[#allocation6 + $0x218] ss:$12 sps:$4 sm:$0xff]  }
 0x5df   : > { %v3513_v43 = vpop.f32.mrb[36].mxu1 }
 0x5e0   : > { %v6636_v44 = vpack.i.bf16 %v3513_v43, %v3329_v27  ;;  %v6516_v45 = vpop.f32.mrb[37].mxu1  ;;  %v7183_v27 = vld [vmem:[#allocation6 + $0x278] ss:$12 sps:$4 sm:$0xff]   ;;  %v7202_v43 = vld [vmem:[#allocation6 + $0x170] ss:$12 sps:$4 sm:$0xff]  }
 0x5e1   : > { %v3516_v47 = vpop.f32.mrb[38].mxu1  ;;  %v7204_v45 = vld [vmem:[#allocation6 + $0xb0] ss:$12 sps:$4 sm:$0xff]  }
 0x5e2   : > { %6637 = vrot.lane.b32.xlu0 %v6636_v44, %s7644_s23  ;;  %v6517_v49 = vpop.f32.mrb[39].mxu1  ;;  %v7203_v44 = vld [vmem:[#allocation6 + $0x2f0] ss:$12 sps:$4 sm:$0xff]  }
 0x5e3   : > { %v7205_v47 = vld [vmem:[#allocation6 + $0x230] ss:$12 sps:$4 sm:$0xff]   ;;  %v8131_v49 = vshrl.u32 %v3038_v3, 7  ;;  %v7454_v3 = vld [vmem:[%s7869_s16] sm:$0xff] }
 0x60f   : > { %v3191_v50 = vpop.f32.mrb[36].mxu0 }
 0x610   : > { %v6474_v51 = vpop.f32.mrb[37].mxu0 }
 0x611   : > { %v3194_v52 = vpop.f32.mrb[38].mxu0  ;;  %v8134_v51 = vld [vmem:[#allocation8] sm:$0x7] }
 0x612   : > { %v6475_v55 = vpop.f32.mrb[39].mxu0  ;;  %v4352_v52 = vsub.s32 0, %v8131_v49 }
 0x617   : > { %v3283_v56 = vpop.f32.mrb[40].mxu0 }
 0x618   : > { %v6486_v57 = vpop.f32.mrb[41].mxu0 }
 0x619   : > { %v3286_v58 = vpop.f32.mrb[42].mxu0 }
 0x61a   : > { %v6487_v59 = vpop.f32.mrb[43].mxu0 }
 0x61f   : > { %v3375_v46 = vpop.f32.mrb[44].mxu0 }
 0x620   : > { %v6498_v60 = vpop.f32.mrb[45].mxu0 }
 0x621   : > { %v3378_v61 = vpop.f32.mrb[46].mxu0 }
 0x622   : > { %v6499_v62 = vpop.f32.mrb[47].mxu0 }
 0x627   : > { %v3467_v48 = vpop.f32.mrb[48].mxu0 }
 0x628   : > { %v6510_v2 = vpop.f32.mrb[49].mxu0 }
 0x629   : > { %v3470_v4 = vpop.f32.mrb[50].mxu0 }
 0x62a   : > { %v6511_v5 = vpop.f32.mrb[51].mxu0 }
 0x62b   : > { %v7455_v5 = vld [vmem:[%s7869_s16 + $0x8] sm:$0xff] }
 0x64c   : > { %v6643_v6 = vpop.permute.xlu1 %6642 }
 0x64d   : > { %v6645_v7 = vunpack.i.h.bf16 %v6643_v6  ;;  %v6644_v9 = vunpack.i.l.bf16 %v6643_v6 }
 0x64f   : > { %v3537_v13 = vsel %vm2669_vm1, %v3375_v46, %v6645_v7  ;;  %v3535_v18 = vsel %vm2669_vm1, %v3191_v50, %v6644_v9  ;;  %v4356_v50 = vsub.s32 1, %v8131_v49  ;;  %v7208_v9 = vld [vmem:[#allocation9 + $0x4] ss:$24 sps:$4 sm:$0xff]  }
 0x650   : > { %v8118_v21 = vpack.c.bf16 %v3537_v13, %v3537_v13  ;;  %v8120_v22 = vpack.c.bf16 %v3535_v18, %v3535_v18  ;;  %v7211_v13 = vld [vmem:[#allocation9 + $0x34] ss:$24 sps:$4 sm:$0xff]   ;;  %v7209_v18 = vld [vmem:[#allocation9 + $0x30] ss:$24 sps:$4 sm:$0xff]  }
 0x654   : > { %v6638_v8 = vpop.permute.xlu0 %6637 }
 0x655   : > { %v6640_v10 = vunpack.i.h.bf16 %v6638_v8  ;;  %v6639_v11 = vunpack.i.l.bf16 %v6638_v8 }
 0x657   : > { %v3536_v17 = vsel %vm2669_vm1, %v3283_v56, %v6639_v11  ;;  %v3538_v19 = vsel %vm2669_vm1, %v3467_v48, %v6640_v10  ;;  %v4353_v48 = vrot.slane %v8134_v51, %v4352_v52  ;;  %v4368_v10 = vld [vmem:[%s364_s20] sm:$0x7]  ;;  %v7206_v11 = vld [vmem:[#allocation9] ss:$24 sps:$4 sm:$0xff]  }
 0x658   : > { %v3540_v20 = vpack.c.bf16 %v3536_v17, %v3536_v17  ;;  %v3542_v15 = vpack.c.bf16 %v3538_v19, %v3538_v19  ;;  %v7214_v17 = vld [vmem:[#allocation9 + $0x64] ss:$24 sps:$4 sm:$0xff]   ;;  %v7212_v19 = vld [vmem:[#allocation9 + $0x60] ss:$24 sps:$4 sm:$0xff]  }
 0x65a   : > { %4215 = vmatprep.mubr.bf16.mxu0 %v3540_v20  ;;  %4256 = vmatprep.mubr.bf16.mxu1 %v3542_v15 }
 0x65b   : > { %4216 = vmatmul.mubr.bf16.vlgmr.msra.gmra.mrb[52].mxu0 %v8120_v22  ;;  %4257 = vmatmul.mubr.bf16.vlgmr.msra.gmra.mrb[40].mxu1 %v8118_v21 }
 0x65c   : > { %6377 = vmatpush3.bf16.msra.mxu0 %v7176_v53  ;;  %6399 = vmatpush3.bf16.msra.mxu1 %v7177_v38  ;;  %v7220_v53 = vld [vmem:[#allocation9 + $0xc4] ss:$24 sps:$4 sm:$0xff]   ;;  %v7218_v38 = vld [vmem:[#allocation9 + $0xc0] ss:$24 sps:$4 sm:$0xff]  }
 0x65d   : > { %4297 = vmatprep.mubr.bf16.mxu0 %v3540_v20  ;;  %4337 = vmatprep.mubr.bf16.mxu1 %v3542_v15  ;;  %v7217_v20 = vld [vmem:[#allocation9 + $0x94] ss:$24 sps:$4 sm:$0xff]   ;;  %v7215_v15 = vld [vmem:[#allocation9 + $0x90] ss:$24 sps:$4 sm:$0xff]  }
 0x65e   : > { %6378 = vmatprep.subr.bf16.mxu0 %v7178_v23  ;;  %6400 = vmatprep.subr.bf16.mxu1 %v7179_v26  ;;  %v7226_v23 = vld [vmem:[#allocation9 + $0x124] ss:$24 sps:$4 sm:$0xff]   ;;  %v7224_v26 = vld [vmem:[#allocation9 + $0x120] ss:$24 sps:$4 sm:$0xff]  }
 0x660   : > { %6379 = vmatpush3.bf16.msra.mxu0 %v7180_v63  ;;  %6401 = vmatpush3.bf16.msra.mxu1 %v7181_v14 }
 0x661   : > { %6380 = vmatprep.subr.bf16.mxu0 %v7182_v16  ;;  %6402 = vmatprep.subr.bf16.mxu1 %v7183_v27  ;;  %v4360_v16 = vsub.s32 2, %v8131_v49  ;;  %v7229_v27 = vld [vmem:[#allocation9 + $0x154] ss:$24 sps:$4 sm:$0xff]  }
 0x664   : > { %6381 = vmatpush3.bf16.msra.mxu0 %v7184_v28  ;;  %6403 = vmatpush3.bf16.msra.mxu1 %v7185_v29 }
 0x665   : > { %6382 = vmatprep.subr.bf16.mxu0 %v7186_v24  ;;  %6404 = vmatprep.subr.bf16.mxu1 %v7187_v31 }
 0x668   : > { %6383 = vmatpush3.bf16.msra.mxu0 %v7188_v1  ;;  %6405 = vmatpush3.bf16.msra.mxu1 %v7189_v30 }
 0x669   : > { %6384 = vmatprep.subr.bf16.mxu0 %v7190_v25  ;;  %6406 = vmatprep.subr.bf16.mxu1 %v7191_v32 }
 0x66c   : > { %6385 = vmatpush3.bf16.msra.mxu0 %v7192_v33  ;;  %6407 = vmatpush3.bf16.msra.mxu1 %v7193_v34  ;;  %v7227_v33 = vld [vmem:[#allocation9 + $0x150] ss:$24 sps:$4 sm:$0xff]  }
 0x66d   : > { %6386 = vmatprep.subr.bf16.mxu0 %v7194_v35  ;;  %6408 = vmatprep.subr.bf16.mxu1 %v7195_v36  ;;  %v4361_v35 = vrot.slane %v8134_v51, %v4360_v16  ;;  %v7232_v36 = vld [vmem:[#allocation9 + $0x184] ss:$24 sps:$4 sm:$0xff]  }
 0x670   : > { %6387 = vmatpush3.bf16.msra.mxu0 %v7196_v12  ;;  %6409 = vmatpush3.bf16.msra.mxu1 %v7197_v37  ;;  %v7456_v12 = vld [vmem:[%s7869_s16 + $0x10] sm:$0xff] }
 0x671   : > { %6388 = vmatprep.subr.bf16.mxu0 %v7198_v39  ;;  %6410 = vmatprep.subr.bf16.mxu1 %v7199_v40  ;;  %v7230_v39 = vld [vmem:[#allocation9 + $0x180] ss:$24 sps:$4 sm:$0xff]  }
 0x674   : > { %6389 = vmatpush3.bf16.msra.mxu0 %v7200_v41  ;;  %6411 = vmatpush3.bf16.msra.mxu1 %v7201_v42  ;;  %v7235_v41 = vld [vmem:[#allocation9 + $0x1b4] ss:$24 sps:$4 sm:$0xff]   ;;  %v7233_v42 = vld [vmem:[#allocation9 + $0x1b0] ss:$24 sps:$4 sm:$0xff]  }
 0x675   : > { %6390 = vmatprep.subr.bf16.mxu0 %v7202_v43  ;;  %6412 = vmatprep.subr.bf16.mxu1 %v7203_v44  ;;  %v7238_v43 = vld [vmem:[#allocation9 + $0x1e4] ss:$24 sps:$4 sm:$0xff]   ;;  %v7236_v44 = vld [vmem:[#allocation9 + $0x1e0] ss:$24 sps:$4 sm:$0xff]  }
 0x678   : > { %6391 = vmatpush3.bf16.msra.mxu0 %v7204_v45  ;;  %6413 = vmatpush3.bf16.msra.mxu1 %v7205_v47  ;;  %v7241_v45 = vld [vmem:[#allocation9 + $0x214] ss:$24 sps:$4 sm:$0xff]   ;;  %v7239_v47 = vld [vmem:[#allocation9 + $0x210] ss:$24 sps:$4 sm:$0xff]  }
 0x679   : > { %6518 = vmatprep.subr.mxu1 %v7642_v54 }
 0x67b   : > { %4298 = vmatmul.mubr.bf16.vlgmr.msra.gmra.mrb[56].mxu0 %v8120_v22  ;;  %4338 = vmatmul.mubr.bf16.vlgmr.msra.gmra.mrb[44].mxu1 %v8118_v21  ;;  %v7223_v21 = vld [vmem:[#allocation9 + $0xf4] ss:$24 sps:$4 sm:$0xff]   ;;  %v7221_v22 = vld [vmem:[#allocation9 + $0xf0] ss:$24 sps:$4 sm:$0xff]  }
 0x67c   : > { %4436 = vmatprep.mubr.f32.mxu0 %v7642_v54  ;;  %6520 = vmatprep.mubr.msk.f32.mxu1 %vm7643_vm0, %v7642_v54  ;;  %v4357_v54 = vrot.slane %v8134_v51, %v4356_v50  ;;  %v7244_v51 = vld [vmem:[#allocation9 + $0x244] ss:$24 sps:$4 sm:$0xff]  }
 0x72e   : > { %v4217_v55 = vpop.f32.mrb[52].mxu0  ;;  %v4258_v56 = vpop.f32.mrb[40].mxu1 }
 0x72f   : > { %v4259_v57 = vadd.f32 %v4258_v56, %v4217_v55  ;;  %v4219_v58 = vpop.f32.mrb[53].mxu0  ;;  %v4260_v59 = vpop.f32.mrb[41].mxu1  ;;  %v7242_v55 = vld [vmem:[#allocation9 + $0x240] ss:$24 sps:$4 sm:$0xff]   ;;  %v7247_v56 = vld [vmem:[#allocation9 + $0x274] ss:$24 sps:$4 sm:$0xff]  }
 0x730   : > { %v4261_v46 = vadd.f32 %v4260_v59, %v4219_v58  ;;  %v4221_v60 = vpop.f32.mrb[54].mxu0  ;;  %v4262_v61 = vpop.f32.mrb[42].mxu1  ;;  %v7250_v58 = vld [vmem:[#allocation9 + $0x2a4] ss:$24 sps:$4 sm:$0xff]   ;;  %v7248_v59 = vld [vmem:[#allocation9 + $0x2a0] ss:$24 sps:$4 sm:$0xff]  }
 0x731   : > { %v4345_v62 = vadd.f32 %v7454_v3, %v4259_v57  ;;  %v4222_v2 = vpop.f32.mrb[55].mxu0  ;;  %v4263_v4 = vpop.f32.mrb[43].mxu1  ;;  %v7245_v57 = vld [vmem:[#allocation9 + $0x270] ss:$24 sps:$4 sm:$0xff]   ;;  %v7256_v61 = vld [vmem:[#allocation9 + $0x304] ss:$24 sps:$4 sm:$0xff]  }
 0x732   : > { %v4346_v6 = vadd.f32 %v7455_v5, %v4261_v46  ;;  %v7253_v46 = vld [vmem:[#allocation9 + $0x2d4] ss:$24 sps:$4 sm:$0xff]   ;;  %v7251_v60 = vld [vmem:[#allocation9 + $0x2d0] ss:$24 sps:$4 sm:$0xff]   ;;  %v7268_v2 = vld [vmem:[#allocation9 + $0x364] ss:$24 sps:$4 sm:$0xff]  }
 0x733   : > { %v4365_v8 = vadd.f32 %v4353_v48, %v4345_v62  ;;  %v7259_v3 = vld [vmem:[#allocation9 + $0x30c] ss:$24 sps:$4 sm:$0xff]   ;;  %v7260_v48 = vld [vmem:[#allocation9 + $0x330] ss:$24 sps:$4 sm:$0xff]   ;;  %v7266_v4 = vld [vmem:[#allocation9 + $0x360] ss:$24 sps:$4 sm:$0xff]  }
 0x734   : > { %v4366_v7 = vadd.f32 %v4357_v54, %v4346_v6  ;;  %v7254_v54 = vld [vmem:[#allocation9 + $0x300] ss:$24 sps:$4 sm:$0xff]   ;;  %v7262_v62 = vld [vmem:[#allocation9 + $0x334] ss:$24 sps:$4 sm:$0xff]   ;;  %v7272_v6 = vld [vmem:[#allocation9 + $0x390] ss:$24 sps:$4 sm:$0xff]  }
 0x735   : > { %v7274_v5 = vld [vmem:[#allocation9 + $0x394] ss:$24 sps:$4 sm:$0xff]  }
 0x736   : > { %4372 = vmatprep.subr.mxu0 %v4366_v7  ;;  %v7280_v7 = vld [vmem:[#allocation9 + $0x3c4] ss:$24 sps:$4 sm:$0xff]  }
 0x737   : > { %4373 = vmatpush1.msra.mxu0 %v4365_v8  ;;  %v7286_v8 = vld [vmem:[#allocation9 + $0x3f4] ss:$24 sps:$4 sm:$0xff]  }
 0x738   : > { %6196 = vmatmul.mubr.msk.f32.vlgmr.msra.gmra.mrb[60].mxu0 %vm3053_vm4, %v4368_v10  ;;  %5383 = vmatprep.subr.bf16.mxu0 %v7208_v9  ;;  %v7278_v9 = vld [vmem:[#allocation9 + $0x3c0] ss:$24 sps:$4 sm:$0xff]  }
 0x739   : > { %5384 = vmatpush1.bf16.msra.mxu0 %v7206_v11  ;;  %v7292_v11 = vld [vmem:[#allocation9 + $0x424] ss:$24 sps:$4 sm:$0xff]  }
 0x73a   : > { %5385 = vmatprep.subr.bf16.mxu0 %v7211_v13  ;;  %v7290_v13 = vld [vmem:[#allocation9 + $0x420] ss:$24 sps:$4 sm:$0xff]  }
 0x73d   : > { %5386 = vmatpush1.bf16.msra.mxu0 %v7209_v18  ;;  %v7298_v18 = vld [vmem:[#allocation9 + $0x454] ss:$24 sps:$4 sm:$0xff]  }
 0x73e   : > { %5387 = vmatprep.subr.bf16.mxu0 %v7214_v17  ;;  %v7296_v17 = vld [vmem:[#allocation9 + $0x450] ss:$24 sps:$4 sm:$0xff]  }
 0x741   : > { %5388 = vmatpush1.bf16.msra.mxu0 %v7212_v19  ;;  %v7304_v19 = vld [vmem:[#allocation9 + $0xc] ss:$24 sps:$4 sm:$0xff]  }
 0x742   : > { %5389 = vmatprep.subr.bf16.mxu0 %v7217_v20 }
 0x745   : > { %5390 = vmatpush1.bf16.msra.mxu0 %v7215_v15 }
 0x746   : > { %5391 = vmatprep.subr.bf16.mxu0 %v7220_v53 }
 0x749   : > { %5392 = vmatpush1.bf16.msra.mxu0 %v7218_v38 }
 0x74a   : > { %5393 = vmatprep.subr.bf16.mxu0 %v7223_v21 }
 0x74d   : > { %5394 = vmatpush1.bf16.msra.mxu0 %v7221_v22  ;;  %v7257_v22 = vld [vmem:[#allocation9 + $0x308] ss:$24 sps:$4 sm:$0xff]  }
 0x74e   : > { %v6392_v63 = vpop.f32.mrb[56].mxu0  ;;  %v6414_v14 = vpop.f32.mrb[44].mxu1  ;;  %5395 = vmatprep.subr.bf16.mxu0 %v7226_v23 }
 0x74f   : > { %v6393_v28 = vpop.f32.mrb[57].mxu0  ;;  %v6415_v29 = vpop.f32.mrb[45].mxu1 }
 0x750   : > { %v6394_v24 = vadd.f32 %v6393_v28, %v6392_v63  ;;  %v6416_v31 = vadd.f32 %v6415_v29, %v6414_v14  ;;  %v6395_v1 = vpop.f32.mrb[58].mxu0  ;;  %v6417_v30 = vpop.f32.mrb[46].mxu1  ;;  %v7263_v63 = vld [vmem:[#allocation9 + $0x338] ss:$24 sps:$4 sm:$0xff]   ;;  %v7271_v14 = vld [vmem:[#allocation9 + $0x36c] ss:$24 sps:$4 sm:$0xff]  }
 0x751   : > { %v6396_v25 = vpop.f32.mrb[59].mxu0  ;;  %v6418_v32 = vpop.f32.mrb[47].mxu1  ;;  %5396 = vmatpush1.bf16.msra.mxu0 %v7224_v26  ;;  %v7265_v26 = vld [vmem:[#allocation9 + $0x33c] ss:$24 sps:$4 sm:$0xff]   ;;  %v7275_v29 = vld [vmem:[#allocation9 + $0x398] ss:$24 sps:$4 sm:$0xff]  }
 0x752   : > { %v4340_v34 = vadd.f32 %v6416_v31, %v6394_v24  ;;  %5397 = vmatprep.subr.bf16.mxu0 %v7229_v27  ;;  %v7269_v27 = vld [vmem:[#allocation9 + $0x368] ss:$24 sps:$4 sm:$0xff]   ;;  %v7277_v28 = vld [vmem:[#allocation9 + $0x39c] ss:$24 sps:$4 sm:$0xff]   ;;  %v7283_v24 = vld [vmem:[#allocation9 + $0x3cc] ss:$24 sps:$4 sm:$0xff]  }
 0x753   : > { %v7281_v31 = vld [vmem:[#allocation9 + $0x3c8] ss:$24 sps:$4 sm:$0xff]   ;;  %v7289_v1 = vld [vmem:[#allocation9 + $0x3fc] ss:$24 sps:$4 sm:$0xff]   ;;  %v7287_v30 = vld [vmem:[#allocation9 + $0x3f8] ss:$24 sps:$4 sm:$0xff]  }
 0x754   : > { %v4347_v37 = vadd.f32 %v7456_v12, %v4340_v34  ;;  %v7295_v25 = vld [vmem:[#allocation9 + $0x42c] ss:$24 sps:$4 sm:$0xff]   ;;  %v7293_v32 = vld [vmem:[#allocation9 + $0x428] ss:$24 sps:$4 sm:$0xff]   ;;  %v7299_v34 = vld [vmem:[#allocation9 + $0x458] ss:$24 sps:$4 sm:$0xff]  }
 0x755   : > { %5398 = vmatpush1.bf16.msra.mxu0 %v7227_v33  ;;  %v7301_v33 = vld [vmem:[#allocation9 + $0x45c] ss:$24 sps:$4 sm:$0xff]  }
 0x756   : > { %v4367_v40 = vadd.f32 %v4361_v35, %v4347_v37  ;;  %5399 = vmatprep.subr.bf16.mxu0 %v7232_v36  ;;  %v7307_v36 = vld [vmem:[#allocation9 + $0x14] ss:$24 sps:$4 sm:$0xff]  }
 0x758   : > { %6519 = vmatpush3.msra.mxu1 %v4367_v40 }
 0x759   : > { %6521 = vmatmul.mubr.msk.f32.vlgmr.msra.gmra.mrb[48].mxu1 %vm3053_vm4, %v4368_v10  ;;  %5400 = vmatpush1.bf16.msra.mxu0 %v7230_v39  ;;  %v7284_v10 = vld [vmem:[#allocation9 + $0x3f0] ss:$24 sps:$4 sm:$0xff]  }
 0x75a   : > { %5401 = vmatprep.subr.bf16.mxu0 %v7235_v41  ;;  %5456 = vmatprep.mubr.bf16.mxu1 %v7641_v0  ;;  %v7302_v39 = vld [vmem:[#allocation9 + $0x8] ss:$24 sps:$4 sm:$0xff]   ;;  %v7310_v41 = vld [vmem:[#allocation9 + $0x3c] ss:$24 sps:$4 sm:$0xff]  }
 0x75b   : > { %5424 = vmatprep.subr.bf16.mxu1 %v7256_v61  ;;  %v7331_v61 = vld [vmem:[#allocation9 + $0xd4] ss:$24 sps:$4 sm:$0xff]  }
 0x75c   : > { %5425 = vmatpush1.bf16.msra.mxu1 %v7254_v54  ;;  %v7326_v54 = vld [vmem:[#allocation9 + $0xc8] ss:$24 sps:$4 sm:$0xff]  }
 0x75d   : > { %5402 = vmatpush1.bf16.msra.mxu0 %v7233_v42  ;;  %5426 = vmatprep.subr.bf16.mxu1 %v7262_v62  ;;  %v7305_v42 = vld [vmem:[#allocation9 + $0x10] ss:$24 sps:$4 sm:$0xff]  }
 0x75e   : > { %5403 = vmatprep.subr.bf16.mxu0 %v7238_v43  ;;  %v7313_v43 = vld [vmem:[#allocation9 + $0x44] ss:$24 sps:$4 sm:$0xff]   ;;  %v7329_v62 = vld [vmem:[#allocation9 + $0xd0] ss:$24 sps:$4 sm:$0xff]  }
 0x760   : > { %5427 = vmatpush1.bf16.msra.mxu1 %v7260_v48  ;;  %v7337_v48 = vld [vmem:[#allocation9 + $0x104] ss:$24 sps:$4 sm:$0xff]  }
 0x761   : > { %5404 = vmatpush1.bf16.msra.mxu0 %v7236_v44  ;;  %5428 = vmatprep.subr.bf16.mxu1 %v7268_v2  ;;  %v7308_v44 = vld [vmem:[#allocation9 + $0x38] ss:$24 sps:$4 sm:$0xff]  }
 0x762   : > { %5405 = vmatprep.subr.bf16.mxu0 %v7241_v45  ;;  %v7316_v45 = vld [vmem:[#allocation9 + $0x6c] ss:$24 sps:$4 sm:$0xff]   ;;  %v7332_v2 = vld [vmem:[#allocation9 + $0xf8] ss:$24 sps:$4 sm:$0xff]  }
 0x764   : > { %5429 = vmatpush1.bf16.msra.mxu1 %v7266_v4  ;;  %v7340_v4 = vld [vmem:[#allocation9 + $0x12c] ss:$24 sps:$4 sm:$0xff]  }
 0x765   : > { %5406 = vmatpush1.bf16.msra.mxu0 %v7239_v47  ;;  %5430 = vmatprep.subr.bf16.mxu1 %v7274_v5  ;;  %v7311_v47 = vld [vmem:[#allocation9 + $0x40] ss:$24 sps:$4 sm:$0xff]  }
 0x766   : > { %5407 = vmatprep.subr.bf16.mxu0 %v7244_v51  ;;  %v7319_v51 = vld [vmem:[#allocation9 + $0x74] ss:$24 sps:$4 sm:$0xff]   ;;  %v7335_v5 = vld [vmem:[#allocation9 + $0x100] ss:$24 sps:$4 sm:$0xff]  }
 0x768   : > { %5431 = vmatpush1.bf16.msra.mxu1 %v7272_v6  ;;  %v7343_v6 = vld [vmem:[#allocation9 + $0x134] ss:$24 sps:$4 sm:$0xff]  }
 0x769   : > { %5408 = vmatpush1.bf16.msra.mxu0 %v7242_v55  ;;  %5432 = vmatprep.subr.bf16.mxu1 %v7280_v7  ;;  %v7314_v55 = vld [vmem:[#allocation9 + $0x68] ss:$24 sps:$4 sm:$0xff]  }
 0x76a   : > { %5409 = vmatprep.subr.bf16.mxu0 %v7247_v56  ;;  %v7322_v56 = vld [vmem:[#allocation9 + $0x9c] ss:$24 sps:$4 sm:$0xff]   ;;  %v7338_v7 = vld [vmem:[#allocation9 + $0x128] ss:$24 sps:$4 sm:$0xff]  }
 0x76c   : > { %5433 = vmatpush1.bf16.msra.mxu1 %v7278_v9  ;;  %v7346_v9 = vld [vmem:[#allocation9 + $0x15c] ss:$24 sps:$4 sm:$0xff]  }
 0x76d   : > { %5410 = vmatpush1.bf16.msra.mxu0 %v7245_v57  ;;  %5434 = vmatprep.subr.bf16.mxu1 %v7286_v8  ;;  %v7317_v57 = vld [vmem:[#allocation9 + $0x70] ss:$24 sps:$4 sm:$0xff]  }
 0x76e   : > { %5411 = vmatprep.subr.bf16.mxu0 %v7250_v58  ;;  %v7325_v58 = vld [vmem:[#allocation9 + $0xa4] ss:$24 sps:$4 sm:$0xff]   ;;  %v7341_v8 = vld [vmem:[#allocation9 + $0x130] ss:$24 sps:$4 sm:$0xff]  }
 0x770   : > { %5435 = vmatpush1.bf16.msra.mxu1 %v7284_v10  ;;  %v7349_v10 = vld [vmem:[#allocation9 + $0x164] ss:$24 sps:$4 sm:$0xff]  }
 0x771   : > { %5412 = vmatpush1.bf16.msra.mxu0 %v7248_v59  ;;  %5436 = vmatprep.subr.bf16.mxu1 %v7292_v11  ;;  %v7320_v59 = vld [vmem:[#allocation9 + $0x98] ss:$24 sps:$4 sm:$0xff]  }
 0x772   : > { %5413 = vmatprep.subr.bf16.mxu0 %v7253_v46  ;;  %v7328_v46 = vld [vmem:[#allocation9 + $0xcc] ss:$24 sps:$4 sm:$0xff]   ;;  %v7344_v11 = vld [vmem:[#allocation9 + $0x158] ss:$24 sps:$4 sm:$0xff]  }
 0x774   : > { %5437 = vmatpush1.bf16.msra.mxu1 %v7290_v13  ;;  %v7352_v13 = vld [vmem:[#allocation9 + $0x18c] ss:$24 sps:$4 sm:$0xff]  }
 0x775   : > { %5414 = vmatpush1.bf16.msra.mxu0 %v7251_v60  ;;  %5438 = vmatprep.subr.bf16.mxu1 %v7298_v18  ;;  %v7323_v60 = vld [vmem:[#allocation9 + $0xa0] ss:$24 sps:$4 sm:$0xff]  }
 0x776   : > { %5506 = vmatprep.subr.bf16.mxu0 %v7259_v3  ;;  %v7334_v3 = vld [vmem:[#allocation9 + $0xfc] ss:$24 sps:$4 sm:$0xff]   ;;  %v7347_v18 = vld [vmem:[#allocation9 + $0x160] ss:$24 sps:$4 sm:$0xff]  }
 0x778   : > { %5439 = vmatpush1.bf16.msra.mxu1 %v7296_v17  ;;  %v7355_v17 = vld [vmem:[#allocation9 + $0x194] ss:$24 sps:$4 sm:$0xff]  }
 0x779   : > { %5465 = vmatprep.subr.bf16.mxu1 %v7304_v19  ;;  %v7350_v19 = vld [vmem:[#allocation9 + $0x188] ss:$24 sps:$4 sm:$0xff]  }
 0x80b   : > { %v4438_v20 = vpop.f32.mrb[60].mxu0 }
 0x80c   : > { %v4513_v15 = vmul.f32 0.083333336, %v4438_v20  ;;  %v4440_v53 = vpop.f32.mrb[61].mxu0  ;;  %v7358_v20 = vld [vmem:[#allocation9 + $0x1bc] ss:$24 sps:$4 sm:$0xff]  }
 0x80d   : > { %v4514_v38 = vmul.f32 0.083333336, %v4440_v53  ;;  %v7361_v53 = vld [vmem:[#allocation9 + $0x1c4] ss:$24 sps:$4 sm:$0xff]  }
 0x80e   : > { %v8157_v23 = vpack.c.bf16 %v4513_v15, %v4513_v15  ;;  %v7353_v15 = vld [vmem:[#allocation9 + $0x190] ss:$24 sps:$4 sm:$0xff]  }
 0x80f   : > { %v4517_v21 = vpack.c.bf16 %v4514_v38, %v4514_v38  ;;  %v7356_v38 = vld [vmem:[#allocation9 + $0x1b8] ss:$24 sps:$4 sm:$0xff]  }
 0x811   : > { %5415 = vmatprep.mubr.bf16.mxu0 %v4517_v21 }
 0x812   : > { %5416 = vmatmul.mubr.bf16.vlgmr.msra.gmra.mrb[64].mxu0 %v8157_v23 }
 0x813   : > { %5507 = vmatpush1.bf16.msra.mxu0 %v7257_v22  ;;  %5538 = vmatprep.mubr.bf16.mxu0 %v7641_v0  ;;  %v7359_v22 = vld [vmem:[#allocation9 + $0x1c0] ss:$24 sps:$4 sm:$0xff]  }
 0x814   : > { %5508 = vmatprep.subr.bf16.mxu0 %v7265_v26  ;;  %v7367_v26 = vld [vmem:[#allocation9 + $0x1f4] ss:$24 sps:$4 sm:$0xff]  }
 0x817   : > { %5509 = vmatpush1.bf16.msra.mxu0 %v7263_v63  ;;  %v7362_v63 = vld [vmem:[#allocation9 + $0x1e8] ss:$24 sps:$4 sm:$0xff]  }
 0x818   : > { %5510 = vmatprep.subr.bf16.mxu0 %v7271_v14  ;;  %v7370_v14 = vld [vmem:[#allocation9 + $0x21c] ss:$24 sps:$4 sm:$0xff]  }
 0x81b   : > { %5511 = vmatpush1.bf16.msra.mxu0 %v7269_v27  ;;  %v7365_v27 = vld [vmem:[#allocation9 + $0x1f0] ss:$24 sps:$4 sm:$0xff]  }
 0x81c   : > { %5512 = vmatprep.subr.bf16.mxu0 %v7277_v28  ;;  %v7373_v28 = vld [vmem:[#allocation9 + $0x224] ss:$24 sps:$4 sm:$0xff]  }
 0x81f   : > { %5513 = vmatpush1.bf16.msra.mxu0 %v7275_v29  ;;  %v7368_v29 = vld [vmem:[#allocation9 + $0x218] ss:$24 sps:$4 sm:$0xff]  }
 0x820   : > { %5514 = vmatprep.subr.bf16.mxu0 %v7283_v24  ;;  %v7376_v24 = vld [vmem:[#allocation9 + $0x24c] ss:$24 sps:$4 sm:$0xff]  }
 0x823   : > { %5515 = vmatpush1.bf16.msra.mxu0 %v7281_v31  ;;  %v7371_v31 = vld [vmem:[#allocation9 + $0x220] ss:$24 sps:$4 sm:$0xff]  }
 0x824   : > { %5516 = vmatprep.subr.bf16.mxu0 %v7289_v1  ;;  %v7379_v1 = vld [vmem:[#allocation9 + $0x254] ss:$24 sps:$4 sm:$0xff]  }
 0x827   : > { %5517 = vmatpush1.bf16.msra.mxu0 %v7287_v30  ;;  %v7374_v30 = vld [vmem:[#allocation9 + $0x248] ss:$24 sps:$4 sm:$0xff]  }
 0x828   : > { %5518 = vmatprep.subr.bf16.mxu0 %v7295_v25  ;;  %v7382_v25 = vld [vmem:[#allocation9 + $0x27c] ss:$24 sps:$4 sm:$0xff]  }
 0x82b   : > { %5519 = vmatpush1.bf16.msra.mxu0 %v7293_v32  ;;  %v7377_v32 = vld [vmem:[#allocation9 + $0x250] ss:$24 sps:$4 sm:$0xff]  }
 0x82c   : > { %v4509_v35 = vpop.f32.mrb[48].mxu1  ;;  %5520 = vmatprep.subr.bf16.mxu0 %v7301_v33  ;;  %v7385_v33 = vld [vmem:[#allocation9 + $0x284] ss:$24 sps:$4 sm:$0xff]  }
 0x82d   : > { %v4515_v12 = vmul.f32 0.083333336, %v4509_v35  ;;  %v6522_v37 = vpop.f32.mrb[49].mxu1  ;;  %v7388_v35 = vld [vmem:[#allocation9 + $0x2ac] ss:$24 sps:$4 sm:$0xff]  }
 0x82e   : > { %v7386_v37 = vld [vmem:[#allocation9 + $0x2a8] ss:$24 sps:$4 sm:$0xff]  }
 0x82f   : > { %v8161_v40 = vpack.c.bf16 %v4515_v12, %v4515_v12  ;;  %5521 = vmatpush1.bf16.msra.mxu0 %v7299_v34  ;;  %v7380_v34 = vld [vmem:[#allocation9 + $0x278] ss:$24 sps:$4 sm:$0xff]   ;;  %v7391_v12 = vld [vmem:[#allocation9 + $0x2b4] ss:$24 sps:$4 sm:$0xff]  }
 0x830   : > { %5547 = vmatprep.subr.bf16.mxu0 %v7307_v36  ;;  %v7383_v36 = vld [vmem:[#allocation9 + $0x280] ss:$24 sps:$4 sm:$0xff]  }
 0x831   : > { %5457 = vmatmul.mubr.bf16.vlgmr.msra.gmra.mrb[52].mxu1 %v8161_v40 }
 0x832   : > { %5466 = vmatpush1.bf16.msra.mxu1 %v7302_v39  ;;  %5497 = vmatprep.mubr.bf16.mxu1 %v4517_v21  ;;  %v7394_v39 = vld [vmem:[#allocation9 + $0x2dc] ss:$24 sps:$4 sm:$0xff]  }
 0x833   : > { %5539 = vmatmul.mubr.bf16.vlgmr.msra.gmra.mrb[68].mxu0 %v8161_v40  ;;  %5467 = vmatprep.subr.bf16.mxu1 %v7310_v41  ;;  %v7389_v41 = vld [vmem:[#allocation9 + $0x2b0] ss:$24 sps:$4 sm:$0xff]  }
 0x834   : > { %5548 = vmatpush1.bf16.msra.mxu0 %v7305_v42  ;;  %5579 = vmatprep.mubr.bf16.mxu0 %v4517_v21  ;;  %v7364_v21 = vld [vmem:[#allocation9 + $0x1ec] ss:$24 sps:$4 sm:$0xff]  }
 0x835   : > { %5549 = vmatprep.subr.bf16.mxu0 %v7313_v43  ;;  %v7397_v42 = vld [vmem:[#allocation9 + $0x2e4] ss:$24 sps:$4 sm:$0xff]   ;;  %v7392_v43 = vld [vmem:[#allocation9 + $0x2d8] ss:$24 sps:$4 sm:$0xff]  }
 0x836   : > { %5468 = vmatpush1.bf16.msra.mxu1 %v7308_v44  ;;  %v7395_v44 = vld [vmem:[#allocation9 + $0x2e0] ss:$24 sps:$4 sm:$0xff]  }
 0x837   : > { %5469 = vmatprep.subr.bf16.mxu1 %v7316_v45  ;;  %v7400_v45 = vld [vmem:[#allocation9 + $0x314] ss:$24 sps:$4 sm:$0xff]  }
 0x838   : > { %5550 = vmatpush1.bf16.msra.mxu0 %v7311_v47  ;;  %v7398_v47 = vld [vmem:[#allocation9 + $0x310] ss:$24 sps:$4 sm:$0xff]  }
 0x839   : > { %5551 = vmatprep.subr.bf16.mxu0 %v7319_v51  ;;  %v7403_v51 = vld [vmem:[#allocation9 + $0x344] ss:$24 sps:$4 sm:$0xff]  }
 0x83a   : > { %5470 = vmatpush1.bf16.msra.mxu1 %v7314_v55  ;;  %v7401_v55 = vld [vmem:[#allocation9 + $0x340] ss:$24 sps:$4 sm:$0xff]  }
 0x83b   : > { %5471 = vmatprep.subr.bf16.mxu1 %v7322_v56  ;;  %v7406_v56 = vld [vmem:[#allocation9 + $0x374] ss:$24 sps:$4 sm:$0xff]  }
 0x83c   : > { %5552 = vmatpush1.bf16.msra.mxu0 %v7317_v57  ;;  %v7404_v57 = vld [vmem:[#allocation9 + $0x370] ss:$24 sps:$4 sm:$0xff]  }
 0x83d   : > { %5553 = vmatprep.subr.bf16.mxu0 %v7325_v58  ;;  %v7409_v58 = vld [vmem:[#allocation9 + $0x3a4] ss:$24 sps:$4 sm:$0xff]  }
 0x83e   : > { %5472 = vmatpush1.bf16.msra.mxu1 %v7320_v59  ;;  %v7407_v59 = vld [vmem:[#allocation9 + $0x3a0] ss:$24 sps:$4 sm:$0xff]  }
 0x83f   : > { %5473 = vmatprep.subr.bf16.mxu1 %v7328_v46  ;;  %v7412_v46 = vld [vmem:[#allocation9 + $0x3d4] ss:$24 sps:$4 sm:$0xff]  }
 0x840   : > { %5554 = vmatpush1.bf16.msra.mxu0 %v7323_v60  ;;  %v7410_v60 = vld [vmem:[#allocation9 + $0x3d0] ss:$24 sps:$4 sm:$0xff]  }
 0x841   : > { %5555 = vmatprep.subr.bf16.mxu0 %v7331_v61  ;;  %v7415_v61 = vld [vmem:[#allocation9 + $0x404] ss:$24 sps:$4 sm:$0xff]  }
 0x842   : > { %5474 = vmatpush1.bf16.msra.mxu1 %v7326_v54  ;;  %v7418_v54 = vld [vmem:[#allocation9 + $0x434] ss:$24 sps:$4 sm:$0xff]  }
 0x843   : > { %5475 = vmatprep.subr.bf16.mxu1 %v7334_v3  ;;  %v7421_v3 = vld [vmem:[#allocation9 + $0x464] ss:$24 sps:$4 sm:$0xff]  }
 0x844   : > { %5556 = vmatpush1.bf16.msra.mxu0 %v7329_v62  ;;  %v7419_v62 = vld [vmem:[#allocation9 + $0x460] ss:$24 sps:$4 sm:$0xff]  }
 0x845   : > { %5557 = vmatprep.subr.bf16.mxu0 %v7337_v48 }
 0x846   : > { %5476 = vmatpush1.bf16.msra.mxu1 %v7332_v2 }
 0x847   : > { %5477 = vmatprep.subr.bf16.mxu1 %v7340_v4 }
 0x848   : > { %5558 = vmatpush1.bf16.msra.mxu0 %v7335_v5 }
 0x849   : > { %5559 = vmatprep.subr.bf16.mxu0 %v7343_v6 }
 0x84a   : > { %5478 = vmatpush1.bf16.msra.mxu1 %v7338_v7 }
 0x84b   : > { %5479 = vmatprep.subr.bf16.mxu1 %v7346_v9 }
 0x84c   : > { %5560 = vmatpush1.bf16.msra.mxu0 %v7341_v8 }
 0x84d   : > { %5561 = vmatprep.subr.bf16.mxu0 %v7349_v10 }
 0x84e   : > { %5480 = vmatpush1.bf16.msra.mxu1 %v7344_v11 }
 0x84f   : > { %5481 = vmatprep.subr.bf16.mxu1 %v7352_v13 }
 0x850   : > { %5562 = vmatpush1.bf16.msra.mxu0 %v7347_v18 }
 0x851   : > { %5563 = vmatprep.subr.bf16.mxu0 %v7355_v17 }
 0x852   : > { %5482 = vmatpush1.bf16.msra.mxu1 %v7350_v19 }
 0x853   : > { %5483 = vmatprep.subr.bf16.mxu1 %v7358_v20 }
 0x854   : > { %5564 = vmatpush1.bf16.msra.mxu0 %v7353_v15 }
 0x855   : > { %5565 = vmatprep.subr.bf16.mxu0 %v7361_v53 }
 0x856   : > { %5484 = vmatpush1.bf16.msra.mxu1 %v7356_v38 }
 0x857   : > { %5485 = vmatprep.subr.bf16.mxu1 %v7364_v21 }
 0x858   : > { %5566 = vmatpush1.bf16.msra.mxu0 %v7359_v22 }
 0x859   : > { %5567 = vmatprep.subr.bf16.mxu0 %v7367_v26 }
 0x85a   : > { %5486 = vmatpush1.bf16.msra.mxu1 %v7362_v63  ;;  %v5635_v63 = vld [vmem:[#allocation11] sm:$0x7] }
 0x85b   : > { %5487 = vmatprep.subr.bf16.mxu1 %v7370_v14 }
 0x85c   : > { %5568 = vmatpush1.bf16.msra.mxu0 %v7365_v27  ;;  %v5640_v27 = vrot.slane %v5635_v63, %v4352_v52 }
 0x85d   : > { %5569 = vmatprep.subr.bf16.mxu0 %v7373_v28 }
 0x85e   : > { %5488 = vmatpush1.bf16.msra.mxu1 %v7368_v29  ;;  %v5644_v29 = vrot.slane %v5635_v63, %v4356_v50 }
 0x85f   : > { %5489 = vmatprep.subr.bf16.mxu1 %v7376_v24 }
 0x860   : > { %5570 = vmatpush1.bf16.msra.mxu0 %v7371_v31 }
 0x861   : > { %5571 = vmatprep.subr.bf16.mxu0 %v7379_v1  ;;  %v5648_v1 = vrot.slane %v5635_v63, %v4360_v16 }
 0x862   : > { %5490 = vmatpush1.bf16.msra.mxu1 %v7374_v30 }
 0x863   : > { %5491 = vmatprep.subr.bf16.mxu1 %v7382_v25 }
 0x864   : > { %5572 = vmatpush1.bf16.msra.mxu0 %v7377_v32 }
 0x865   : > { %5573 = vmatprep.subr.bf16.mxu0 %v7385_v33 }
 0x866   : > { %5492 = vmatpush1.bf16.msra.mxu1 %v7380_v34 }
 0x867   : > { %5493 = vmatprep.subr.bf16.mxu1 %v7388_v35 }
 0x868   : > { %5574 = vmatpush1.bf16.msra.mxu0 %v7383_v36 }
 0x869   : > { %5575 = vmatprep.subr.bf16.mxu0 %v7391_v12 }
 0x86a   : > { %5494 = vmatpush1.bf16.msra.mxu1 %v7386_v37 }
 0x86b   : > { %5495 = vmatprep.subr.bf16.mxu1 %v7394_v39 }
 0x86c   : > { %5576 = vmatpush1.bf16.msra.mxu0 %v7389_v41 }
 0x86d   : > { %5577 = vmatprep.subr.bf16.mxu0 %v7397_v42 }
 0x86e   : > { %5496 = vmatpush1.bf16.msra.mxu1 %v7392_v43 }
 0x870   : > { %5578 = vmatpush1.bf16.msra.mxu0 %v7395_v44 }
 0x871   : > { %5498 = vmatmul.mubr.bf16.vlgmr.msra.gmra.mrb[56].mxu1 %v8157_v23  ;;  %5588 = vmatprep.subr.bf16.mxu0 %v7400_v45 }
 0x873   : > { %5580 = vmatmul.mubr.bf16.vlgmr.msra.gmra.mrb[72].mxu0 %v8157_v23  ;;  %v7413_v23 = vld [vmem:[#allocation9 + $0x400] ss:$24 sps:$4 sm:$0xff]  }
 0x874   : > { %5589 = vmatpush1.bf16.msra.mxu0 %v7398_v47  ;;  %5620 = vmatprep.mubr.bf16.mxu0 %v7641_v0  ;;  %v7416_v0 = vld [vmem:[#allocation9 + $0x430] ss:$24 sps:$4 sm:$0xff]  }
 0x875   : > { %5590 = vmatprep.subr.bf16.mxu0 %v7403_v51 }
 0x878   : > { %5591 = vmatpush1.bf16.msra.mxu0 %v7401_v55 }
 0x879   : > { %5592 = vmatprep.subr.bf16.mxu0 %v7406_v56 }
 0x87c   : > { %5593 = vmatpush1.bf16.msra.mxu0 %v7404_v57 }
 0x87d   : > { %5594 = vmatprep.subr.bf16.mxu0 %v7409_v58 }
 0x880   : > { %5595 = vmatpush1.bf16.msra.mxu0 %v7407_v59 }
 0x881   : > { %5596 = vmatprep.subr.bf16.mxu0 %v7412_v46 }
 0x884   : > { %5597 = vmatpush1.bf16.msra.mxu0 %v7410_v60 }
 0x885   : > { %5598 = vmatprep.subr.bf16.mxu0 %v7415_v61 }
 0x888   : > { %5599 = vmatpush1.bf16.msra.mxu0 %v7413_v23 }
 0x889   : > { %5600 = vmatprep.subr.bf16.mxu0 %v7418_v54 }
 0x88c   : > { %5601 = vmatpush1.bf16.msra.mxu0 %v7416_v0 }
 0x88d   : > { %5602 = vmatprep.subr.bf16.mxu0 %v7421_v3 }
 0x890   : > { %5603 = vmatpush1.bf16.msra.mxu0 %v7419_v62 }
 0x893   : > { %5621 = vmatmul.mubr.bf16.vlgmr.msra.gmra.mrb[72].mxu0 %v8161_v40 }
 0x8e5   : > { %v5417_v48 = vpop.f32.mrb[64].mxu0 }
 0x8e6   : > { %v5419_v2 = vpop.f32.mrb[65].mxu0 }
 0x8e7   : > { %v5421_v4 = vpop.f32.mrb[66].mxu0 }
 0x8e8   : > { %v5422_v5 = vpop.f32.mrb[67].mxu0 }
 0x904   : > { %v5458_v6 = vpop.f32.mrb[52].mxu1 }
 0x905   : > { %v5459_v7 = vadd.f32 %v5458_v6, %v5417_v48  ;;  %v5460_v9 = vpop.f32.mrb[53].mxu1 }
 0x906   : > { %v5461_v8 = vadd.f32 %v5460_v9, %v5419_v2  ;;  %v5540_v10 = vpop.f32.mrb[68].mxu0  ;;  %v5462_v11 = vpop.f32.mrb[54].mxu1 }
 0x907   : > { %v5542_v13 = vpop.f32.mrb[69].mxu0  ;;  %v5463_v18 = vpop.f32.mrb[55].mxu1 }
 0x908   : > { %v5544_v17 = vpop.f32.mrb[70].mxu0 }
 0x909   : > { %v5545_v19 = vpop.f32.mrb[71].mxu0 }
 0x944   : > { %v5499_v20 = vpop.f32.mrb[56].mxu1 }
 0x945   : > { %v5541_v15 = vadd.f32 %v5540_v10, %v5499_v20  ;;  %v5501_v53 = vpop.f32.mrb[57].mxu1 }
 0x946   : > { %v5543_v38 = vadd.f32 %v5542_v13, %v5501_v53  ;;  %v5503_v40 = vpop.f32.mrb[58].mxu1 }
 0x947   : > { %v5504_v21 = vpop.f32.mrb[59].mxu1 }
 0x948   : > { %v5629_v22 = vmul.f32 1e-05, %v5543_v38 }
 0x94a   : > { %v5632_v26 = vadd.f32 %v5629_v22, %v5459_v7 }
 0x94c   : > { %v5652_v34 = vadd.f32 %v5640_v27, %v5632_v26 }
 0x966   : > { %v5622_v14 = vpop.f32.mrb[72].mxu0 }
 0x967   : > { %v5630_v28 = vmul.f32 1e-05, %v5622_v14  ;;  %v5624_v24 = vpop.f32.mrb[73].mxu0 }
 0x968   : > { %v5631_v31 = vmul.f32 1e-05, %v5624_v24  ;;  %v5626_v30 = vpop.f32.mrb[74].mxu0 }
 0x969   : > { %v5633_v25 = vadd.f32 %v5630_v28, %v5461_v8  ;;  %v5627_v32 = vpop.f32.mrb[75].mxu0 }
 0x96a   : > { %v5634_v33 = vadd.f32 %v5631_v31, %v5541_v15 }
 0x96b   : > { %v5653_v52 = vadd.f32 %v5644_v29, %v5633_v25 }
 0x96c   : > { %v5654_v35 = vadd.f32 %v5648_v1, %v5634_v33 }
 0x96d   : > { %v5657_v36 = vcombine.low %v5652_v34, %v5653_v52 }
 0x96e   : > { %5660 = vst [vmem:[%s369_s17 + $0x8] sm:$0x7] %v5654_v35 }
 0x96f   : > { %5659 = vst [vmem:[%s369_s17] sm:$0x77] %v5657_v36 }
 0x970 PF: > { %s25_s15 = sadd.s32 1, %s7627_s15  }
 0x971   : > { %p22_p4 = scmp.ge.s32.totalorder %s25_s15, 4  }
 0x973   :  { %24 = sbr.rel (!%p22_p4) target bundleno = 15 (0xf), region = 102 }
 0x97a   :  { %5682 = vsyncpa [#allocation5], 1 }
 0x97b   :  { %5684 = vsyncpa [#allocation5 + $0x1], 1 }
 0x97c   :  { %5685 = vsyncpa [#allocation7], 1 }
 0x97d   :  { %5686 = vsyncpa [#allocation10], 1 }

</bundles_post_ra>
